<compile_context>
chip_gen: v7x
topology: tpu7x:2x2x1
jax: 0.10.0
libtpu: 0.0.40
codegen_flags: <defaults>
</compile_context>

<pallas_src>
import jax
import jax.numpy as jnp
from jax.experimental import pallas as pl
from jax.experimental.pallas import tpu as pltpu

# ----------------------------- config ---------------------------------------
B = 2            # batch
S = 8            # sequence length
H = 32           # hidden size (hparams.bert_output / encoder_size)
NH = 4           # attention heads
D = H // NH      # head dim
FFN = 64         # intermediate size
L = 2            # encoder layers
VOCAB = 100      # vocab size
NUM_OUT = 4      # hparams.num_output
LN_EPS = 1e-5
ATTN_SCALE = 1.0 / (D ** 0.5)

# ------------------------- packed-slab layout --------------------------------
# Weight slab (bfloat16, width 64, every block starts at lane 0 and at a
# 16-row (bf16 tile) boundary).  Per-layer block:
WQ_OFF = 0                       # head h: rows [h*H, h*H+H), cols [0, D)
WK_OFF = NH * H                  # 128
WV_OFF = 2 * NH * H              # 256
WO_OFF = 3 * NH * H              # 384, head h: rows [+h*16, +h*16+D), cols [0,H)
WO_STRIDE = 16                   # 8 real rows + 8 pad keeps 16-row alignment
WI_OFF = WO_OFF + NH * WO_STRIDE # 448, rows [.., ..+H),  cols [0, FFN)
WD_OFF = WI_OFF + H              # 480, rows [.., ..+FFN), cols [0, H)
W_LAYER_ROWS = WD_OFF + FFN      # 544
FC_OFF = L * W_LAYER_ROWS        # 1088, rows [.., ..+H), cols [0, NUM_OUT)
W_ROWS = FC_OFF + H              # 1120
W_COLS = max(FFN, H)             # 64

# Vector slab (float32, width 64): one row per bias / LN vector.
V_EMB_G, V_EMB_B = 0, 1
V_LAYER_BASE = 2
V_BQ = 0                 # + h, head-split q bias (cols 0:D)
V_BK = NH                # + h
V_BV = 2 * NH            # + h
V_BO = 3 * NH            # cols 0:H
V_LN1G, V_LN1B = 3 * NH + 1, 3 * NH + 2
V_BI = 3 * NH + 3        # cols 0:FFN
V_BD = 3 * NH + 4
V_LN2G, V_LN2B = 3 * NH + 5, 3 * NH + 6
V_LAYER_ROWS = 3 * NH + 7
V_FCB = V_LAYER_BASE + L * V_LAYER_ROWS
V_ROWS = V_FCB + 1
V_COLS = 64


# ----------------------------- fused kernel ---------------------------------
def _layernorm(h, g, b):
    mu = jnp.mean(h, axis=-1, keepdims=True)
    var = jnp.mean(jnp.square(h - mu), axis=-1, keepdims=True)
    return (h - mu) * jax.lax.rsqrt(var + LN_EPS) * g + b


def _fused_kernel(ids_ref, emb_ref, w_ref, v_ref, o_ref, x_scr):
    # --- in-kernel embedding gather: word row + precombined (pos+tt) row ---
    for t in range(B * S):
        tok = ids_ref[t]                                   # scalar from SMEM
        row = (emb_ref[pl.ds(tok, 1), :]                   # dynamic row gather
               + emb_ref[pl.ds(VOCAB + (t % S), 1), :])    # static pos+tt row
        x_scr[pl.ds(t, 1), :] = row
    x = x_scr[...]                                         # [B*S, H] f32

    # --- embedding LayerNorm ---
    x = _layernorm(x, v_ref[V_EMB_G:V_EMB_G + 1, 0:H],
                   v_ref[V_EMB_B:V_EMB_B + 1, 0:H])

    # --- encoder layers, statically unrolled ---
    for l in range(L):
        base = l * W_LAYER_ROWS
        vb = V_LAYER_BASE + l * V_LAYER_ROWS
        xb = x.astype(jnp.bfloat16)                        # MXU operands in bf16

        # ---- multi-head self-attention (head-split weights, no lane slices)
        # TODO(synk): no attention/padding mask (fixed-length synthetic setup).
        head_out = []
        for h in range(NH):
            wq_h = w_ref[base + WQ_OFF + h * H: base + WQ_OFF + h * H + H, 0:D]
            wk_h = w_ref[base + WK_OFF + h * H: base + WK_OFF + h * H + H, 0:D]
            wv_h = w_ref[base + WV_OFF + h * H: base + WV_OFF + h * H + H, 0:D]
            wo_h = w_ref[base + WO_OFF + h * WO_STRIDE:
                         base + WO_OFF + h * WO_STRIDE + D, 0:H]

            q = (jnp.dot(xb, wq_h, preferred_element_type=jnp.float32)
                 + v_ref[vb + V_BQ + h: vb + V_BQ + h + 1, 0:D])      # [B*S, D]
            k = (jnp.dot(xb, wk_h, preferred_element_type=jnp.float32)
                 + v_ref[vb + V_BK + h: vb + V_BK + h + 1, 0:D])
            vv = (jnp.dot(xb, wv_h, preferred_element_type=jnp.float32)
                  + v_ref[vb + V_BV + h: vb + V_BV + h + 1, 0:D])

            q3 = q.reshape(B, S, D).astype(jnp.bfloat16)
            k3 = k.reshape(B, S, D).astype(jnp.bfloat16)
            v3 = vv.reshape(B, S, D).astype(jnp.bfloat16)

            s = jnp.einsum("bqd,bkd->bqk", q3, k3,
                           preferred_element_type=jnp.float32) * ATTN_SCALE
            m = jnp.max(s, axis=-1, keepdims=True)
            p = jnp.exp(s - m)
            p = p * pl.reciprocal(jnp.sum(p, axis=-1, keepdims=True),
                                  approx=True)              # EUP slot
            ctx = jnp.einsum("bqk,bkd->bqd", p.astype(jnp.bfloat16), v3,
                             preferred_element_type=jnp.float32)       # [B,S,D]
            ctx2 = ctx.reshape(B * S, D).astype(jnp.bfloat16)
            # independent per-head output-projection dots (summed below)
            head_out.append(jnp.dot(ctx2, wo_h,
                                    preferred_element_type=jnp.float32))

        attn = head_out[0]
        for h in range(1, NH):
            attn = attn + head_out[h]
        attn = attn + v_ref[vb + V_BO: vb + V_BO + 1, 0:H]

        # add & norm (attention)
        x = _layernorm(attn + x,
                       v_ref[vb + V_LN1G: vb + V_LN1G + 1, 0:H],
                       v_ref[vb + V_LN1B: vb + V_LN1B + 1, 0:H])

        # ---- FFN: matmul -> GELU -> matmul -> residual -> LayerNorm ----
        xb2 = x.astype(jnp.bfloat16)
        wi = w_ref[base + WI_OFF: base + WI_OFF + H, 0:FFN]
        wd = w_ref[base + WD_OFF: base + WD_OFF + FFN, 0:H]
        h1 = (jnp.dot(xb2, wi, preferred_element_type=jnp.float32)
              + v_ref[vb + V_BI: vb + V_BI + 1, 0:FFN])
        # TODO(synk): torch default GELU is exact erf; tanh approx maps to TPU EUP.
        g = jax.nn.gelu(h1, approximate=True)
        h2 = (jnp.dot(g.astype(jnp.bfloat16), wd,
                      preferred_element_type=jnp.float32)
              + v_ref[vb + V_BD: vb + V_BD + 1, 0:H])
        x = _layernorm(h2 + x,
                       v_ref[vb + V_LN2G: vb + V_LN2G + 1, 0:H],
                       v_ref[vb + V_LN2B: vb + V_LN2B + 1, 0:H])

    # --- select last-token rows FIRST, then FC -> sigmoid, single store ---
    x_last = jnp.concatenate(
        [x[(b + 1) * S - 1:(b + 1) * S, :] for b in range(B)], axis=0)  # [B, H]
    fc_w = w_ref[FC_OFF:FC_OFF + H, 0:NUM_OUT]
    logits = (jnp.dot(x_last.astype(jnp.bfloat16), fc_w,
                      preferred_element_type=jnp.float32)
              + v_ref[V_FCB:V_FCB + 1, 0:NUM_OUT])
    o_ref[...] = jax.nn.sigmoid(logits)                                  # [B, NUM_OUT]


@jax.jit
def xlmr_encoder_forward(ids, packed):
    ids_flat = ids.reshape(B * S).astype(jnp.int32)
    return pl.pallas_call(
        _fused_kernel,
        out_shape=jax.ShapeDtypeStruct((B, NUM_OUT), jnp.float32),
        in_specs=[
            pl.BlockSpec(memory_space=pltpu.MemorySpace.SMEM),   # token ids
            pl.BlockSpec(memory_space=pltpu.MemorySpace.VMEM),   # embedding slab
            pl.BlockSpec(memory_space=pltpu.MemorySpace.VMEM),   # bf16 weight slab
            pl.BlockSpec(memory_space=pltpu.MemorySpace.VMEM),   # f32 bias/LN slab
        ],
        out_specs=pl.BlockSpec(memory_space=pltpu.MemorySpace.VMEM),
        scratch_shapes=[pltpu.VMEM((B * S, H), jnp.float32)],
    )(ids_flat, packed["emb"], packed["w"], packed["v"])


# ----------------------------- parameters -----------------------------------
def init_params(key):
    keys = jax.random.split(key, 64)
    counter = [0]

    def w(shape):
        k = keys[counter[0]]
        counter[0] += 1
        return 0.02 * jax.random.normal(k, shape, dtype=jnp.float32)

    return {
        "word_emb": w((VOCAB, H)),
        "pos_emb": w((S, H)),
        "tt_emb": w((1, H)),
        "emb_ln_g": jnp.ones((H,), jnp.float32),
        "emb_ln_b": jnp.zeros((H,), jnp.float32),
        "fc_w": w((H, NUM_OUT)),
        "fc_b": jnp.zeros((NUM_OUT,), jnp.float32),
        "wq": jnp.stack([w((H, H)) for _ in range(L)]),
        "wk": jnp.stack([w((H, H)) for _ in range(L)]),
        "wv": jnp.stack([w((H, H)) for _ in range(L)]),
        "wo": jnp.stack([w((H, H)) for _ in range(L)]),
        "bq": jnp.zeros((L, H), jnp.float32),
        "bk": jnp.zeros((L, H), jnp.float32),
        "bv": jnp.zeros((L, H), jnp.float32),
        "bo": jnp.zeros((L, H), jnp.float32),
        "ln1_g": jnp.ones((L, H), jnp.float32),
        "ln1_b": jnp.zeros((L, H), jnp.float32),
        "wi": jnp.stack([w((H, FFN)) for _ in range(L)]),
        "bi": jnp.zeros((L, FFN), jnp.float32),
        "wd": jnp.stack([w((FFN, H)) for _ in range(L)]),
        "bd": jnp.zeros((L, H), jnp.float32),
        "ln2_g": jnp.ones((L, H), jnp.float32),
        "ln2_b": jnp.zeros((L, H), jnp.float32),
    }


def pack_params(p):
    # embedding slab: word embeddings + precombined (pos + token-type) rows
    emb = jnp.concatenate([p["word_emb"], p["pos_emb"] + p["tt_emb"]], axis=0)

    wslab = jnp.zeros((W_ROWS, W_COLS), jnp.float32)
    for l in range(L):
        base = l * W_LAYER_ROWS
        for h in range(NH):
            cs, ce = h * D, (h + 1) * D
            wslab = wslab.at[base + WQ_OFF + h * H: base + WQ_OFF + h * H + H,
                             0:D].set(p["wq"][l][:, cs:ce])
            wslab = wslab.at[base + WK_OFF + h * H: base + WK_OFF + h * H + H,
                             0:D].set(p["wk"][l][:, cs:ce])
            wslab = wslab.at[base + WV_OFF + h * H: base + WV_OFF + h * H + H,
                             0:D].set(p["wv"][l][:, cs:ce])
            wslab = wslab.at[base + WO_OFF + h * WO_STRIDE:
                             base + WO_OFF + h * WO_STRIDE + D,
                             0:H].set(p["wo"][l][cs:ce, :])
        wslab = wslab.at[base + WI_OFF: base + WI_OFF + H, 0:FFN].set(p["wi"][l])
        wslab = wslab.at[base + WD_OFF: base + WD_OFF + FFN, 0:H].set(p["wd"][l])
    wslab = wslab.at[FC_OFF:FC_OFF + H, 0:NUM_OUT].set(p["fc_w"])
    wslab = wslab.astype(jnp.bfloat16)

    vslab = jnp.zeros((V_ROWS, V_COLS), jnp.float32)
    vslab = vslab.at[V_EMB_G, 0:H].set(p["emb_ln_g"])
    vslab = vslab.at[V_EMB_B, 0:H].set(p["emb_ln_b"])
    for l in range(L):
        vb = V_LAYER_BASE + l * V_LAYER_ROWS
        for h in range(NH):
            cs, ce = h * D, (h + 1) * D
            vslab = vslab.at[vb + V_BQ + h, 0:D].set(p["bq"][l][cs:ce])
            vslab = vslab.at[vb + V_BK + h, 0:D].set(p["bk"][l][cs:ce])
            vslab = vslab.at[vb + V_BV + h, 0:D].set(p["bv"][l][cs:ce])
        vslab = vslab.at[vb + V_BO, 0:H].set(p["bo"][l])
        vslab = vslab.at[vb + V_LN1G, 0:H].set(p["ln1_g"][l])
        vslab = vslab.at[vb + V_LN1B, 0:H].set(p["ln1_b"][l])
        vslab = vslab.at[vb + V_BI, 0:FFN].set(p["bi"][l])
        vslab = vslab.at[vb + V_BD, 0:H].set(p["bd"][l])
        vslab = vslab.at[vb + V_LN2G, 0:H].set(p["ln2_g"][l])
        vslab = vslab.at[vb + V_LN2B, 0:H].set(p["ln2_b"][l])
    vslab = vslab.at[V_FCB, 0:NUM_OUT].set(p["fc_b"])

    return {"emb": emb, "w": wslab, "v": vslab}


# ----------------------------- main ------------------------------------------
if __name__ == "__main__":
    key = jax.random.PRNGKey(0)
    k_ids, k_params = jax.random.split(key)
    ids = jax.random.randint(k_ids, (B, S), minval=0, maxval=VOCAB)
    params = init_params(k_params)
    packed = pack_params(params)

    out = xlmr_encoder_forward(ids, packed)
    out = jax.block_until_ready(out)

    assert out.shape == (B, NUM_OUT)
    assert bool(jnp.all((out > 0.0) & (out < 1.0)))
    print("KERNEL_OK")
</pallas_src>

<mosaic_0001>
module attributes {stable_mosaic.version = 11 : i64} {
  func.func @_fused_kernel(%arg0: memref<16xi32, #tpu.memory_space<smem>>, %arg1: memref<108x32xf32, #tpu.memory_space<vmem>>, %arg2: memref<1120x64xbf16, #tpu.memory_space<vmem>>, %arg3: memref<41x64xf32, #tpu.memory_space<vmem>>, %arg4: memref<2x4xf32, #tpu.memory_space<vmem>>, %arg5: memref<16x32xf32, #tpu.memory_space<vmem>>) attributes {dimension_semantics = [], scalar_prefetch = 0 : i64, scratch_operands = 1 : i64, tpu.core_type = #tpu.core_type<tc>} {
    %c0 = arith.constant 0 : index
    %0 = memref.load %arg0[%c0] : memref<16xi32, #tpu.memory_space<smem>>
    %1 = arith.index_cast %0 : i32 to index
    %c0_0 = arith.constant 0 : index
    %2 = vector.load %arg1[%1, %c0_0] : memref<108x32xf32, #tpu.memory_space<vmem>>, vector<1x32xf32>
    %c100 = arith.constant 100 : index
    %c0_1 = arith.constant 0 : index
    %3 = vector.load %arg1[%c100, %c0_1] : memref<108x32xf32, #tpu.memory_space<vmem>>, vector<1x32xf32>
    %4 = arith.addf %2, %3 : vector<1x32xf32>
    %c0_2 = arith.constant 0 : index
    %c0_3 = arith.constant 0 : index
    %5 = vector.load %arg5[%c0_2, %c0_3] : memref<16x32xf32, #tpu.memory_space<vmem>>, vector<1x32xf32>
    tpu.vector_store %arg5[%c0_2, %c0_3], %4 {strides = array<i32>} : memref<16x32xf32, #tpu.memory_space<vmem>>, vector<1x32xf32>,
    %c1 = arith.constant 1 : index
    %6 = memref.load %arg0[%c1] : memref<16xi32, #tpu.memory_space<smem>>
    %7 = arith.index_cast %6 : i32 to index
    %c0_4 = arith.constant 0 : index
    %8 = vector.load %arg1[%7, %c0_4] : memref<108x32xf32, #tpu.memory_space<vmem>>, vector<1x32xf32>
    %c101 = arith.constant 101 : index
    %c0_5 = arith.constant 0 : index
    %9 = vector.load %arg1[%c101, %c0_5] : memref<108x32xf32, #tpu.memory_space<vmem>>, vector<1x32xf32>
    %10 = arith.addf %8, %9 : vector<1x32xf32>
    %c1_6 = arith.constant 1 : index
    %c0_7 = arith.constant 0 : index
    %11 = vector.load %arg5[%c1_6, %c0_7] : memref<16x32xf32, #tpu.memory_space<vmem>>, vector<1x32xf32>
    tpu.vector_store %arg5[%c1_6, %c0_7], %10 {strides = array<i32>} : memref<16x32xf32, #tpu.memory_space<vmem>>, vector<1x32xf32>,
    %c2 = arith.constant 2 : index
    %12 = memref.load %arg0[%c2] : memref<16xi32, #tpu.memory_space<smem>>
    %13 = arith.index_cast %12 : i32 to index
    %c0_8 = arith.constant 0 : index
    %14 = vector.load %arg1[%13, %c0_8] : memref<108x32xf32, #tpu.memory_space<vmem>>, vector<1x32xf32>
    %c102 = arith.constant 102 : index
    %c0_9 = arith.constant 0 : index
    %15 = vector.load %arg1[%c102, %c0_9] : memref<108x32xf32, #tpu.memory_space<vmem>>, vector<1x32xf32>
    %16 = arith.addf %14, %15 : vector<1x32xf32>
    %c2_10 = arith.constant 2 : index
    %c0_11 = arith.constant 0 : index
    %17 = vector.load %arg5[%c2_10, %c0_11] : memref<16x32xf32, #tpu.memory_space<vmem>>, vector<1x32xf32>
    tpu.vector_store %arg5[%c2_10, %c0_11], %16 {strides = array<i32>} : memref<16x32xf32, #tpu.memory_space<vmem>>, vector<1x32xf32>,
    %c3 = arith.constant 3 : index
    %18 = memref.load %arg0[%c3] : memref<16xi32, #tpu.memory_space<smem>>
    %19 = arith.index_cast %18 : i32 to index
    %c0_12 = arith.constant 0 : index
    %20 = vector.load %arg1[%19, %c0_12] : memref<108x32xf32, #tpu.memory_space<vmem>>, vector<1x32xf32>
    %c103 = arith.constant 103 : index
    %c0_13 = arith.constant 0 : index
    %21 = vector.load %arg1[%c103, %c0_13] : memref<108x32xf32, #tpu.memory_space<vmem>>, vector<1x32xf32>
    %22 = arith.addf %20, %21 : vector<1x32xf32>
    %c3_14 = arith.constant 3 : index
    %c0_15 = arith.constant 0 : index
    %23 = vector.load %arg5[%c3_14, %c0_15] : memref<16x32xf32, #tpu.memory_space<vmem>>, vector<1x32xf32>
    tpu.vector_store %arg5[%c3_14, %c0_15], %22 {strides = array<i32>} : memref<16x32xf32, #tpu.memory_space<vmem>>, vector<1x32xf32>,
    %c4 = arith.constant 4 : index
    %24 = memref.load %arg0[%c4] : memref<16xi32, #tpu.memory_space<smem>>
    %25 = arith.index_cast %24 : i32 to index
    %c0_16 = arith.constant 0 : index
    %26 = vector.load %arg1[%25, %c0_16] : memref<108x32xf32, #tpu.memory_space<vmem>>, vector<1x32xf32>
    %c104 = arith.constant 104 : index
    %c0_17 = arith.constant 0 : index
    %27 = vector.load %arg1[%c104, %c0_17] : memref<108x32xf32, #tpu.memory_space<vmem>>, vector<1x32xf32>
    %28 = arith.addf %26, %27 : vector<1x32xf32>
    %c4_18 = arith.constant 4 : index
    %c0_19 = arith.constant 0 : index
    %29 = vector.load %arg5[%c4_18, %c0_19] : memref<16x32xf32, #tpu.memory_space<vmem>>, vector<1x32xf32>
    tpu.vector_store %arg5[%c4_18, %c0_19], %28 {strides = array<i32>} : memref<16x32xf32, #tpu.memory_space<vmem>>, vector<1x32xf32>,
    %c5 = arith.constant 5 : index
    %30 = memref.load %arg0[%c5] : memref<16xi32, #tpu.memory_space<smem>>
    %31 = arith.index_cast %30 : i32 to index
    %c0_20 = arith.constant 0 : index
    %32 = vector.load %arg1[%31, %c0_20] : memref<108x32xf32, #tpu.memory_space<vmem>>, vector<1x32xf32>
    %c105 = arith.constant 105 : index
    %c0_21 = arith.constant 0 : index
    %33 = vector.load %arg1[%c105, %c0_21] : memref<108x32xf32, #tpu.memory_space<vmem>>, vector<1x32xf32>
    %34 = arith.addf %32, %33 : vector<1x32xf32>
    %c5_22 = arith.constant 5 : index
    %c0_23 = arith.constant 0 : index
    %35 = vector.load %arg5[%c5_22, %c0_23] : memref<16x32xf32, #tpu.memory_space<vmem>>, vector<1x32xf32>
    tpu.vector_store %arg5[%c5_22, %c0_23], %34 {strides = array<i32>} : memref<16x32xf32, #tpu.memory_space<vmem>>, vector<1x32xf32>,
    %c6 = arith.constant 6 : index
    %36 = memref.load %arg0[%c6] : memref<16xi32, #tpu.memory_space<smem>>
    %37 = arith.index_cast %36 : i32 to index
    %c0_24 = arith.constant 0 : index
    %38 = vector.load %arg1[%37, %c0_24] : memref<108x32xf32, #tpu.memory_space<vmem>>, vector<1x32xf32>
    %c106 = arith.constant 106 : index
    %c0_25 = arith.constant 0 : index
    %39 = vector.load %arg1[%c106, %c0_25] : memref<108x32xf32, #tpu.memory_space<vmem>>, vector<1x32xf32>
    %40 = arith.addf %38, %39 : vector<1x32xf32>
    %c6_26 = arith.constant 6 : index
    %c0_27 = arith.constant 0 : index
    %41 = vector.load %arg5[%c6_26, %c0_27] : memref<16x32xf32, #tpu.memory_space<vmem>>, vector<1x32xf32>
    tpu.vector_store %arg5[%c6_26, %c0_27], %40 {strides = array<i32>} : memref<16x32xf32, #tpu.memory_space<vmem>>, vector<1x32xf32>,
    %c7 = arith.constant 7 : index
    %42 = memref.load %arg0[%c7] : memref<16xi32, #tpu.memory_space<smem>>
    %43 = arith.index_cast %42 : i32 to index
    %c0_28 = arith.constant 0 : index
    %44 = vector.load %arg1[%43, %c0_28] : memref<108x32xf32, #tpu.memory_space<vmem>>, vector<1x32xf32>
    %c107 = arith.constant 107 : index
    %c0_29 = arith.constant 0 : index
    %45 = vector.load %arg1[%c107, %c0_29] : memref<108x32xf32, #tpu.memory_space<vmem>>, vector<1x32xf32>
    %46 = arith.addf %44, %45 : vector<1x32xf32>
    %c7_30 = arith.constant 7 : index
    %c0_31 = arith.constant 0 : index
    %47 = vector.load %arg5[%c7_30, %c0_31] : memref<16x32xf32, #tpu.memory_space<vmem>>, vector<1x32xf32>
    tpu.vector_store %arg5[%c7_30, %c0_31], %46 {strides = array<i32>} : memref<16x32xf32, #tpu.memory_space<vmem>>, vector<1x32xf32>,
    %c8 = arith.constant 8 : index
    %48 = memref.load %arg0[%c8] : memref<16xi32, #tpu.memory_space<smem>>
    %49 = arith.index_cast %48 : i32 to index
    %c0_32 = arith.constant 0 : index
    %50 = vector.load %arg1[%49, %c0_32] : memref<108x32xf32, #tpu.memory_space<vmem>>, vector<1x32xf32>
    %c100_33 = arith.constant 100 : index
    %c0_34 = arith.constant 0 : index
    %51 = vector.load %arg1[%c100_33, %c0_34] : memref<108x32xf32, #tpu.memory_space<vmem>>, vector<1x32xf32>
    %52 = arith.addf %50, %51 : vector<1x32xf32>
    %c8_35 = arith.constant 8 : index
    %c0_36 = arith.constant 0 : index
    %53 = vector.load %arg5[%c8_35, %c0_36] : memref<16x32xf32, #tpu.memory_space<vmem>>, vector<1x32xf32>
    tpu.vector_store %arg5[%c8_35, %c0_36], %52 {strides = array<i32>} : memref<16x32xf32, #tpu.memory_space<vmem>>, vector<1x32xf32>,
    %c9 = arith.constant 9 : index
    %54 = memref.load %arg0[%c9] : memref<16xi32, #tpu.memory_space<smem>>
    %55 = arith.index_cast %54 : i32 to index
    %c0_37 = arith.constant 0 : index
    %56 = vector.load %arg1[%55, %c0_37] : memref<108x32xf32, #tpu.memory_space<vmem>>, vector<1x32xf32>
    %c101_38 = arith.constant 101 : index
    %c0_39 = arith.constant 0 : index
    %57 = vector.load %arg1[%c101_38, %c0_39] : memref<108x32xf32, #tpu.memory_space<vmem>>, vector<1x32xf32>
    %58 = arith.addf %56, %57 : vector<1x32xf32>
    %c9_40 = arith.constant 9 : index
    %c0_41 = arith.constant 0 : index
    %59 = vector.load %arg5[%c9_40, %c0_41] : memref<16x32xf32, #tpu.memory_space<vmem>>, vector<1x32xf32>
    tpu.vector_store %arg5[%c9_40, %c0_41], %58 {strides = array<i32>} : memref<16x32xf32, #tpu.memory_space<vmem>>, vector<1x32xf32>,
    %c10 = arith.constant 10 : index
    %60 = memref.load %arg0[%c10] : memref<16xi32, #tpu.memory_space<smem>>
    %61 = arith.index_cast %60 : i32 to index
    %c0_42 = arith.constant 0 : index
    %62 = vector.load %arg1[%61, %c0_42] : memref<108x32xf32, #tpu.memory_space<vmem>>, vector<1x32xf32>
    %c102_43 = arith.constant 102 : index
    %c0_44 = arith.constant 0 : index
    %63 = vector.load %arg1[%c102_43, %c0_44] : memref<108x32xf32, #tpu.memory_space<vmem>>, vector<1x32xf32>
    %64 = arith.addf %62, %63 : vector<1x32xf32>
    %c10_45 = arith.constant 10 : index
    %c0_46 = arith.constant 0 : index
    %65 = vector.load %arg5[%c10_45, %c0_46] : memref<16x32xf32, #tpu.memory_space<vmem>>, vector<1x32xf32>
    tpu.vector_store %arg5[%c10_45, %c0_46], %64 {strides = array<i32>} : memref<16x32xf32, #tpu.memory_space<vmem>>, vector<1x32xf32>,
    %c11 = arith.constant 11 : index
    %66 = memref.load %arg0[%c11] : memref<16xi32, #tpu.memory_space<smem>>
    %67 = arith.index_cast %66 : i32 to index
    %c0_47 = arith.constant 0 : index
    %68 = vector.load %arg1[%67, %c0_47] : memref<108x32xf32, #tpu.memory_space<vmem>>, vector<1x32xf32>
    %c103_48 = arith.constant 103 : index
    %c0_49 = arith.constant 0 : index
    %69 = vector.load %arg1[%c103_48, %c0_49] : memref<108x32xf32, #tpu.memory_space<vmem>>, vector<1x32xf32>
    %70 = arith.addf %68, %69 : vector<1x32xf32>
    %c11_50 = arith.constant 11 : index
    %c0_51 = arith.constant 0 : index
    %71 = vector.load %arg5[%c11_50, %c0_51] : memref<16x32xf32, #tpu.memory_space<vmem>>, vector<1x32xf32>
    tpu.vector_store %arg5[%c11_50, %c0_51], %70 {strides = array<i32>} : memref<16x32xf32, #tpu.memory_space<vmem>>, vector<1x32xf32>,
    %c12 = arith.constant 12 : index
    %72 = memref.load %arg0[%c12] : memref<16xi32, #tpu.memory_space<smem>>
    %73 = arith.index_cast %72 : i32 to index
    %c0_52 = arith.constant 0 : index
    %74 = vector.load %arg1[%73, %c0_52] : memref<108x32xf32, #tpu.memory_space<vmem>>, vector<1x32xf32>
    %c104_53 = arith.constant 104 : index
    %c0_54 = arith.constant 0 : index
    %75 = vector.load %arg1[%c104_53, %c0_54] : memref<108x32xf32, #tpu.memory_space<vmem>>, vector<1x32xf32>
    %76 = arith.addf %74, %75 : vector<1x32xf32>
    %c12_55 = arith.constant 12 : index
    %c0_56 = arith.constant 0 : index
    %77 = vector.load %arg5[%c12_55, %c0_56] : memref<16x32xf32, #tpu.memory_space<vmem>>, vector<1x32xf32>
    tpu.vector_store %arg5[%c12_55, %c0_56], %76 {strides = array<i32>} : memref<16x32xf32, #tpu.memory_space<vmem>>, vector<1x32xf32>,
    %c13 = arith.constant 13 : index
    %78 = memref.load %arg0[%c13] : memref<16xi32, #tpu.memory_space<smem>>
    %79 = arith.index_cast %78 : i32 to index
    %c0_57 = arith.constant 0 : index
    %80 = vector.load %arg1[%79, %c0_57] : memref<108x32xf32, #tpu.memory_space<vmem>>, vector<1x32xf32>
    %c105_58 = arith.constant 105 : index
    %c0_59 = arith.constant 0 : index
    %81 = vector.load %arg1[%c105_58, %c0_59] : memref<108x32xf32, #tpu.memory_space<vmem>>, vector<1x32xf32>
    %82 = arith.addf %80, %81 : vector<1x32xf32>
    %c13_60 = arith.constant 13 : index
    %c0_61 = arith.constant 0 : index
    %83 = vector.load %arg5[%c13_60, %c0_61] : memref<16x32xf32, #tpu.memory_space<vmem>>, vector<1x32xf32>
    tpu.vector_store %arg5[%c13_60, %c0_61], %82 {strides = array<i32>} : memref<16x32xf32, #tpu.memory_space<vmem>>, vector<1x32xf32>,
    %c14 = arith.constant 14 : index
    %84 = memref.load %arg0[%c14] : memref<16xi32, #tpu.memory_space<smem>>
    %85 = arith.index_cast %84 : i32 to index
    %c0_62 = arith.constant 0 : index
    %86 = vector.load %arg1[%85, %c0_62] : memref<108x32xf32, #tpu.memory_space<vmem>>, vector<1x32xf32>
    %c106_63 = arith.constant 106 : index
    %c0_64 = arith.constant 0 : index
    %87 = vector.load %arg1[%c106_63, %c0_64] : memref<108x32xf32, #tpu.memory_space<vmem>>, vector<1x32xf32>
    %88 = arith.addf %86, %87 : vector<1x32xf32>
    %c14_65 = arith.constant 14 : index
    %c0_66 = arith.constant 0 : index
    %89 = vector.load %arg5[%c14_65, %c0_66] : memref<16x32xf32, #tpu.memory_space<vmem>>, vector<1x32xf32>
    tpu.vector_store %arg5[%c14_65, %c0_66], %88 {strides = array<i32>} : memref<16x32xf32, #tpu.memory_space<vmem>>, vector<1x32xf32>,
    %c15 = arith.constant 15 : index
    %90 = memref.load %arg0[%c15] : memref<16xi32, #tpu.memory_space<smem>>
    %91 = arith.index_cast %90 : i32 to index
    %c0_67 = arith.constant 0 : index
    %92 = vector.load %arg1[%91, %c0_67] : memref<108x32xf32, #tpu.memory_space<vmem>>, vector<1x32xf32>
    %c107_68 = arith.constant 107 : index
    %c0_69 = arith.constant 0 : index
    %93 = vector.load %arg1[%c107_68, %c0_69] : memref<108x32xf32, #tpu.memory_space<vmem>>, vector<1x32xf32>
    %94 = arith.addf %92, %93 : vector<1x32xf32>
    %c15_70 = arith.constant 15 : index
    %c0_71 = arith.constant 0 : index
    %95 = vector.load %arg5[%c15_70, %c0_71] : memref<16x32xf32, #tpu.memory_space<vmem>>, vector<1x32xf32>
    tpu.vector_store %arg5[%c15_70, %c0_71], %94 {strides = array<i32>} : memref<16x32xf32, #tpu.memory_space<vmem>>, vector<1x32xf32>,
    %c0_72 = arith.constant 0 : index
    %c0_73 = arith.constant 0 : index
    %96 = vector.load %arg5[%c0_72, %c0_73] : memref<16x32xf32, #tpu.memory_space<vmem>>, vector<16x32xf32>
    %c0_74 = arith.constant 0 : index
    %c0_75 = arith.constant 0 : index
    %97 = vector.load %arg3[%c0_74, %c0_75] : memref<41x64xf32, #tpu.memory_space<vmem>>, vector<1x32xf32>
    %c1_76 = arith.constant 1 : index
    %c0_77 = arith.constant 0 : index
    %98 = vector.load %arg3[%c1_76, %c0_77] : memref<41x64xf32, #tpu.memory_space<vmem>>, vector<1x32xf32>
    %cst = arith.constant dense<0.000000e+00> : vector<16xf32>
    %99 = vector.multi_reduction <add>, %96, %cst [1] : vector<16x32xf32> to vector<16xf32>
    %100 = vector.shape_cast %99 : vector<16xf32> to vector<16x1xf32>
    %cst_78 = arith.constant 3.200000e+01 : f32
    %101 = vector.broadcast %cst_78 : f32 to vector<16x1xf32>
    %102 = arith.divf %100, %101 : vector<16x1xf32>
    %103 = vector.broadcast %102 : vector<16x1xf32> to vector<16x32xf32>
    %104 = arith.subf %96, %103 : vector<16x32xf32>
    %105 = arith.mulf %104, %104 : vector<16x32xf32>
    %cst_79 = arith.constant dense<0.000000e+00> : vector<16xf32>
    %106 = vector.multi_reduction <add>, %105, %cst_79 [1] : vector<16x32xf32> to vector<16xf32>
    %107 = vector.shape_cast %106 : vector<16xf32> to vector<16x1xf32>
    %cst_80 = arith.constant 3.200000e+01 : f32
    %108 = vector.broadcast %cst_80 : f32 to vector<16x1xf32>
    %109 = arith.divf %107, %108 : vector<16x1xf32>
    %110 = vector.broadcast %102 : vector<16x1xf32> to vector<16x32xf32>
    %111 = arith.subf %96, %110 : vector<16x32xf32>
    %cst_81 = arith.constant 9.99999974E-6 : f32
    %112 = vector.broadcast %cst_81 : f32 to vector<16x1xf32>
    %113 = arith.addf %109, %112 : vector<16x1xf32>
    %114 = math.rsqrt %113 : vector<16x1xf32>
    %115 = vector.broadcast %114 : vector<16x1xf32> to vector<16x32xf32>
    %116 = arith.mulf %111, %115 : vector<16x32xf32>
    %117 = vector.broadcast %97 : vector<1x32xf32> to vector<16x32xf32>
    %118 = arith.mulf %116, %117 : vector<16x32xf32>
    %119 = vector.broadcast %98 : vector<1x32xf32> to vector<16x32xf32>
    %120 = arith.addf %118, %119 : vector<16x32xf32>
    %121 = arith.truncf %120 : vector<16x32xf32> to vector<16x32xbf16>
    %c0_82 = arith.constant 0 : index
    %c0_83 = arith.constant 0 : index
    %122 = vector.load %arg2[%c0_82, %c0_83] : memref<1120x64xbf16, #tpu.memory_space<vmem>>, vector<32x8xbf16>
    %c128 = arith.constant 128 : index
    %c0_84 = arith.constant 0 : index
    %123 = vector.load %arg2[%c128, %c0_84] : memref<1120x64xbf16, #tpu.memory_space<vmem>>, vector<32x8xbf16>
    %c256 = arith.constant 256 : index
    %c0_85 = arith.constant 0 : index
    %124 = vector.load %arg2[%c256, %c0_85] : memref<1120x64xbf16, #tpu.memory_space<vmem>>, vector<32x8xbf16>
    %c384 = arith.constant 384 : index
    %c0_86 = arith.constant 0 : index
    %125 = vector.load %arg2[%c384, %c0_86] : memref<1120x64xbf16, #tpu.memory_space<vmem>>, vector<8x32xbf16>
    %cst_87 = arith.constant dense<0.000000e+00> : vector<16x8xf32>
    %126 = tpu.matmul %121, %122, %cst_87 {dimension_numbers = #tpu.dot_dimension_numbers<[1], [0], [0], [1], [0, 0, 1, 1], [], []>} : vector<16x32xbf16>, vector<32x8xbf16>, vector<16x8xf32> -> vector<16x8xf32>
    %c2_88 = arith.constant 2 : index
    %c0_89 = arith.constant 0 : index
    %127 = vector.load %arg3[%c2_88, %c0_89] : memref<41x64xf32, #tpu.memory_space<vmem>>, vector<1x8xf32>
    %128 = vector.broadcast %127 : vector<1x8xf32> to vector<16x8xf32>
    %129 = arith.addf %126, %128 : vector<16x8xf32>
    %cst_90 = arith.constant dense<0.000000e+00> : vector<16x8xf32>
    %130 = tpu.matmul %121, %123, %cst_90 {dimension_numbers = #tpu.dot_dimension_numbers<[1], [0], [0], [1], [0, 0, 1, 1], [], []>} : vector<16x32xbf16>, vector<32x8xbf16>, vector<16x8xf32> -> vector<16x8xf32>
    %c6_91 = arith.constant 6 : index
    %c0_92 = arith.constant 0 : index
    %131 = vector.load %arg3[%c6_91, %c0_92] : memref<41x64xf32, #tpu.memory_space<vmem>>, vector<1x8xf32>
    %132 = vector.broadcast %131 : vector<1x8xf32> to vector<16x8xf32>
    %133 = arith.addf %130, %132 : vector<16x8xf32>
    %cst_93 = arith.constant dense<0.000000e+00> : vector<16x8xf32>
    %134 = tpu.matmul %121, %124, %cst_93 {dimension_numbers = #tpu.dot_dimension_numbers<[1], [0], [0], [1], [0, 0, 1, 1], [], []>} : vector<16x32xbf16>, vector<32x8xbf16>, vector<16x8xf32> -> vector<16x8xf32>
    %c10_94 = arith.constant 10 : index
    %c0_95 = arith.constant 0 : index
    %135 = vector.load %arg3[%c10_94, %c0_95] : memref<41x64xf32, #tpu.memory_space<vmem>>, vector<1x8xf32>
    %136 = vector.broadcast %135 : vector<1x8xf32> to vector<16x8xf32>
    %137 = arith.addf %134, %136 : vector<16x8xf32>
    %138 = vector.shape_cast %129 : vector<16x8xf32> to vector<2x8x8xf32>
    %139 = arith.truncf %138 : vector<2x8x8xf32> to vector<2x8x8xbf16>
    %140 = vector.shape_cast %133 : vector<16x8xf32> to vector<2x8x8xf32>
    %141 = arith.truncf %140 : vector<2x8x8xf32> to vector<2x8x8xbf16>
    %142 = vector.shape_cast %137 : vector<16x8xf32> to vector<2x8x8xf32>
    %143 = arith.truncf %142 : vector<2x8x8xf32> to vector<2x8x8xbf16>
    "tpu.trace_start"() <{level = 10 : i32, message = "bqd,bkd->bqk"}> : () -> ()
    %cst_96 = arith.constant dense<0.000000e+00> : vector<2x8x8xf32>
    %144 = tpu.matmul %139, %141, %cst_96 {dimension_numbers = #tpu.dot_dimension_numbers<[2], [2], [1], [1], [0, 0, 0, 1, 1, 1], [0], [0]>} : vector<2x8x8xbf16>, vector<2x8x8xbf16>, vector<2x8x8xf32> -> vector<2x8x8xf32>
    "tpu.trace_stop"() : () -> ()
    %cst_97 = arith.constant 0.353553385 : f32
    %145 = vector.broadcast %cst_97 : f32 to vector<2x8x8xf32>
    %146 = arith.mulf %144, %145 : vector<2x8x8xf32>
    %cst_98 = arith.constant dense<0xFF800000> : vector<2x8xf32>
    %147 = vector.multi_reduction <maximumf>, %146, %cst_98 [2] : vector<2x8x8xf32> to vector<2x8xf32>
    %148 = vector.shape_cast %147 : vector<2x8xf32> to vector<2x8x1xf32>
    %149 = vector.broadcast %148 : vector<2x8x1xf32> to vector<2x8x8xf32>
    %150 = arith.subf %146, %149 : vector<2x8x8xf32>
    %151 = math.exp %150 : vector<2x8x8xf32>
    %cst_99 = arith.constant dense<0.000000e+00> : vector<2x8xf32>
    %152 = vector.multi_reduction <add>, %151, %cst_99 [2] : vector<2x8x8xf32> to vector<2x8xf32>
    %153 = vector.shape_cast %152 : vector<2x8xf32> to vector<2x8x1xf32>
    %154 = tpu.reciprocal %153 {approx = true} : vector<2x8x1xf32> -> vector<2x8x1xf32>
    %155 = vector.broadcast %154 : vector<2x8x1xf32> to vector<2x8x8xf32>
    %156 = arith.mulf %151, %155 : vector<2x8x8xf32>
    %157 = arith.truncf %156 : vector<2x8x8xf32> to vector<2x8x8xbf16>
    "tpu.trace_start"() <{level = 10 : i32, message = "bqk,bkd->bqd"}> : () -> ()
    %cst_100 = arith.constant dense<0.000000e+00> : vector<2x8x8xf32>
    %158 = tpu.matmul %157, %143, %cst_100 {dimension_numbers = #tpu.dot_dimension_numbers<[2], [1], [1], [2], [0, 0, 0, 1, 1, 2], [0], [0]>} : vector<2x8x8xbf16>, vector<2x8x8xbf16>, vector<2x8x8xf32> -> vector<2x8x8xf32>
    "tpu.trace_stop"() : () -> ()
    %159 = vector.shape_cast %158 : vector<2x8x8xf32> to vector<16x8xf32>
    %160 = arith.truncf %159 : vector<16x8xf32> to vector<16x8xbf16>
    %cst_101 = arith.constant dense<0.000000e+00> : vector<16x32xf32>
    %161 = tpu.matmul %160, %125, %cst_101 {dimension_numbers = #tpu.dot_dimension_numbers<[1], [0], [0], [1], [0, 0, 1, 1], [], []>} : vector<16x8xbf16>, vector<8x32xbf16>, vector<16x32xf32> -> vector<16x32xf32>
    %c32 = arith.constant 32 : index
    %c0_102 = arith.constant 0 : index
    %162 = vector.load %arg2[%c32, %c0_102] : memref<1120x64xbf16, #tpu.memory_space<vmem>>, vector<32x8xbf16>
    %c160 = arith.constant 160 : index
    %c0_103 = arith.constant 0 : index
    %163 = vector.load %arg2[%c160, %c0_103] : memref<1120x64xbf16, #tpu.memory_space<vmem>>, vector<32x8xbf16>
    %c288 = arith.constant 288 : index
    %c0_104 = arith.constant 0 : index
    %164 = vector.load %arg2[%c288, %c0_104] : memref<1120x64xbf16, #tpu.memory_space<vmem>>, vector<32x8xbf16>
    %c400 = arith.constant 400 : index
    %c0_105 = arith.constant 0 : index
    %165 = vector.load %arg2[%c400, %c0_105] : memref<1120x64xbf16, #tpu.memory_space<vmem>>, vector<8x32xbf16>
    %cst_106 = arith.constant dense<0.000000e+00> : vector<16x8xf32>
    %166 = tpu.matmul %121, %162, %cst_106 {dimension_numbers = #tpu.dot_dimension_numbers<[1], [0], [0], [1], [0, 0, 1, 1], [], []>} : vector<16x32xbf16>, vector<32x8xbf16>, vector<16x8xf32> -> vector<16x8xf32>
    %c3_107 = arith.constant 3 : index
    %c0_108 = arith.constant 0 : index
    %167 = vector.load %arg3[%c3_107, %c0_108] : memref<41x64xf32, #tpu.memory_space<vmem>>, vector<1x8xf32>
    %168 = vector.broadcast %167 : vector<1x8xf32> to vector<16x8xf32>
    %169 = arith.addf %166, %168 : vector<16x8xf32>
    %cst_109 = arith.constant dense<0.000000e+00> : vector<16x8xf32>
    %170 = tpu.matmul %121, %163, %cst_109 {dimension_numbers = #tpu.dot_dimension_numbers<[1], [0], [0], [1], [0, 0, 1, 1], [], []>} : vector<16x32xbf16>, vector<32x8xbf16>, vector<16x8xf32> -> vector<16x8xf32>
    %c7_110 = arith.constant 7 : index
    %c0_111 = arith.constant 0 : index
    %171 = vector.load %arg3[%c7_110, %c0_111] : memref<41x64xf32, #tpu.memory_space<vmem>>, vector<1x8xf32>
    %172 = vector.broadcast %171 : vector<1x8xf32> to vector<16x8xf32>
    %173 = arith.addf %170, %172 : vector<16x8xf32>
    %cst_112 = arith.constant dense<0.000000e+00> : vector<16x8xf32>
    %174 = tpu.matmul %121, %164, %cst_112 {dimension_numbers = #tpu.dot_dimension_numbers<[1], [0], [0], [1], [0, 0, 1, 1], [], []>} : vector<16x32xbf16>, vector<32x8xbf16>, vector<16x8xf32> -> vector<16x8xf32>
    %c11_113 = arith.constant 11 : index
    %c0_114 = arith.constant 0 : index
    %175 = vector.load %arg3[%c11_113, %c0_114] : memref<41x64xf32, #tpu.memory_space<vmem>>, vector<1x8xf32>
    %176 = vector.broadcast %175 : vector<1x8xf32> to vector<16x8xf32>
    %177 = arith.addf %174, %176 : vector<16x8xf32>
    %178 = vector.shape_cast %169 : vector<16x8xf32> to vector<2x8x8xf32>
    %179 = arith.truncf %178 : vector<2x8x8xf32> to vector<2x8x8xbf16>
    %180 = vector.shape_cast %173 : vector<16x8xf32> to vector<2x8x8xf32>
    %181 = arith.truncf %180 : vector<2x8x8xf32> to vector<2x8x8xbf16>
    %182 = vector.shape_cast %177 : vector<16x8xf32> to vector<2x8x8xf32>
    %183 = arith.truncf %182 : vector<2x8x8xf32> to vector<2x8x8xbf16>
    "tpu.trace_start"() <{level = 10 : i32, message = "bqd,bkd->bqk"}> : () -> ()
    %cst_115 = arith.constant dense<0.000000e+00> : vector<2x8x8xf32>
    %184 = tpu.matmul %179, %181, %cst_115 {dimension_numbers = #tpu.dot_dimension_numbers<[2], [2], [1], [1], [0, 0, 0, 1, 1, 1], [0], [0]>} : vector<2x8x8xbf16>, vector<2x8x8xbf16>, vector<2x8x8xf32> -> vector<2x8x8xf32>
    "tpu.trace_stop"() : () -> ()
    %cst_116 = arith.constant 0.353553385 : f32
    %185 = vector.broadcast %cst_116 : f32 to vector<2x8x8xf32>
    %186 = arith.mulf %184, %185 : vector<2x8x8xf32>
    %cst_117 = arith.constant dense<0xFF800000> : vector<2x8xf32>
    %187 = vector.multi_reduction <maximumf>, %186, %cst_117 [2] : vector<2x8x8xf32> to vector<2x8xf32>
    %188 = vector.shape_cast %187 : vector<2x8xf32> to vector<2x8x1xf32>
    %189 = vector.broadcast %188 : vector<2x8x1xf32> to vector<2x8x8xf32>
    %190 = arith.subf %186, %189 : vector<2x8x8xf32>
    %191 = math.exp %190 : vector<2x8x8xf32>
    %cst_118 = arith.constant dense<0.000000e+00> : vector<2x8xf32>
    %192 = vector.multi_reduction <add>, %191, %cst_118 [2] : vector<2x8x8xf32> to vector<2x8xf32>
    %193 = vector.shape_cast %192 : vector<2x8xf32> to vector<2x8x1xf32>
    %194 = tpu.reciprocal %193 {approx = true} : vector<2x8x1xf32> -> vector<2x8x1xf32>
    %195 = vector.broadcast %194 : vector<2x8x1xf32> to vector<2x8x8xf32>
    %196 = arith.mulf %191, %195 : vector<2x8x8xf32>
    %197 = arith.truncf %196 : vector<2x8x8xf32> to vector<2x8x8xbf16>
    "tpu.trace_start"() <{level = 10 : i32, message = "bqk,bkd->bqd"}> : () -> ()
    %cst_119 = arith.constant dense<0.000000e+00> : vector<2x8x8xf32>
    %198 = tpu.matmul %197, %183, %cst_119 {dimension_numbers = #tpu.dot_dimension_numbers<[2], [1], [1], [2], [0, 0, 0, 1, 1, 2], [0], [0]>} : vector<2x8x8xbf16>, vector<2x8x8xbf16>, vector<2x8x8xf32> -> vector<2x8x8xf32>
    "tpu.trace_stop"() : () -> ()
    %199 = vector.shape_cast %198 : vector<2x8x8xf32> to vector<16x8xf32>
    %200 = arith.truncf %199 : vector<16x8xf32> to vector<16x8xbf16>
    %cst_120 = arith.constant dense<0.000000e+00> : vector<16x32xf32>
    %201 = tpu.matmul %200, %165, %cst_120 {dimension_numbers = #tpu.dot_dimension_numbers<[1], [0], [0], [1], [0, 0, 1, 1], [], []>} : vector<16x8xbf16>, vector<8x32xbf16>, vector<16x32xf32> -> vector<16x32xf32>
    %c64 = arith.constant 64 : index
    %c0_121 = arith.constant 0 : index
    %202 = vector.load %arg2[%c64, %c0_121] : memref<1120x64xbf16, #tpu.memory_space<vmem>>, vector<32x8xbf16>
    %c192 = arith.constant 192 : index
    %c0_122 = arith.constant 0 : index
    %203 = vector.load %arg2[%c192, %c0_122] : memref<1120x64xbf16, #tpu.memory_space<vmem>>, vector<32x8xbf16>
    %c320 = arith.constant 320 : index
    %c0_123 = arith.constant 0 : index
    %204 = vector.load %arg2[%c320, %c0_123] : memref<1120x64xbf16, #tpu.memory_space<vmem>>, vector<32x8xbf16>
    %c416 = arith.constant 416 : index
    %c0_124 = arith.constant 0 : index
    %205 = vector.load %arg2[%c416, %c0_124] : memref<1120x64xbf16, #tpu.memory_space<vmem>>, vector<8x32xbf16>
    %cst_125 = arith.constant dense<0.000000e+00> : vector<16x8xf32>
    %206 = tpu.matmul %121, %202, %cst_125 {dimension_numbers = #tpu.dot_dimension_numbers<[1], [0], [0], [1], [0, 0, 1, 1], [], []>} : vector<16x32xbf16>, vector<32x8xbf16>, vector<16x8xf32> -> vector<16x8xf32>
    %c4_126 = arith.constant 4 : index
    %c0_127 = arith.constant 0 : index
    %207 = vector.load %arg3[%c4_126, %c0_127] : memref<41x64xf32, #tpu.memory_space<vmem>>, vector<1x8xf32>
    %208 = vector.broadcast %207 : vector<1x8xf32> to vector<16x8xf32>
    %209 = arith.addf %206, %208 : vector<16x8xf32>
    %cst_128 = arith.constant dense<0.000000e+00> : vector<16x8xf32>
    %210 = tpu.matmul %121, %203, %cst_128 {dimension_numbers = #tpu.dot_dimension_numbers<[1], [0], [0], [1], [0, 0, 1, 1], [], []>} : vector<16x32xbf16>, vector<32x8xbf16>, vector<16x8xf32> -> vector<16x8xf32>
    %c8_129 = arith.constant 8 : index
    %c0_130 = arith.constant 0 : index
    %211 = vector.load %arg3[%c8_129, %c0_130] : memref<41x64xf32, #tpu.memory_space<vmem>>, vector<1x8xf32>
    %212 = vector.broadcast %211 : vector<1x8xf32> to vector<16x8xf32>
    %213 = arith.addf %210, %212 : vector<16x8xf32>
    %cst_131 = arith.constant dense<0.000000e+00> : vector<16x8xf32>
    %214 = tpu.matmul %121, %204, %cst_131 {dimension_numbers = #tpu.dot_dimension_numbers<[1], [0], [0], [1], [0, 0, 1, 1], [], []>} : vector<16x32xbf16>, vector<32x8xbf16>, vector<16x8xf32> -> vector<16x8xf32>
    %c12_132 = arith.constant 12 : index
    %c0_133 = arith.constant 0 : index
    %215 = vector.load %arg3[%c12_132, %c0_133] : memref<41x64xf32, #tpu.memory_space<vmem>>, vector<1x8xf32>
    %216 = vector.broadcast %215 : vector<1x8xf32> to vector<16x8xf32>
    %217 = arith.addf %214, %216 : vector<16x8xf32>
    %218 = vector.shape_cast %209 : vector<16x8xf32> to vector<2x8x8xf32>
    %219 = arith.truncf %218 : vector<2x8x8xf32> to vector<2x8x8xbf16>
    %220 = vector.shape_cast %213 : vector<16x8xf32> to vector<2x8x8xf32>
    %221 = arith.truncf %220 : vector<2x8x8xf32> to vector<2x8x8xbf16>
    %222 = vector.shape_cast %217 : vector<16x8xf32> to vector<2x8x8xf32>
    %223 = arith.truncf %222 : vector<2x8x8xf32> to vector<2x8x8xbf16>
    "tpu.trace_start"() <{level = 10 : i32, message = "bqd,bkd->bqk"}> : () -> ()
    %cst_134 = arith.constant dense<0.000000e+00> : vector<2x8x8xf32>
    %224 = tpu.matmul %219, %221, %cst_134 {dimension_numbers = #tpu.dot_dimension_numbers<[2], [2], [1], [1], [0, 0, 0, 1, 1, 1], [0], [0]>} : vector<2x8x8xbf16>, vector<2x8x8xbf16>, vector<2x8x8xf32> -> vector<2x8x8xf32>
    "tpu.trace_stop"() : () -> ()
    %cst_135 = arith.constant 0.353553385 : f32
    %225 = vector.broadcast %cst_135 : f32 to vector<2x8x8xf32>
    %226 = arith.mulf %224, %225 : vector<2x8x8xf32>
    %cst_136 = arith.constant dense<0xFF800000> : vector<2x8xf32>
    %227 = vector.multi_reduction <maximumf>, %226, %cst_136 [2] : vector<2x8x8xf32> to vector<2x8xf32>
    %228 = vector.shape_cast %227 : vector<2x8xf32> to vector<2x8x1xf32>
    %229 = vector.broadcast %228 : vector<2x8x1xf32> to vector<2x8x8xf32>
    %230 = arith.subf %226, %229 : vector<2x8x8xf32>
    %231 = math.exp %230 : vector<2x8x8xf32>
    %cst_137 = arith.constant dense<0.000000e+00> : vector<2x8xf32>
    %232 = vector.multi_reduction <add>, %231, %cst_137 [2] : vector<2x8x8xf32> to vector<2x8xf32>
    %233 = vector.shape_cast %232 : vector<2x8xf32> to vector<2x8x1xf32>
    %234 = tpu.reciprocal %233 {approx = true} : vector<2x8x1xf32> -> vector<2x8x1xf32>
    %235 = vector.broadcast %234 : vector<2x8x1xf32> to vector<2x8x8xf32>
    %236 = arith.mulf %231, %235 : vector<2x8x8xf32>
    %237 = arith.truncf %236 : vector<2x8x8xf32> to vector<2x8x8xbf16>
    "tpu.trace_start"() <{level = 10 : i32, message = "bqk,bkd->bqd"}> : () -> ()
    %cst_138 = arith.constant dense<0.000000e+00> : vector<2x8x8xf32>
    %238 = tpu.matmul %237, %223, %cst_138 {dimension_numbers = #tpu.dot_dimension_numbers<[2], [1], [1], [2], [0, 0, 0, 1, 1, 2], [0], [0]>} : vector<2x8x8xbf16>, vector<2x8x8xbf16>, vector<2x8x8xf32> -> vector<2x8x8xf32>
    "tpu.trace_stop"() : () -> ()
    %239 = vector.shape_cast %238 : vector<2x8x8xf32> to vector<16x8xf32>
    %240 = arith.truncf %239 : vector<16x8xf32> to vector<16x8xbf16>
    %cst_139 = arith.constant dense<0.000000e+00> : vector<16x32xf32>
    %241 = tpu.matmul %240, %205, %cst_139 {dimension_numbers = #tpu.dot_dimension_numbers<[1], [0], [0], [1], [0, 0, 1, 1], [], []>} : vector<16x8xbf16>, vector<8x32xbf16>, vector<16x32xf32> -> vector<16x32xf32>
    %c96 = arith.constant 96 : index
    %c0_140 = arith.constant 0 : index
    %242 = vector.load %arg2[%c96, %c0_140] : memref<1120x64xbf16, #tpu.memory_space<vmem>>, vector<32x8xbf16>
    %c224 = arith.constant 224 : index
    %c0_141 = arith.constant 0 : index
    %243 = vector.load %arg2[%c224, %c0_141] : memref<1120x64xbf16, #tpu.memory_space<vmem>>, vector<32x8xbf16>
    %c352 = arith.constant 352 : index
    %c0_142 = arith.constant 0 : index
    %244 = vector.load %arg2[%c352, %c0_142] : memref<1120x64xbf16, #tpu.memory_space<vmem>>, vector<32x8xbf16>
    %c432 = arith.constant 432 : index
    %c0_143 = arith.constant 0 : index
    %245 = vector.load %arg2[%c432, %c0_143] : memref<1120x64xbf16, #tpu.memory_space<vmem>>, vector<8x32xbf16>
    %cst_144 = arith.constant dense<0.000000e+00> : vector<16x8xf32>
    %246 = tpu.matmul %121, %242, %cst_144 {dimension_numbers = #tpu.dot_dimension_numbers<[1], [0], [0], [1], [0, 0, 1, 1], [], []>} : vector<16x32xbf16>, vector<32x8xbf16>, vector<16x8xf32> -> vector<16x8xf32>
    %c5_145 = arith.constant 5 : index
    %c0_146 = arith.constant 0 : index
    %247 = vector.load %arg3[%c5_145, %c0_146] : memref<41x64xf32, #tpu.memory_space<vmem>>, vector<1x8xf32>
    %248 = vector.broadcast %247 : vector<1x8xf32> to vector<16x8xf32>
    %249 = arith.addf %246, %248 : vector<16x8xf32>
    %cst_147 = arith.constant dense<0.000000e+00> : vector<16x8xf32>
    %250 = tpu.matmul %121, %243, %cst_147 {dimension_numbers = #tpu.dot_dimension_numbers<[1], [0], [0], [1], [0, 0, 1, 1], [], []>} : vector<16x32xbf16>, vector<32x8xbf16>, vector<16x8xf32> -> vector<16x8xf32>
    %c9_148 = arith.constant 9 : index
    %c0_149 = arith.constant 0 : index
    %251 = vector.load %arg3[%c9_148, %c0_149] : memref<41x64xf32, #tpu.memory_space<vmem>>, vector<1x8xf32>
    %252 = vector.broadcast %251 : vector<1x8xf32> to vector<16x8xf32>
    %253 = arith.addf %250, %252 : vector<16x8xf32>
    %cst_150 = arith.constant dense<0.000000e+00> : vector<16x8xf32>
    %254 = tpu.matmul %121, %244, %cst_150 {dimension_numbers = #tpu.dot_dimension_numbers<[1], [0], [0], [1], [0, 0, 1, 1], [], []>} : vector<16x32xbf16>, vector<32x8xbf16>, vector<16x8xf32> -> vector<16x8xf32>
    %c13_151 = arith.constant 13 : index
    %c0_152 = arith.constant 0 : index
    %255 = vector.load %arg3[%c13_151, %c0_152] : memref<41x64xf32, #tpu.memory_space<vmem>>, vector<1x8xf32>
    %256 = vector.broadcast %255 : vector<1x8xf32> to vector<16x8xf32>
    %257 = arith.addf %254, %256 : vector<16x8xf32>
    %258 = vector.shape_cast %249 : vector<16x8xf32> to vector<2x8x8xf32>
    %259 = arith.truncf %258 : vector<2x8x8xf32> to vector<2x8x8xbf16>
    %260 = vector.shape_cast %253 : vector<16x8xf32> to vector<2x8x8xf32>
    %261 = arith.truncf %260 : vector<2x8x8xf32> to vector<2x8x8xbf16>
    %262 = vector.shape_cast %257 : vector<16x8xf32> to vector<2x8x8xf32>
    %263 = arith.truncf %262 : vector<2x8x8xf32> to vector<2x8x8xbf16>
    "tpu.trace_start"() <{level = 10 : i32, message = "bqd,bkd->bqk"}> : () -> ()
    %cst_153 = arith.constant dense<0.000000e+00> : vector<2x8x8xf32>
    %264 = tpu.matmul %259, %261, %cst_153 {dimension_numbers = #tpu.dot_dimension_numbers<[2], [2], [1], [1], [0, 0, 0, 1, 1, 1], [0], [0]>} : vector<2x8x8xbf16>, vector<2x8x8xbf16>, vector<2x8x8xf32> -> vector<2x8x8xf32>
    "tpu.trace_stop"() : () -> ()
    %cst_154 = arith.constant 0.353553385 : f32
    %265 = vector.broadcast %cst_154 : f32 to vector<2x8x8xf32>
    %266 = arith.mulf %264, %265 : vector<2x8x8xf32>
    %cst_155 = arith.constant dense<0xFF800000> : vector<2x8xf32>
    %267 = vector.multi_reduction <maximumf>, %266, %cst_155 [2] : vector<2x8x8xf32> to vector<2x8xf32>
    %268 = vector.shape_cast %267 : vector<2x8xf32> to vector<2x8x1xf32>
    %269 = vector.broadcast %268 : vector<2x8x1xf32> to vector<2x8x8xf32>
    %270 = arith.subf %266, %269 : vector<2x8x8xf32>
    %271 = math.exp %270 : vector<2x8x8xf32>
    %cst_156 = arith.constant dense<0.000000e+00> : vector<2x8xf32>
    %272 = vector.multi_reduction <add>, %271, %cst_156 [2] : vector<2x8x8xf32> to vector<2x8xf32>
    %273 = vector.shape_cast %272 : vector<2x8xf32> to vector<2x8x1xf32>
    %274 = tpu.reciprocal %273 {approx = true} : vector<2x8x1xf32> -> vector<2x8x1xf32>
    %275 = vector.broadcast %274 : vector<2x8x1xf32> to vector<2x8x8xf32>
    %276 = arith.mulf %271, %275 : vector<2x8x8xf32>
    %277 = arith.truncf %276 : vector<2x8x8xf32> to vector<2x8x8xbf16>
    "tpu.trace_start"() <{level = 10 : i32, message = "bqk,bkd->bqd"}> : () -> ()
    %cst_157 = arith.constant dense<0.000000e+00> : vector<2x8x8xf32>
    %278 = tpu.matmul %277, %263, %cst_157 {dimension_numbers = #tpu.dot_dimension_numbers<[2], [1], [1], [2], [0, 0, 0, 1, 1, 2], [0], [0]>} : vector<2x8x8xbf16>, vector<2x8x8xbf16>, vector<2x8x8xf32> -> vector<2x8x8xf32>
    "tpu.trace_stop"() : () -> ()
    %279 = vector.shape_cast %278 : vector<2x8x8xf32> to vector<16x8xf32>
    %280 = arith.truncf %279 : vector<16x8xf32> to vector<16x8xbf16>
    %cst_158 = arith.constant dense<0.000000e+00> : vector<16x32xf32>
    %281 = tpu.matmul %280, %245, %cst_158 {dimension_numbers = #tpu.dot_dimension_numbers<[1], [0], [0], [1], [0, 0, 1, 1], [], []>} : vector<16x8xbf16>, vector<8x32xbf16>, vector<16x32xf32> -> vector<16x32xf32>
    %282 = arith.addf %161, %201 : vector<16x32xf32>
    %283 = arith.addf %282, %241 : vector<16x32xf32>
    %284 = arith.addf %283, %281 : vector<16x32xf32>
    %c14_159 = arith.constant 14 : index
    %c0_160 = arith.constant 0 : index
    %285 = vector.load %arg3[%c14_159, %c0_160] : memref<41x64xf32, #tpu.memory_space<vmem>>, vector<1x32xf32>
    %286 = vector.broadcast %285 : vector<1x32xf32> to vector<16x32xf32>
    %287 = arith.addf %284, %286 : vector<16x32xf32>
    %288 = arith.addf %287, %120 : vector<16x32xf32>
    %c15_161 = arith.constant 15 : index
    %c0_162 = arith.constant 0 : index
    %289 = vector.load %arg3[%c15_161, %c0_162] : memref<41x64xf32, #tpu.memory_space<vmem>>, vector<1x32xf32>
    %c16 = arith.constant 16 : index
    %c0_163 = arith.constant 0 : index
    %290 = vector.load %arg3[%c16, %c0_163] : memref<41x64xf32, #tpu.memory_space<vmem>>, vector<1x32xf32>
    %cst_164 = arith.constant dense<0.000000e+00> : vector<16xf32>
    %291 = vector.multi_reduction <add>, %288, %cst_164 [1] : vector<16x32xf32> to vector<16xf32>
    %292 = vector.shape_cast %291 : vector<16xf32> to vector<16x1xf32>
    %cst_165 = arith.constant 3.200000e+01 : f32
    %293 = vector.broadcast %cst_165 : f32 to vector<16x1xf32>
    %294 = arith.divf %292, %293 : vector<16x1xf32>
    %295 = vector.broadcast %294 : vector<16x1xf32> to vector<16x32xf32>
    %296 = arith.subf %288, %295 : vector<16x32xf32>
    %297 = arith.mulf %296, %296 : vector<16x32xf32>
    %cst_166 = arith.constant dense<0.000000e+00> : vector<16xf32>
    %298 = vector.multi_reduction <add>, %297, %cst_166 [1] : vector<16x32xf32> to vector<16xf32>
    %299 = vector.shape_cast %298 : vector<16xf32> to vector<16x1xf32>
    %cst_167 = arith.constant 3.200000e+01 : f32
    %300 = vector.broadcast %cst_167 : f32 to vector<16x1xf32>
    %301 = arith.divf %299, %300 : vector<16x1xf32>
    %302 = vector.broadcast %294 : vector<16x1xf32> to vector<16x32xf32>
    %303 = arith.subf %288, %302 : vector<16x32xf32>
    %cst_168 = arith.constant 9.99999974E-6 : f32
    %304 = vector.broadcast %cst_168 : f32 to vector<16x1xf32>
    %305 = arith.addf %301, %304 : vector<16x1xf32>
    %306 = math.rsqrt %305 : vector<16x1xf32>
    %307 = vector.broadcast %306 : vector<16x1xf32> to vector<16x32xf32>
    %308 = arith.mulf %303, %307 : vector<16x32xf32>
    %309 = vector.broadcast %289 : vector<1x32xf32> to vector<16x32xf32>
    %310 = arith.mulf %308, %309 : vector<16x32xf32>
    %311 = vector.broadcast %290 : vector<1x32xf32> to vector<16x32xf32>
    %312 = arith.addf %310, %311 : vector<16x32xf32>
    %313 = arith.truncf %312 : vector<16x32xf32> to vector<16x32xbf16>
    %c448 = arith.constant 448 : index
    %c0_169 = arith.constant 0 : index
    %314 = vector.load %arg2[%c448, %c0_169] : memref<1120x64xbf16, #tpu.memory_space<vmem>>, vector<32x64xbf16>
    %c480 = arith.constant 480 : index
    %c0_170 = arith.constant 0 : index
    %315 = vector.load %arg2[%c480, %c0_170] : memref<1120x64xbf16, #tpu.memory_space<vmem>>, vector<64x32xbf16>
    %cst_171 = arith.constant dense<0.000000e+00> : vector<16x64xf32>
    %316 = tpu.matmul %313, %314, %cst_171 {dimension_numbers = #tpu.dot_dimension_numbers<[1], [0], [0], [1], [0, 0, 1, 1], [], []>} : vector<16x32xbf16>, vector<32x64xbf16>, vector<16x64xf32> -> vector<16x64xf32>
    %c17 = arith.constant 17 : index
    %c0_172 = arith.constant 0 : index
    %317 = vector.load %arg3[%c17, %c0_172] : memref<41x64xf32, #tpu.memory_space<vmem>>, vector<1x64xf32>
    %318 = vector.broadcast %317 : vector<1x64xf32> to vector<16x64xf32>
    %319 = arith.addf %316, %318 : vector<16x64xf32>
    %320 = arith.mulf %319, %319 : vector<16x64xf32>
    %321 = arith.mulf %319, %320 : vector<16x64xf32>
    %cst_173 = arith.constant 4.471500e-02 : f32
    %322 = vector.broadcast %cst_173 : f32 to vector<16x64xf32>
    %323 = arith.mulf %322, %321 : vector<16x64xf32>
    %324 = arith.addf %319, %323 : vector<16x64xf32>
    %cst_174 = arith.constant 0.797884583 : f32
    %325 = vector.broadcast %cst_174 : f32 to vector<16x64xf32>
    %326 = arith.mulf %325, %324 : vector<16x64xf32>
    %327 = math.tanh %326 : vector<16x64xf32>
    %cst_175 = arith.constant 1.000000e+00 : f32
    %328 = vector.broadcast %cst_175 : f32 to vector<16x64xf32>
    %329 = arith.addf %328, %327 : vector<16x64xf32>
    %cst_176 = arith.constant 5.000000e-01 : f32
    %330 = vector.broadcast %cst_176 : f32 to vector<16x64xf32>
    %331 = arith.mulf %330, %329 : vector<16x64xf32>
    %332 = arith.mulf %319, %331 : vector<16x64xf32>
    %333 = arith.truncf %332 : vector<16x64xf32> to vector<16x64xbf16>
    %cst_177 = arith.constant dense<0.000000e+00> : vector<16x32xf32>
    %334 = tpu.matmul %333, %315, %cst_177 {dimension_numbers = #tpu.dot_dimension_numbers<[1], [0], [0], [1], [0, 0, 1, 1], [], []>} : vector<16x64xbf16>, vector<64x32xbf16>, vector<16x32xf32> -> vector<16x32xf32>
    %c18 = arith.constant 18 : index
    %c0_178 = arith.constant 0 : index
    %335 = vector.load %arg3[%c18, %c0_178] : memref<41x64xf32, #tpu.memory_space<vmem>>, vector<1x32xf32>
    %336 = vector.broadcast %335 : vector<1x32xf32> to vector<16x32xf32>
    %337 = arith.addf %334, %336 : vector<16x32xf32>
    %338 = arith.addf %337, %312 : vector<16x32xf32>
    %c19 = arith.constant 19 : index
    %c0_179 = arith.constant 0 : index
    %339 = vector.load %arg3[%c19, %c0_179] : memref<41x64xf32, #tpu.memory_space<vmem>>, vector<1x32xf32>
    %c20 = arith.constant 20 : index
    %c0_180 = arith.constant 0 : index
    %340 = vector.load %arg3[%c20, %c0_180] : memref<41x64xf32, #tpu.memory_space<vmem>>, vector<1x32xf32>
    %cst_181 = arith.constant dense<0.000000e+00> : vector<16xf32>
    %341 = vector.multi_reduction <add>, %338, %cst_181 [1] : vector<16x32xf32> to vector<16xf32>
    %342 = vector.shape_cast %341 : vector<16xf32> to vector<16x1xf32>
    %cst_182 = arith.constant 3.200000e+01 : f32
    %343 = vector.broadcast %cst_182 : f32 to vector<16x1xf32>
    %344 = arith.divf %342, %343 : vector<16x1xf32>
    %345 = vector.broadcast %344 : vector<16x1xf32> to vector<16x32xf32>
    %346 = arith.subf %338, %345 : vector<16x32xf32>
    %347 = arith.mulf %346, %346 : vector<16x32xf32>
    %cst_183 = arith.constant dense<0.000000e+00> : vector<16xf32>
    %348 = vector.multi_reduction <add>, %347, %cst_183 [1] : vector<16x32xf32> to vector<16xf32>
    %349 = vector.shape_cast %348 : vector<16xf32> to vector<16x1xf32>
    %cst_184 = arith.constant 3.200000e+01 : f32
    %350 = vector.broadcast %cst_184 : f32 to vector<16x1xf32>
    %351 = arith.divf %349, %350 : vector<16x1xf32>
    %352 = vector.broadcast %344 : vector<16x1xf32> to vector<16x32xf32>
    %353 = arith.subf %338, %352 : vector<16x32xf32>
    %cst_185 = arith.constant 9.99999974E-6 : f32
    %354 = vector.broadcast %cst_185 : f32 to vector<16x1xf32>
    %355 = arith.addf %351, %354 : vector<16x1xf32>
    %356 = math.rsqrt %355 : vector<16x1xf32>
    %357 = vector.broadcast %356 : vector<16x1xf32> to vector<16x32xf32>
    %358 = arith.mulf %353, %357 : vector<16x32xf32>
    %359 = vector.broadcast %339 : vector<1x32xf32> to vector<16x32xf32>
    %360 = arith.mulf %358, %359 : vector<16x32xf32>
    %361 = vector.broadcast %340 : vector<1x32xf32> to vector<16x32xf32>
    %362 = arith.addf %360, %361 : vector<16x32xf32>
    %363 = arith.truncf %362 : vector<16x32xf32> to vector<16x32xbf16>
    %c544 = arith.constant 544 : index
    %c0_186 = arith.constant 0 : index
    %364 = vector.load %arg2[%c544, %c0_186] : memref<1120x64xbf16, #tpu.memory_space<vmem>>, vector<32x8xbf16>
    %c672 = arith.constant 672 : index
    %c0_187 = arith.constant 0 : index
    %365 = vector.load %arg2[%c672, %c0_187] : memref<1120x64xbf16, #tpu.memory_space<vmem>>, vector<32x8xbf16>
    %c800 = arith.constant 800 : index
    %c0_188 = arith.constant 0 : index
    %366 = vector.load %arg2[%c800, %c0_188] : memref<1120x64xbf16, #tpu.memory_space<vmem>>, vector<32x8xbf16>
    %c928 = arith.constant 928 : index
    %c0_189 = arith.constant 0 : index
    %367 = vector.load %arg2[%c928, %c0_189] : memref<1120x64xbf16, #tpu.memory_space<vmem>>, vector<8x32xbf16>
    %cst_190 = arith.constant dense<0.000000e+00> : vector<16x8xf32>
    %368 = tpu.matmul %363, %364, %cst_190 {dimension_numbers = #tpu.dot_dimension_numbers<[1], [0], [0], [1], [0, 0, 1, 1], [], []>} : vector<16x32xbf16>, vector<32x8xbf16>, vector<16x8xf32> -> vector<16x8xf32>
    %c21 = arith.constant 21 : index
    %c0_191 = arith.constant 0 : index
    %369 = vector.load %arg3[%c21, %c0_191] : memref<41x64xf32, #tpu.memory_space<vmem>>, vector<1x8xf32>
    %370 = vector.broadcast %369 : vector<1x8xf32> to vector<16x8xf32>
    %371 = arith.addf %368, %370 : vector<16x8xf32>
    %cst_192 = arith.constant dense<0.000000e+00> : vector<16x8xf32>
    %372 = tpu.matmul %363, %365, %cst_192 {dimension_numbers = #tpu.dot_dimension_numbers<[1], [0], [0], [1], [0, 0, 1, 1], [], []>} : vector<16x32xbf16>, vector<32x8xbf16>, vector<16x8xf32> -> vector<16x8xf32>
    %c25 = arith.constant 25 : index
    %c0_193 = arith.constant 0 : index
    %373 = vector.load %arg3[%c25, %c0_193] : memref<41x64xf32, #tpu.memory_space<vmem>>, vector<1x8xf32>
    %374 = vector.broadcast %373 : vector<1x8xf32> to vector<16x8xf32>
    %375 = arith.addf %372, %374 : vector<16x8xf32>
    %cst_194 = arith.constant dense<0.000000e+00> : vector<16x8xf32>
    %376 = tpu.matmul %363, %366, %cst_194 {dimension_numbers = #tpu.dot_dimension_numbers<[1], [0], [0], [1], [0, 0, 1, 1], [], []>} : vector<16x32xbf16>, vector<32x8xbf16>, vector<16x8xf32> -> vector<16x8xf32>
    %c29 = arith.constant 29 : index
    %c0_195 = arith.constant 0 : index
    %377 = vector.load %arg3[%c29, %c0_195] : memref<41x64xf32, #tpu.memory_space<vmem>>, vector<1x8xf32>
    %378 = vector.broadcast %377 : vector<1x8xf32> to vector<16x8xf32>
    %379 = arith.addf %376, %378 : vector<16x8xf32>
    %380 = vector.shape_cast %371 : vector<16x8xf32> to vector<2x8x8xf32>
    %381 = arith.truncf %380 : vector<2x8x8xf32> to vector<2x8x8xbf16>
    %382 = vector.shape_cast %375 : vector<16x8xf32> to vector<2x8x8xf32>
    %383 = arith.truncf %382 : vector<2x8x8xf32> to vector<2x8x8xbf16>
    %384 = vector.shape_cast %379 : vector<16x8xf32> to vector<2x8x8xf32>
    %385 = arith.truncf %384 : vector<2x8x8xf32> to vector<2x8x8xbf16>
    "tpu.trace_start"() <{level = 10 : i32, message = "bqd,bkd->bqk"}> : () -> ()
    %cst_196 = arith.constant dense<0.000000e+00> : vector<2x8x8xf32>
    %386 = tpu.matmul %381, %383, %cst_196 {dimension_numbers = #tpu.dot_dimension_numbers<[2], [2], [1], [1], [0, 0, 0, 1, 1, 1], [0], [0]>} : vector<2x8x8xbf16>, vector<2x8x8xbf16>, vector<2x8x8xf32> -> vector<2x8x8xf32>
    "tpu.trace_stop"() : () -> ()
    %cst_197 = arith.constant 0.353553385 : f32
    %387 = vector.broadcast %cst_197 : f32 to vector<2x8x8xf32>
    %388 = arith.mulf %386, %387 : vector<2x8x8xf32>
    %cst_198 = arith.constant dense<0xFF800000> : vector<2x8xf32>
    %389 = vector.multi_reduction <maximumf>, %388, %cst_198 [2] : vector<2x8x8xf32> to vector<2x8xf32>
    %390 = vector.shape_cast %389 : vector<2x8xf32> to vector<2x8x1xf32>
    %391 = vector.broadcast %390 : vector<2x8x1xf32> to vector<2x8x8xf32>
    %392 = arith.subf %388, %391 : vector<2x8x8xf32>
    %393 = math.exp %392 : vector<2x8x8xf32>
    %cst_199 = arith.constant dense<0.000000e+00> : vector<2x8xf32>
    %394 = vector.multi_reduction <add>, %393, %cst_199 [2] : vector<2x8x8xf32> to vector<2x8xf32>
    %395 = vector.shape_cast %394 : vector<2x8xf32> to vector<2x8x1xf32>
    %396 = tpu.reciprocal %395 {approx = true} : vector<2x8x1xf32> -> vector<2x8x1xf32>
    %397 = vector.broadcast %396 : vector<2x8x1xf32> to vector<2x8x8xf32>
    %398 = arith.mulf %393, %397 : vector<2x8x8xf32>
    %399 = arith.truncf %398 : vector<2x8x8xf32> to vector<2x8x8xbf16>
    "tpu.trace_start"() <{level = 10 : i32, message = "bqk,bkd->bqd"}> : () -> ()
    %cst_200 = arith.constant dense<0.000000e+00> : vector<2x8x8xf32>
    %400 = tpu.matmul %399, %385, %cst_200 {dimension_numbers = #tpu.dot_dimension_numbers<[2], [1], [1], [2], [0, 0, 0, 1, 1, 2], [0], [0]>} : vector<2x8x8xbf16>, vector<2x8x8xbf16>, vector<2x8x8xf32> -> vector<2x8x8xf32>
    "tpu.trace_stop"() : () -> ()
    %401 = vector.shape_cast %400 : vector<2x8x8xf32> to vector<16x8xf32>
    %402 = arith.truncf %401 : vector<16x8xf32> to vector<16x8xbf16>
    %cst_201 = arith.constant dense<0.000000e+00> : vector<16x32xf32>
    %403 = tpu.matmul %402, %367, %cst_201 {dimension_numbers = #tpu.dot_dimension_numbers<[1], [0], [0], [1], [0, 0, 1, 1], [], []>} : vector<16x8xbf16>, vector<8x32xbf16>, vector<16x32xf32> -> vector<16x32xf32>
    %c576 = arith.constant 576 : index
    %c0_202 = arith.constant 0 : index
    %404 = vector.load %arg2[%c576, %c0_202] : memref<1120x64xbf16, #tpu.memory_space<vmem>>, vector<32x8xbf16>
    %c704 = arith.constant 704 : index
    %c0_203 = arith.constant 0 : index
    %405 = vector.load %arg2[%c704, %c0_203] : memref<1120x64xbf16, #tpu.memory_space<vmem>>, vector<32x8xbf16>
    %c832 = arith.constant 832 : index
    %c0_204 = arith.constant 0 : index
    %406 = vector.load %arg2[%c832, %c0_204] : memref<1120x64xbf16, #tpu.memory_space<vmem>>, vector<32x8xbf16>
    %c944 = arith.constant 944 : index
    %c0_205 = arith.constant 0 : index
    %407 = vector.load %arg2[%c944, %c0_205] : memref<1120x64xbf16, #tpu.memory_space<vmem>>, vector<8x32xbf16>
    %cst_206 = arith.constant dense<0.000000e+00> : vector<16x8xf32>
    %408 = tpu.matmul %363, %404, %cst_206 {dimension_numbers = #tpu.dot_dimension_numbers<[1], [0], [0], [1], [0, 0, 1, 1], [], []>} : vector<16x32xbf16>, vector<32x8xbf16>, vector<16x8xf32> -> vector<16x8xf32>
    %c22 = arith.constant 22 : index
    %c0_207 = arith.constant 0 : index
    %409 = vector.load %arg3[%c22, %c0_207] : memref<41x64xf32, #tpu.memory_space<vmem>>, vector<1x8xf32>
    %410 = vector.broadcast %409 : vector<1x8xf32> to vector<16x8xf32>
    %411 = arith.addf %408, %410 : vector<16x8xf32>
    %cst_208 = arith.constant dense<0.000000e+00> : vector<16x8xf32>
    %412 = tpu.matmul %363, %405, %cst_208 {dimension_numbers = #tpu.dot_dimension_numbers<[1], [0], [0], [1], [0, 0, 1, 1], [], []>} : vector<16x32xbf16>, vector<32x8xbf16>, vector<16x8xf32> -> vector<16x8xf32>
    %c26 = arith.constant 26 : index
    %c0_209 = arith.constant 0 : index
    %413 = vector.load %arg3[%c26, %c0_209] : memref<41x64xf32, #tpu.memory_space<vmem>>, vector<1x8xf32>
    %414 = vector.broadcast %413 : vector<1x8xf32> to vector<16x8xf32>
    %415 = arith.addf %412, %414 : vector<16x8xf32>
    %cst_210 = arith.constant dense<0.000000e+00> : vector<16x8xf32>
    %416 = tpu.matmul %363, %406, %cst_210 {dimension_numbers = #tpu.dot_dimension_numbers<[1], [0], [0], [1], [0, 0, 1, 1], [], []>} : vector<16x32xbf16>, vector<32x8xbf16>, vector<16x8xf32> -> vector<16x8xf32>
    %c30 = arith.constant 30 : index
    %c0_211 = arith.constant 0 : index
    %417 = vector.load %arg3[%c30, %c0_211] : memref<41x64xf32, #tpu.memory_space<vmem>>, vector<1x8xf32>
    %418 = vector.broadcast %417 : vector<1x8xf32> to vector<16x8xf32>
    %419 = arith.addf %416, %418 : vector<16x8xf32>
    %420 = vector.shape_cast %411 : vector<16x8xf32> to vector<2x8x8xf32>
    %421 = arith.truncf %420 : vector<2x8x8xf32> to vector<2x8x8xbf16>
    %422 = vector.shape_cast %415 : vector<16x8xf32> to vector<2x8x8xf32>
    %423 = arith.truncf %422 : vector<2x8x8xf32> to vector<2x8x8xbf16>
    %424 = vector.shape_cast %419 : vector<16x8xf32> to vector<2x8x8xf32>
    %425 = arith.truncf %424 : vector<2x8x8xf32> to vector<2x8x8xbf16>
    "tpu.trace_start"() <{level = 10 : i32, message = "bqd,bkd->bqk"}> : () -> ()
    %cst_212 = arith.constant dense<0.000000e+00> : vector<2x8x8xf32>
    %426 = tpu.matmul %421, %423, %cst_212 {dimension_numbers = #tpu.dot_dimension_numbers<[2], [2], [1], [1], [0, 0, 0, 1, 1, 1], [0], [0]>} : vector<2x8x8xbf16>, vector<2x8x8xbf16>, vector<2x8x8xf32> -> vector<2x8x8xf32>
    "tpu.trace_stop"() : () -> ()
    %cst_213 = arith.constant 0.353553385 : f32
    %427 = vector.broadcast %cst_213 : f32 to vector<2x8x8xf32>
    %428 = arith.mulf %426, %427 : vector<2x8x8xf32>
    %cst_214 = arith.constant dense<0xFF800000> : vector<2x8xf32>
    %429 = vector.multi_reduction <maximumf>, %428, %cst_214 [2] : vector<2x8x8xf32> to vector<2x8xf32>
    %430 = vector.shape_cast %429 : vector<2x8xf32> to vector<2x8x1xf32>
    %431 = vector.broadcast %430 : vector<2x8x1xf32> to vector<2x8x8xf32>
    %432 = arith.subf %428, %431 : vector<2x8x8xf32>
    %433 = math.exp %432 : vector<2x8x8xf32>
    %cst_215 = arith.constant dense<0.000000e+00> : vector<2x8xf32>
    %434 = vector.multi_reduction <add>, %433, %cst_215 [2] : vector<2x8x8xf32> to vector<2x8xf32>
    %435 = vector.shape_cast %434 : vector<2x8xf32> to vector<2x8x1xf32>
    %436 = tpu.reciprocal %435 {approx = true} : vector<2x8x1xf32> -> vector<2x8x1xf32>
    %437 = vector.broadcast %436 : vector<2x8x1xf32> to vector<2x8x8xf32>
    %438 = arith.mulf %433, %437 : vector<2x8x8xf32>
    %439 = arith.truncf %438 : vector<2x8x8xf32> to vector<2x8x8xbf16>
    "tpu.trace_start"() <{level = 10 : i32, message = "bqk,bkd->bqd"}> : () -> ()
    %cst_216 = arith.constant dense<0.000000e+00> : vector<2x8x8xf32>
    %440 = tpu.matmul %439, %425, %cst_216 {dimension_numbers = #tpu.dot_dimension_numbers<[2], [1], [1], [2], [0, 0, 0, 1, 1, 2], [0], [0]>} : vector<2x8x8xbf16>, vector<2x8x8xbf16>, vector<2x8x8xf32> -> vector<2x8x8xf32>
    "tpu.trace_stop"() : () -> ()
    %441 = vector.shape_cast %440 : vector<2x8x8xf32> to vector<16x8xf32>
    %442 = arith.truncf %441 : vector<16x8xf32> to vector<16x8xbf16>
    %cst_217 = arith.constant dense<0.000000e+00> : vector<16x32xf32>
    %443 = tpu.matmul %442, %407, %cst_217 {dimension_numbers = #tpu.dot_dimension_numbers<[1], [0], [0], [1], [0, 0, 1, 1], [], []>} : vector<16x8xbf16>, vector<8x32xbf16>, vector<16x32xf32> -> vector<16x32xf32>
    %c608 = arith.constant 608 : index
    %c0_218 = arith.constant 0 : index
    %444 = vector.load %arg2[%c608, %c0_218] : memref<1120x64xbf16, #tpu.memory_space<vmem>>, vector<32x8xbf16>
    %c736 = arith.constant 736 : index
    %c0_219 = arith.constant 0 : index
    %445 = vector.load %arg2[%c736, %c0_219] : memref<1120x64xbf16, #tpu.memory_space<vmem>>, vector<32x8xbf16>
    %c864 = arith.constant 864 : index
    %c0_220 = arith.constant 0 : index
    %446 = vector.load %arg2[%c864, %c0_220] : memref<1120x64xbf16, #tpu.memory_space<vmem>>, vector<32x8xbf16>
    %c960 = arith.constant 960 : index
    %c0_221 = arith.constant 0 : index
    %447 = vector.load %arg2[%c960, %c0_221] : memref<1120x64xbf16, #tpu.memory_space<vmem>>, vector<8x32xbf16>
    %cst_222 = arith.constant dense<0.000000e+00> : vector<16x8xf32>
    %448 = tpu.matmul %363, %444, %cst_222 {dimension_numbers = #tpu.dot_dimension_numbers<[1], [0], [0], [1], [0, 0, 1, 1], [], []>} : vector<16x32xbf16>, vector<32x8xbf16>, vector<16x8xf32> -> vector<16x8xf32>
    %c23 = arith.constant 23 : index
    %c0_223 = arith.constant 0 : index
    %449 = vector.load %arg3[%c23, %c0_223] : memref<41x64xf32, #tpu.memory_space<vmem>>, vector<1x8xf32>
    %450 = vector.broadcast %449 : vector<1x8xf32> to vector<16x8xf32>
    %451 = arith.addf %448, %450 : vector<16x8xf32>
    %cst_224 = arith.constant dense<0.000000e+00> : vector<16x8xf32>
    %452 = tpu.matmul %363, %445, %cst_224 {dimension_numbers = #tpu.dot_dimension_numbers<[1], [0], [0], [1], [0, 0, 1, 1], [], []>} : vector<16x32xbf16>, vector<32x8xbf16>, vector<16x8xf32> -> vector<16x8xf32>
    %c27 = arith.constant 27 : index
    %c0_225 = arith.constant 0 : index
    %453 = vector.load %arg3[%c27, %c0_225] : memref<41x64xf32, #tpu.memory_space<vmem>>, vector<1x8xf32>
    %454 = vector.broadcast %453 : vector<1x8xf32> to vector<16x8xf32>
    %455 = arith.addf %452, %454 : vector<16x8xf32>
    %cst_226 = arith.constant dense<0.000000e+00> : vector<16x8xf32>
    %456 = tpu.matmul %363, %446, %cst_226 {dimension_numbers = #tpu.dot_dimension_numbers<[1], [0], [0], [1], [0, 0, 1, 1], [], []>} : vector<16x32xbf16>, vector<32x8xbf16>, vector<16x8xf32> -> vector<16x8xf32>
    %c31 = arith.constant 31 : index
    %c0_227 = arith.constant 0 : index
    %457 = vector.load %arg3[%c31, %c0_227] : memref<41x64xf32, #tpu.memory_space<vmem>>, vector<1x8xf32>
    %458 = vector.broadcast %457 : vector<1x8xf32> to vector<16x8xf32>
    %459 = arith.addf %456, %458 : vector<16x8xf32>
    %460 = vector.shape_cast %451 : vector<16x8xf32> to vector<2x8x8xf32>
    %461 = arith.truncf %460 : vector<2x8x8xf32> to vector<2x8x8xbf16>
    %462 = vector.shape_cast %455 : vector<16x8xf32> to vector<2x8x8xf32>
    %463 = arith.truncf %462 : vector<2x8x8xf32> to vector<2x8x8xbf16>
    %464 = vector.shape_cast %459 : vector<16x8xf32> to vector<2x8x8xf32>
    %465 = arith.truncf %464 : vector<2x8x8xf32> to vector<2x8x8xbf16>
    "tpu.trace_start"() <{level = 10 : i32, message = "bqd,bkd->bqk"}> : () -> ()
    %cst_228 = arith.constant dense<0.000000e+00> : vector<2x8x8xf32>
    %466 = tpu.matmul %461, %463, %cst_228 {dimension_numbers = #tpu.dot_dimension_numbers<[2], [2], [1], [1], [0, 0, 0, 1, 1, 1], [0], [0]>} : vector<2x8x8xbf16>, vector<2x8x8xbf16>, vector<2x8x8xf32> -> vector<2x8x8xf32>
    "tpu.trace_stop"() : () -> ()
    %cst_229 = arith.constant 0.353553385 : f32
    %467 = vector.broadcast %cst_229 : f32 to vector<2x8x8xf32>
    %468 = arith.mulf %466, %467 : vector<2x8x8xf32>
    %cst_230 = arith.constant dense<0xFF800000> : vector<2x8xf32>
    %469 = vector.multi_reduction <maximumf>, %468, %cst_230 [2] : vector<2x8x8xf32> to vector<2x8xf32>
    %470 = vector.shape_cast %469 : vector<2x8xf32> to vector<2x8x1xf32>
    %471 = vector.broadcast %470 : vector<2x8x1xf32> to vector<2x8x8xf32>
    %472 = arith.subf %468, %471 : vector<2x8x8xf32>
    %473 = math.exp %472 : vector<2x8x8xf32>
    %cst_231 = arith.constant dense<0.000000e+00> : vector<2x8xf32>
    %474 = vector.multi_reduction <add>, %473, %cst_231 [2] : vector<2x8x8xf32> to vector<2x8xf32>
    %475 = vector.shape_cast %474 : vector<2x8xf32> to vector<2x8x1xf32>
    %476 = tpu.reciprocal %475 {approx = true} : vector<2x8x1xf32> -> vector<2x8x1xf32>
    %477 = vector.broadcast %476 : vector<2x8x1xf32> to vector<2x8x8xf32>
    %478 = arith.mulf %473, %477 : vector<2x8x8xf32>
    %479 = arith.truncf %478 : vector<2x8x8xf32> to vector<2x8x8xbf16>
    "tpu.trace_start"() <{level = 10 : i32, message = "bqk,bkd->bqd"}> : () -> ()
    %cst_232 = arith.constant dense<0.000000e+00> : vector<2x8x8xf32>
    %480 = tpu.matmul %479, %465, %cst_232 {dimension_numbers = #tpu.dot_dimension_numbers<[2], [1], [1], [2], [0, 0, 0, 1, 1, 2], [0], [0]>} : vector<2x8x8xbf16>, vector<2x8x8xbf16>, vector<2x8x8xf32> -> vector<2x8x8xf32>
    "tpu.trace_stop"() : () -> ()
    %481 = vector.shape_cast %480 : vector<2x8x8xf32> to vector<16x8xf32>
    %482 = arith.truncf %481 : vector<16x8xf32> to vector<16x8xbf16>
    %cst_233 = arith.constant dense<0.000000e+00> : vector<16x32xf32>
    %483 = tpu.matmul %482, %447, %cst_233 {dimension_numbers = #tpu.dot_dimension_numbers<[1], [0], [0], [1], [0, 0, 1, 1], [], []>} : vector<16x8xbf16>, vector<8x32xbf16>, vector<16x32xf32> -> vector<16x32xf32>
    %c640 = arith.constant 640 : index
    %c0_234 = arith.constant 0 : index
    %484 = vector.load %arg2[%c640, %c0_234] : memref<1120x64xbf16, #tpu.memory_space<vmem>>, vector<32x8xbf16>
    %c768 = arith.constant 768 : index
    %c0_235 = arith.constant 0 : index
    %485 = vector.load %arg2[%c768, %c0_235] : memref<1120x64xbf16, #tpu.memory_space<vmem>>, vector<32x8xbf16>
    %c896 = arith.constant 896 : index
    %c0_236 = arith.constant 0 : index
    %486 = vector.load %arg2[%c896, %c0_236] : memref<1120x64xbf16, #tpu.memory_space<vmem>>, vector<32x8xbf16>
    %c976 = arith.constant 976 : index
    %c0_237 = arith.constant 0 : index
    %487 = vector.load %arg2[%c976, %c0_237] : memref<1120x64xbf16, #tpu.memory_space<vmem>>, vector<8x32xbf16>
    %cst_238 = arith.constant dense<0.000000e+00> : vector<16x8xf32>
    %488 = tpu.matmul %363, %484, %cst_238 {dimension_numbers = #tpu.dot_dimension_numbers<[1], [0], [0], [1], [0, 0, 1, 1], [], []>} : vector<16x32xbf16>, vector<32x8xbf16>, vector<16x8xf32> -> vector<16x8xf32>
    %c24 = arith.constant 24 : index
    %c0_239 = arith.constant 0 : index
    %489 = vector.load %arg3[%c24, %c0_239] : memref<41x64xf32, #tpu.memory_space<vmem>>, vector<1x8xf32>
    %490 = vector.broadcast %489 : vector<1x8xf32> to vector<16x8xf32>
    %491 = arith.addf %488, %490 : vector<16x8xf32>
    %cst_240 = arith.constant dense<0.000000e+00> : vector<16x8xf32>
    %492 = tpu.matmul %363, %485, %cst_240 {dimension_numbers = #tpu.dot_dimension_numbers<[1], [0], [0], [1], [0, 0, 1, 1], [], []>} : vector<16x32xbf16>, vector<32x8xbf16>, vector<16x8xf32> -> vector<16x8xf32>
    %c28 = arith.constant 28 : index
    %c0_241 = arith.constant 0 : index
    %493 = vector.load %arg3[%c28, %c0_241] : memref<41x64xf32, #tpu.memory_space<vmem>>, vector<1x8xf32>
    %494 = vector.broadcast %493 : vector<1x8xf32> to vector<16x8xf32>
    %495 = arith.addf %492, %494 : vector<16x8xf32>
    %cst_242 = arith.constant dense<0.000000e+00> : vector<16x8xf32>
    %496 = tpu.matmul %363, %486, %cst_242 {dimension_numbers = #tpu.dot_dimension_numbers<[1], [0], [0], [1], [0, 0, 1, 1], [], []>} : vector<16x32xbf16>, vector<32x8xbf16>, vector<16x8xf32> -> vector<16x8xf32>
    %c32_243 = arith.constant 32 : index
    %c0_244 = arith.constant 0 : index
    %497 = vector.load %arg3[%c32_243, %c0_244] : memref<41x64xf32, #tpu.memory_space<vmem>>, vector<1x8xf32>
    %498 = vector.broadcast %497 : vector<1x8xf32> to vector<16x8xf32>
    %499 = arith.addf %496, %498 : vector<16x8xf32>
    %500 = vector.shape_cast %491 : vector<16x8xf32> to vector<2x8x8xf32>
    %501 = arith.truncf %500 : vector<2x8x8xf32> to vector<2x8x8xbf16>
    %502 = vector.shape_cast %495 : vector<16x8xf32> to vector<2x8x8xf32>
    %503 = arith.truncf %502 : vector<2x8x8xf32> to vector<2x8x8xbf16>
    %504 = vector.shape_cast %499 : vector<16x8xf32> to vector<2x8x8xf32>
    %505 = arith.truncf %504 : vector<2x8x8xf32> to vector<2x8x8xbf16>
    "tpu.trace_start"() <{level = 10 : i32, message = "bqd,bkd->bqk"}> : () -> ()
    %cst_245 = arith.constant dense<0.000000e+00> : vector<2x8x8xf32>
    %506 = tpu.matmul %501, %503, %cst_245 {dimension_numbers = #tpu.dot_dimension_numbers<[2], [2], [1], [1], [0, 0, 0, 1, 1, 1], [0], [0]>} : vector<2x8x8xbf16>, vector<2x8x8xbf16>, vector<2x8x8xf32> -> vector<2x8x8xf32>
    "tpu.trace_stop"() : () -> ()
    %cst_246 = arith.constant 0.353553385 : f32
    %507 = vector.broadcast %cst_246 : f32 to vector<2x8x8xf32>
    %508 = arith.mulf %506, %507 : vector<2x8x8xf32>
    %cst_247 = arith.constant dense<0xFF800000> : vector<2x8xf32>
    %509 = vector.multi_reduction <maximumf>, %508, %cst_247 [2] : vector<2x8x8xf32> to vector<2x8xf32>
    %510 = vector.shape_cast %509 : vector<2x8xf32> to vector<2x8x1xf32>
    %511 = vector.broadcast %510 : vector<2x8x1xf32> to vector<2x8x8xf32>
    %512 = arith.subf %508, %511 : vector<2x8x8xf32>
    %513 = math.exp %512 : vector<2x8x8xf32>
    %cst_248 = arith.constant dense<0.000000e+00> : vector<2x8xf32>
    %514 = vector.multi_reduction <add>, %513, %cst_248 [2] : vector<2x8x8xf32> to vector<2x8xf32>
    %515 = vector.shape_cast %514 : vector<2x8xf32> to vector<2x8x1xf32>
    %516 = tpu.reciprocal %515 {approx = true} : vector<2x8x1xf32> -> vector<2x8x1xf32>
    %517 = vector.broadcast %516 : vector<2x8x1xf32> to vector<2x8x8xf32>
    %518 = arith.mulf %513, %517 : vector<2x8x8xf32>
    %519 = arith.truncf %518 : vector<2x8x8xf32> to vector<2x8x8xbf16>
    "tpu.trace_start"() <{level = 10 : i32, message = "bqk,bkd->bqd"}> : () -> ()
    %cst_249 = arith.constant dense<0.000000e+00> : vector<2x8x8xf32>
    %520 = tpu.matmul %519, %505, %cst_249 {dimension_numbers = #tpu.dot_dimension_numbers<[2], [1], [1], [2], [0, 0, 0, 1, 1, 2], [0], [0]>} : vector<2x8x8xbf16>, vector<2x8x8xbf16>, vector<2x8x8xf32> -> vector<2x8x8xf32>
    "tpu.trace_stop"() : () -> ()
    %521 = vector.shape_cast %520 : vector<2x8x8xf32> to vector<16x8xf32>
    %522 = arith.truncf %521 : vector<16x8xf32> to vector<16x8xbf16>
    %cst_250 = arith.constant dense<0.000000e+00> : vector<16x32xf32>
    %523 = tpu.matmul %522, %487, %cst_250 {dimension_numbers = #tpu.dot_dimension_numbers<[1], [0], [0], [1], [0, 0, 1, 1], [], []>} : vector<16x8xbf16>, vector<8x32xbf16>, vector<16x32xf32> -> vector<16x32xf32>
    %524 = arith.addf %403, %443 : vector<16x32xf32>
    %525 = arith.addf %524, %483 : vector<16x32xf32>
    %526 = arith.addf %525, %523 : vector<16x32xf32>
    %c33 = arith.constant 33 : index
    %c0_251 = arith.constant 0 : index
    %527 = vector.load %arg3[%c33, %c0_251] : memref<41x64xf32, #tpu.memory_space<vmem>>, vector<1x32xf32>
    %528 = vector.broadcast %527 : vector<1x32xf32> to vector<16x32xf32>
    %529 = arith.addf %526, %528 : vector<16x32xf32>
    %530 = arith.addf %529, %362 : vector<16x32xf32>
    %c34 = arith.constant 34 : index
    %c0_252 = arith.constant 0 : index
    %531 = vector.load %arg3[%c34, %c0_252] : memref<41x64xf32, #tpu.memory_space<vmem>>, vector<1x32xf32>
    %c35 = arith.constant 35 : index
    %c0_253 = arith.constant 0 : index
    %532 = vector.load %arg3[%c35, %c0_253] : memref<41x64xf32, #tpu.memory_space<vmem>>, vector<1x32xf32>
    %cst_254 = arith.constant dense<0.000000e+00> : vector<16xf32>
    %533 = vector.multi_reduction <add>, %530, %cst_254 [1] : vector<16x32xf32> to vector<16xf32>
    %534 = vector.shape_cast %533 : vector<16xf32> to vector<16x1xf32>
    %cst_255 = arith.constant 3.200000e+01 : f32
    %535 = vector.broadcast %cst_255 : f32 to vector<16x1xf32>
    %536 = arith.divf %534, %535 : vector<16x1xf32>
    %537 = vector.broadcast %536 : vector<16x1xf32> to vector<16x32xf32>
    %538 = arith.subf %530, %537 : vector<16x32xf32>
    %539 = arith.mulf %538, %538 : vector<16x32xf32>
    %cst_256 = arith.constant dense<0.000000e+00> : vector<16xf32>
    %540 = vector.multi_reduction <add>, %539, %cst_256 [1] : vector<16x32xf32> to vector<16xf32>
    %541 = vector.shape_cast %540 : vector<16xf32> to vector<16x1xf32>
    %cst_257 = arith.constant 3.200000e+01 : f32
    %542 = vector.broadcast %cst_257 : f32 to vector<16x1xf32>
    %543 = arith.divf %541, %542 : vector<16x1xf32>
    %544 = vector.broadcast %536 : vector<16x1xf32> to vector<16x32xf32>
    %545 = arith.subf %530, %544 : vector<16x32xf32>
    %cst_258 = arith.constant 9.99999974E-6 : f32
    %546 = vector.broadcast %cst_258 : f32 to vector<16x1xf32>
    %547 = arith.addf %543, %546 : vector<16x1xf32>
    %548 = math.rsqrt %547 : vector<16x1xf32>
    %549 = vector.broadcast %548 : vector<16x1xf32> to vector<16x32xf32>
    %550 = arith.mulf %545, %549 : vector<16x32xf32>
    %551 = vector.broadcast %531 : vector<1x32xf32> to vector<16x32xf32>
    %552 = arith.mulf %550, %551 : vector<16x32xf32>
    %553 = vector.broadcast %532 : vector<1x32xf32> to vector<16x32xf32>
    %554 = arith.addf %552, %553 : vector<16x32xf32>
    %555 = arith.truncf %554 : vector<16x32xf32> to vector<16x32xbf16>
    %c992 = arith.constant 992 : index
    %c0_259 = arith.constant 0 : index
    %556 = vector.load %arg2[%c992, %c0_259] : memref<1120x64xbf16, #tpu.memory_space<vmem>>, vector<32x64xbf16>
    %c1024 = arith.constant 1024 : index
    %c0_260 = arith.constant 0 : index
    %557 = vector.load %arg2[%c1024, %c0_260] : memref<1120x64xbf16, #tpu.memory_space<vmem>>, vector<64x32xbf16>
    %cst_261 = arith.constant dense<0.000000e+00> : vector<16x64xf32>
    %558 = tpu.matmul %555, %556, %cst_261 {dimension_numbers = #tpu.dot_dimension_numbers<[1], [0], [0], [1], [0, 0, 1, 1], [], []>} : vector<16x32xbf16>, vector<32x64xbf16>, vector<16x64xf32> -> vector<16x64xf32>
    %c36 = arith.constant 36 : index
    %c0_262 = arith.constant 0 : index
    %559 = vector.load %arg3[%c36, %c0_262] : memref<41x64xf32, #tpu.memory_space<vmem>>, vector<1x64xf32>
    %560 = vector.broadcast %559 : vector<1x64xf32> to vector<16x64xf32>
    %561 = arith.addf %558, %560 : vector<16x64xf32>
    %562 = arith.mulf %561, %561 : vector<16x64xf32>
    %563 = arith.mulf %561, %562 : vector<16x64xf32>
    %cst_263 = arith.constant 4.471500e-02 : f32
    %564 = vector.broadcast %cst_263 : f32 to vector<16x64xf32>
    %565 = arith.mulf %564, %563 : vector<16x64xf32>
    %566 = arith.addf %561, %565 : vector<16x64xf32>
    %cst_264 = arith.constant 0.797884583 : f32
    %567 = vector.broadcast %cst_264 : f32 to vector<16x64xf32>
    %568 = arith.mulf %567, %566 : vector<16x64xf32>
    %569 = math.tanh %568 : vector<16x64xf32>
    %cst_265 = arith.constant 1.000000e+00 : f32
    %570 = vector.broadcast %cst_265 : f32 to vector<16x64xf32>
    %571 = arith.addf %570, %569 : vector<16x64xf32>
    %cst_266 = arith.constant 5.000000e-01 : f32
    %572 = vector.broadcast %cst_266 : f32 to vector<16x64xf32>
    %573 = arith.mulf %572, %571 : vector<16x64xf32>
    %574 = arith.mulf %561, %573 : vector<16x64xf32>
    %575 = arith.truncf %574 : vector<16x64xf32> to vector<16x64xbf16>
    %cst_267 = arith.constant dense<0.000000e+00> : vector<16x32xf32>
    %576 = tpu.matmul %575, %557, %cst_267 {dimension_numbers = #tpu.dot_dimension_numbers<[1], [0], [0], [1], [0, 0, 1, 1], [], []>} : vector<16x64xbf16>, vector<64x32xbf16>, vector<16x32xf32> -> vector<16x32xf32>
    %c37 = arith.constant 37 : index
    %c0_268 = arith.constant 0 : index
    %577 = vector.load %arg3[%c37, %c0_268] : memref<41x64xf32, #tpu.memory_space<vmem>>, vector<1x32xf32>
    %578 = vector.broadcast %577 : vector<1x32xf32> to vector<16x32xf32>
    %579 = arith.addf %576, %578 : vector<16x32xf32>
    %580 = arith.addf %579, %554 : vector<16x32xf32>
    %c38 = arith.constant 38 : index
    %c0_269 = arith.constant 0 : index
    %581 = vector.load %arg3[%c38, %c0_269] : memref<41x64xf32, #tpu.memory_space<vmem>>, vector<1x32xf32>
    %c39 = arith.constant 39 : index
    %c0_270 = arith.constant 0 : index
    %582 = vector.load %arg3[%c39, %c0_270] : memref<41x64xf32, #tpu.memory_space<vmem>>, vector<1x32xf32>
    %cst_271 = arith.constant dense<0.000000e+00> : vector<16xf32>
    %583 = vector.multi_reduction <add>, %580, %cst_271 [1] : vector<16x32xf32> to vector<16xf32>
    %584 = vector.shape_cast %583 : vector<16xf32> to vector<16x1xf32>
    %cst_272 = arith.constant 3.200000e+01 : f32
    %585 = vector.broadcast %cst_272 : f32 to vector<16x1xf32>
    %586 = arith.divf %584, %585 : vector<16x1xf32>
    %587 = vector.broadcast %586 : vector<16x1xf32> to vector<16x32xf32>
    %588 = arith.subf %580, %587 : vector<16x32xf32>
    %589 = arith.mulf %588, %588 : vector<16x32xf32>
    %cst_273 = arith.constant dense<0.000000e+00> : vector<16xf32>
    %590 = vector.multi_reduction <add>, %589, %cst_273 [1] : vector<16x32xf32> to vector<16xf32>
    %591 = vector.shape_cast %590 : vector<16xf32> to vector<16x1xf32>
    %cst_274 = arith.constant 3.200000e+01 : f32
    %592 = vector.broadcast %cst_274 : f32 to vector<16x1xf32>
    %593 = arith.divf %591, %592 : vector<16x1xf32>
    %594 = vector.broadcast %586 : vector<16x1xf32> to vector<16x32xf32>
    %595 = arith.subf %580, %594 : vector<16x32xf32>
    %cst_275 = arith.constant 9.99999974E-6 : f32
    %596 = vector.broadcast %cst_275 : f32 to vector<16x1xf32>
    %597 = arith.addf %593, %596 : vector<16x1xf32>
    %598 = math.rsqrt %597 : vector<16x1xf32>
    %599 = vector.broadcast %598 : vector<16x1xf32> to vector<16x32xf32>
    %600 = arith.mulf %595, %599 : vector<16x32xf32>
    %601 = vector.broadcast %581 : vector<1x32xf32> to vector<16x32xf32>
    %602 = arith.mulf %600, %601 : vector<16x32xf32>
    %603 = vector.broadcast %582 : vector<1x32xf32> to vector<16x32xf32>
    %604 = arith.addf %602, %603 : vector<16x32xf32>
    %605 = vector.extract_strided_slice %604 {offsets = [7, 0], sizes = [1, 32], strides = [1, 1]} : vector<16x32xf32> to vector<1x32xf32>
    %606 = vector.extract_strided_slice %604 {offsets = [15, 0], sizes = [1, 32], strides = [1, 1]} : vector<16x32xf32> to vector<1x32xf32>
    %607 = tpu.concatenate %605, %606 in 0 : vector<1x32xf32>, vector<1x32xf32> -> vector<2x32xf32>
    %c1088 = arith.constant 1088 : index
    %c0_276 = arith.constant 0 : index
    %608 = vector.load %arg2[%c1088, %c0_276] : memref<1120x64xbf16, #tpu.memory_space<vmem>>, vector<32x4xbf16>
    %609 = arith.truncf %607 : vector<2x32xf32> to vector<2x32xbf16>
    %cst_277 = arith.constant dense<0.000000e+00> : vector<2x4xf32>
    %610 = tpu.matmul %609, %608, %cst_277 {dimension_numbers = #tpu.dot_dimension_numbers<[1], [0], [0], [1], [0, 0, 1, 1], [], []>} : vector<2x32xbf16>, vector<32x4xbf16>, vector<2x4xf32> -> vector<2x4xf32>
    %c40 = arith.constant 40 : index
    %c0_278 = arith.constant 0 : index
    %611 = vector.load %arg3[%c40, %c0_278] : memref<41x64xf32, #tpu.memory_space<vmem>>, vector<1x4xf32>
    %612 = vector.broadcast %611 : vector<1x4xf32> to vector<2x4xf32>
    %613 = arith.addf %610, %612 : vector<2x4xf32>
    %614 = arith.negf %613 : vector<2x4xf32>
    %615 = math.exp %614 : vector<2x4xf32>
    %cst_279 = arith.constant 1.000000e+00 : f32
    %616 = vector.broadcast %cst_279 : f32 to vector<2x4xf32>
    %617 = arith.addf %616, %615 : vector<2x4xf32>
    %618 = arith.divf %616, %617 : vector<2x4xf32>
    %c0_280 = arith.constant 0 : index
    %c0_281 = arith.constant 0 : index
    %619 = vector.load %arg4[%c0_280, %c0_281] : memref<2x4xf32, #tpu.memory_space<vmem>>, vector<2x4xf32>
    tpu.vector_store %arg4[%c0_280, %c0_281], %618 {strides = array<i32>} : memref<2x4xf32, #tpu.memory_space<vmem>>, vector<2x4xf32>,
    return
  }
}

</mosaic_0001>

<bundles_post_ra>
// kernel: xlmr_encoder_forward.1
= control target key start
LH: loop header
LB: loop body
LE: loop exit
PB: predicated region body
PF: predicated region fallthrough
CT: control target
= control target key end

     0   :  { %9 = vsyncpa [#allocation5], 0  ;;  %s6465_s0 = inlined_call_operand.vmem [shape: s32[16], index: 0, kind: input, shape index: {}]   ;;  %s6466_s1 = inlined_call_operand.vmem [shape: f32[108,32], index: 1, kind: input, shape index: {}]   ;;  %s6467_s2 = inlined_call_operand.vmem [shape: bf16[1120,64], index: 2, kind: input, shape index: {}]   ;;  %s6468_s3 = inlined_call_operand.vmem [shape: f32[41,64], index: 3, kind: input, shape index: {}]   ;;  %s6469_s4 = inlined_call_operand.hbm [shape: f32[2,4], index: 4, kind: output, shape index: {}]  }
   0x1   :  { %10 = vsyncpa [#allocation4], 0  ;;  %s17_s17 = sshll.u32 %s6465_s0, 4  ;;  %s18_s17 = int_to_ptr.vmem [resolvable:$true] %s17_s17 }
   0x2   :  { %s5427_s18 = scalar_lea.vmem %s18_s17, 16  ;;  %p5432_p1 = scmp.lt.s32.totalorder %s18_s17, %s18_s17 }
   0x3   :  { %p5428_p0 = scmp.ne.s32.totalorder %s18_s17, %s5427_s18  ;;  %p5433_p2 = scmp.lt.s32.totalorder %s5427_s18, %s5427_s18 }
   0x5   :  { %p5434_p3 = por %p5433_p2, %p5432_p1 }
   0x7   :  { %p5435_p4 = pnand %p5434_p3, %p5428_p0 }
   0x9   :  { %5438 = shalt.err (!%p5435_p4)
}
   0xa   :  { %s5465_s19 = smov [#allocation3]  }
   0xb   :  { %20 = dma.vmem_to_smem %s18_s17, 16, %s5465_s19, [#allocation5]  }
   0xc   :  { %5461 = dma.done.wait [#allocation5], 16  }
   0xd   :  { %5462 = vsyncadd [#allocation5], 4294967280 }
   0xe   :  { %30 = sfence }
   0xf   :  { %s32_s20 = sld [smem:[#allocation3]]  ;;  %s4426_s21 = sld [smem:[#allocation3 + $0x1]]  ;;  %v35_v0 = vld [vmem:[%s6466_s1 + $0x64] sm:$0x1]  ;;  %vm37_vm0 = vcmask 253952   ;;  %vm133_vm1 = vcmask 261120  }
  0x10   :  { %s4427_s22 = sld [smem:[#allocation3 + $0x2]]  ;;  %s4428_s23 = sld [smem:[#allocation3 + $0x3]]  ;;  %v42_v1 = vld [vmem:[%s6466_s1 + $0x65] sm:$0x1]  ;;  %v48_v2 = vld [vmem:[%s6466_s1 + $0x66] sm:$0x1] }
  0x11   :  { %s5500_s0 = sld [smem:[#allocation3 + $0x4]]  ;;  %s5502_s26 = sld [smem:[#allocation3 + $0x5]]  ;;  %v54_v3 = vld [vmem:[%s6466_s1 + $0x67] sm:$0x1]  ;;  %v60_v4 = vld [vmem:[%s6466_s1 + $0x68] sm:$0x1] }
  0x12   :  { %s5507_s29 = sld [smem:[#allocation3 + $0x6]]  ;;  %s5512_s6 = sld [smem:[#allocation3 + $0x7]]  ;;  %v66_v6 = vld [vmem:[%s6466_s1 + $0x69] sm:$0x1]  ;;  %v72_v7 = vld [vmem:[%s6466_s1 + $0x6a] sm:$0x1] }
  0x13   :  { %s5514_s7 = sld [smem:[#allocation3 + $0x8]]  ;;  %s5525_s15 = sld [smem:[#allocation3 + $0x9]]  ;;  %v78_v14 = vld [vmem:[%s6466_s1 + $0x6b] sm:$0x1]  ;;  %v84_v15 = vld [vmem:[%s6466_s1 + $0x64] sm:$0x1] }
  0x14   :  { %s5542_s9 = sld [smem:[#allocation3 + $0xa]]  ;;  %v90_v22 = vld [vmem:[%s6466_s1 + $0x65] sm:$0x1]  ;;  %v96_v23 = vld [vmem:[%s6466_s1 + $0x66] sm:$0x1]  ;;  %s4439_s16 = sld [smem:[#allocation3 + $0xe]] }
  0x15   :  { %s33_s10 = scalar_lea.vmem %s6466_s1, %s32_s20  ;;  %s40_s18 = scalar_lea.vmem %s6466_s1, %s4426_s21  ;;  %v102_v30 = vld [vmem:[%s6466_s1 + $0x67] sm:$0x1]  ;;  %v108_v33 = vld [vmem:[%s6466_s1 + $0x68] sm:$0x1]  ;;  %v114_v35 = vld [vmem:[%s6466_s1 + $0x69] sm:$0x1] }
  0x16   :  { %v34_v5 = vld [vmem:[%s33_s10] sm:$0x1]  ;;  %s46_s20 = scalar_lea.vmem %s6466_s1, %s4427_s22  ;;  %s52_s21 = scalar_lea.vmem %s6466_s1, %s4428_s23  ;;  %v120_v36 = vld [vmem:[%s6466_s1 + $0x6a] sm:$0x1]  ;;  %v126_v38 = vld [vmem:[%s6466_s1 + $0x6b] sm:$0x1] }
  0x17   :  { %v36_v8 = vadd.f32 %v35_v0, %v34_v5  ;;  %v41_v9 = vld [vmem:[%s40_s18] sm:$0x1]  ;;  %s58_s11 = scalar_lea.vmem %s6466_s1, %s5500_s0  ;;  %s64_s14 = scalar_lea.vmem %s6466_s1, %s5502_s26  ;;  %v5466_v0 = vmov 0.0   ;;  %vm5467_vm2 = vmmov 0   ;;  %vm370_vm3 = vcmask 64512  }
  0x18   :  { %v47_v10 = vld [vmem:[%s46_s20] sm:$0x1]  ;;  %v43_v11 = vadd.f32 %v42_v1, %v41_v9  ;;  %s70_s24 = scalar_lea.vmem %s6466_s1, %s5507_s29  ;;  %s5563_s20 = sld [smem:[#allocation3 + $0xb]]  ;;  %4785 = vmatprep.subr.bf16.mxu0 %v5466_v0  ;;  %4793 = vmatprep.subr.bf16.mxu1 %v5466_v0  ;;  %v5271_v1 = vld [vmem:[%s6467_s2 + $0x8] sm:$0xff]   ;;  %vm492_vm4 = vcmask 1043456   ;;  %vm2158_vm5 = vcmask 523264  }
  0x19   :  { %v49_v12 = vadd.f32 %v48_v2, %v47_v10  ;;  %v53_v13 = vld [vmem:[%s52_s21] sm:$0x1]  ;;  %38 = vst.msk [vmem:[#allocation2] sm:$0x1] %vm37_vm0, %v36_v8  ;;  %s76_s27 = scalar_lea.vmem %s6466_s1, %s5512_s6  ;;  %s82_s5 = scalar_lea.vmem %s6466_s1, %s5514_s7  ;;  %v5272_v2 = vld [vmem:[%s6467_s2 + $0x48] sm:$0xff]   ;;  %4789 = vmatprep.mubr.msk.bf16.mxu0 %vm5467_vm2, %v5466_v0  ;;  %4797 = vmatprep.mubr.msk.bf16.mxu1 %vm5467_vm2, %v5466_v0  ;;  %vm4320_vm6 = vcmask 1040384  }
  0x1a   :  { %v55_v16 = vadd.f32 %v54_v3, %v53_v13  ;;  %v59_v17 = vld [vmem:[%s58_s11] sm:$0x1]  ;;  %44 = vst.msk [vmem:[#allocation2 + $0x1] sm:$0x1] %vm37_vm0, %v43_v11  ;;  %s88_s11 = scalar_lea.vmem %s6466_s1, %s5525_s15  ;;  %s4437_s7 = sld [smem:[#allocation3 + $0xc]]  ;;  %vm4393_vm7 = vcmask 25600  }
  0x1b   :  { %v65_v18 = vld [vmem:[%s64_s14] sm:$0x1]  ;;  %50 = vst.msk [vmem:[#allocation2 + $0x2] sm:$0x1] %vm37_vm0, %v49_v12  ;;  %v61_v19 = vadd.f32 %v60_v4, %v59_v17  ;;  %s4438_s14 = sld [smem:[#allocation3 + $0xd]]  ;;  %s94_s23 = scalar_lea.vmem %s6466_s1, %s5542_s9 }
  0x1c   :  { %v67_v20 = vadd.f32 %v66_v6, %v65_v18  ;;  %v71_v21 = vld [vmem:[%s70_s24] sm:$0x1]  ;;  %56 = vst.msk [vmem:[#allocation2 + $0x3] sm:$0x1] %vm37_vm0, %v55_v16  ;;  %s4440_s18 = sld [smem:[#allocation3 + $0xf]]  ;;  %s118_s13 = scalar_lea.vmem %s6466_s1, %s4439_s16 }
  0x1d   :  { %v73_v24 = vadd.f32 %v72_v7, %v71_v21  ;;  %v77_v25 = vld [vmem:[%s76_s27] sm:$0x1]  ;;  %62 = vst.msk [vmem:[#allocation2 + $0x4] sm:$0x1] %vm37_vm0, %v61_v19  ;;  %v5274_v21 = vld [vmem:[%s6467_s2 + $0x88] sm:$0xff]   ;;  %s5468_s17 = smov [#allocation6]  }
  0x1e   :  { %v83_v26 = vld [vmem:[%s82_s5] sm:$0x1]  ;;  %68 = vst.msk [vmem:[#allocation2 + $0x5] sm:$0x1] %vm37_vm0, %v67_v20  ;;  %v79_v27 = vadd.f32 %v78_v14, %v77_v25  ;;  %s100_s25 = scalar_lea.vmem %s6466_s1, %s5563_s20  ;;  %s4401_s15 = sshll.u32 %s5468_s17, 4  ;;  %s4402_s15 = int_to_ptr.vmem [resolvable:$true] %s4401_s15 }
  0x1f   :  { %v85_v28 = vadd.f32 %v84_v15, %v83_v26  ;;  %v89_v29 = vld [vmem:[%s88_s11] sm:$0x1]  ;;  %74 = vst.msk [vmem:[#allocation2 + $0x6] sm:$0x1] %vm37_vm0, %v73_v24  ;;  %v4442_v15 = vld [vmem:[%s6468_s3 + $0x1] ss:$0 sm:$0xff]  ;;  %p5444_p6 = scmp.lt.s32.totalorder %s4402_s15, %s4402_s15 }
  0x20   :  { %v91_v31 = vadd.f32 %v90_v22, %v89_v29  ;;  %80 = vst.msk [vmem:[#allocation2 + $0x7] sm:$0x1] %vm37_vm0, %v79_v27  ;;  %v95_v32 = vld [vmem:[%s94_s23] sm:$0x1]  ;;  %s106_s20 = scalar_lea.vmem %s6466_s1, %s4437_s7  ;;  %v4447_v22 = vld [vmem:[%s6468_s3 + $0x6] ss:$0 sm:$0xff] }
  0x21   :  { %86 = vst.msk [vmem:[#allocation2 + $0x8] sm:$0x1] %vm37_vm0, %v85_v28  ;;  %v97_v34 = vadd.f32 %v96_v23, %v95_v32  ;;  %v101_v37 = vld [vmem:[%s100_s25] sm:$0x1]  ;;  %s112_s10 = scalar_lea.vmem %s6466_s1, %s4438_s14 }
  0x22   :  { %92 = vst.msk [vmem:[#allocation2 + $0x9] sm:$0x1] %vm37_vm0, %v91_v31  ;;  %v103_v39 = vadd.f32 %v102_v30, %v101_v37  ;;  %v107_v40 = vld [vmem:[%s106_s20] sm:$0x1]  ;;  %s124_s23 = scalar_lea.vmem %s6466_s1, %s4440_s18  ;;  %v4451_v37 = vld [vmem:[%s6468_s3 + $0xa] ss:$0 sm:$0xff] }
  0x23   :  { %98 = vst.msk [vmem:[#allocation2 + $0xa] sm:$0x1] %vm37_vm0, %v97_v34  ;;  %v109_v41 = vadd.f32 %v108_v33, %v107_v40  ;;  %v113_v42 = vld [vmem:[%s112_s10] sm:$0x1]  ;;  %v4443_v34 = vld [vmem:[%s6468_s3 + $0x2] ss:$0 sm:$0xff] }
  0x24   :  { %104 = vst.msk [vmem:[#allocation2 + $0xb] sm:$0x1] %vm37_vm0, %v103_v39  ;;  %v119_v43 = vld [vmem:[%s118_s13] sm:$0x1]  ;;  %v115_v44 = vadd.f32 %v114_v35, %v113_v42 }
  0x25   :  { %v121_v45 = vadd.f32 %v120_v36, %v119_v43  ;;  %v125_v46 = vld [vmem:[%s124_s23] sm:$0x1]  ;;  %110 = vst.msk [vmem:[#allocation2 + $0xc] sm:$0x1] %vm37_vm0, %v109_v41  ;;  %s5439_s23 = scalar_lea.vmem %s4402_s15, 32 }
  0x26   :  { %v127_v48 = vadd.f32 %v126_v38, %v125_v46  ;;  %116 = vst.msk [vmem:[#allocation2 + $0xd] sm:$0x1] %vm37_vm0, %v115_v44  ;;  %v5269_v62 = vld [vmem:[%s6467_s2] sm:$0xff]   ;;  %p5440_p5 = scmp.ne.s32.totalorder %s4402_s15, %s5439_s23  ;;  %p5445_p7 = scmp.lt.s32.totalorder %s5439_s23, %s5439_s23 }
  0x27   :  { %v129_v47 = vld [vmem:[#allocation2] sm:$0xff]  ;;  %122 = vst.msk [vmem:[#allocation2 + $0xe] sm:$0x1] %vm37_vm0, %v121_v45  ;;  %4786 = vmatpush3.bf16.msra.mxu0 %v5269_v62 }
  0x28   :  { %v134_v49 = vsel %vm133_vm1, %v129_v47, 0.0  ;;  %128 = vst.msk [vmem:[#allocation2 + $0xf] sm:$0x1] %vm37_vm0, %v127_v48  ;;  %v5270_v63 = vld [vmem:[%s6467_s2 + $0x40] sm:$0xff]   ;;  %4787 = vmatprep.subr.bf16.mxu0 %v5466_v0  ;;  %p5446_p8 = por %p5445_p7, %p5444_p6 }
  0x29   :  { %135 = vadd.xlane.f32.xlu0 %v134_v49  ;;  %4794 = vmatpush3.bf16.msra.mxu1 %v5270_v63  ;;  %v4441_v11 = vld [vmem:[%s6468_s3] ss:$0 sm:$0xff] }
  0x2a   :  { %4795 = vmatprep.subr.bf16.mxu1 %v5466_v0  ;;  %v5273_v19 = vld [vmem:[%s6467_s2 + $0x80] sm:$0xff]   ;;  %p5447_p9 = pnand %p5446_p8, %p5440_p5 }
  0x2b   :  { %4788 = vmatpush3.bf16.msra.mxu0 %v5271_v1 }
  0x2c   :  { %4801 = vmatprep.subr.bf16.mxu0 %v5466_v0 }
  0x2d   :  { %4796 = vmatpush3.bf16.msra.mxu1 %v5272_v2 }
  0x2e   :  { %4809 = vmatprep.subr.bf16.mxu1 %v5466_v0 }
  0x2f   :  { %v130_v50 = vld [vmem:[#allocation2 + $0x8] sm:$0xff] }
  0x30   :  { %v137_v51 = vsel %vm133_vm1, %v130_v50, 0.0 }
  0x31   :  { %138 = vadd.xlane.f32.xlu0 %v137_v51 }
  0xb6   :  { %v136_v52 = vpop.xlane.xlu0 %135 }
  0xb7   :  { %v141_v53 = vmul.f32 0.03125, %v136_v52 }
  0xb9   :  { %v143_v54 = vsub.f32 %v129_v47, %v141_v53 }
  0xbb   :  { %v145_v55 = vmul.f32 %v143_v54, %v143_v54 }
  0xbd   :  { %v147_v56 = vsel %vm133_vm1, %v145_v55, 0.0 }
  0xbe   :  { %148 = vadd.xlane.f32.xlu1 %v147_v56  ;;  %v139_v57 = vpop.xlane.xlu0 %138 }
  0xbf   :  { %v142_v58 = vmul.f32 0.03125, %v139_v57 }
  0xc1   :  { %v144_v59 = vsub.f32 %v130_v50, %v142_v58 }
  0xc3   :  { %v146_v60 = vmul.f32 %v144_v59, %v144_v59 }
  0xc5   :  { %v150_v61 = vsel %vm133_vm1, %v146_v60, 0.0 }
  0xc6   :  { %151 = vadd.xlane.f32.xlu1 %v150_v61 }
 0x14b   :  { %v149_v3 = vpop.xlane.xlu1 %148 }
 0x14c   :  { %v153_v4 = vmul.f32 0.03125, %v149_v3 }
 0x14e   :  { %v155_v5 = vadd.f32 1e-05, %v153_v4 }
 0x150   :  { %5331 = vrsqrt.f32 %v155_v5 }
 0x153   :  { %v152_v6 = vpop.xlane.xlu1 %151 }
 0x154   :  { %v154_v7 = vmul.f32 0.03125, %v152_v6 }
 0x156   :  { %v156_v8 = vadd.f32 1e-05, %v154_v7 }
 0x158   :  { %5333 = vrsqrt.f32 %v156_v8 }
 0x15a   :  { %v5332_v9 = vpop.eup %5331 }
 0x15b   :  { %v159_v10 = vmul.f32 %v5332_v9, %v143_v54 }
 0x15d   :  { %v165_v13 = vmul.f32 %v4441_v11, %v159_v10 }
 0x15f   :  { %v5665_v17 = vadd.f32 %v4442_v15, %v165_v13 }
 0x162   :  { %v5334_v12 = vpop.eup %5333 }
 0x163   :  { %v160_v14 = vmul.f32 %v5334_v12, %v144_v59 }
 0x165   :  { %v166_v16 = vmul.f32 %v4441_v11, %v160_v14 }
 0x167   :  { %v5667_v18 = vadd.f32 %v4442_v15, %v166_v16 }
 0x169   :  { %v5674_v20 = vpack.c.bf16 %v5667_v18, %v5665_v17 }
 0x16b   :  { %4790 = vmatmul.mubr.msk.bf16.vlgmr.msra.gmra.mrb[0].mxu0 %vm133_vm1, %v5674_v20  ;;  %4798 = vmatmul.mubr.msk.bf16.vlgmr.msra.gmra.mrb[0].mxu1 %vm133_vm1, %v5674_v20 }
 0x16c   :  { %4802 = vmatpush3.bf16.msra.mxu0 %v5273_v19  ;;  %4805 = vmatprep.mubr.msk.bf16.mxu0 %vm5467_vm2, %v5466_v0  ;;  %v5275_v19 = vld [vmem:[%s6467_s2 + $0x10] sm:$0xff]  }
 0x16d   :  { %4803 = vmatprep.subr.bf16.mxu0 %v5466_v0  ;;  %4811 = vmatprep.mubr.msk.bf16.mxu1 %vm5467_vm2, %v5466_v0 }
 0x170   :  { %4804 = vmatpush3.bf16.msra.mxu0 %v5274_v21 }
 0x171   :  { %4815 = vmatprep.subr.bf16.mxu0 %v5466_v0 }
 0x173   :  { %4806 = vmatmul.mubr.msk.bf16.vlgmr.msra.gmra.mrb[4].mxu0 %vm133_vm1, %v5674_v20 }
 0x174   :  { %4817 = vmatprep.mubr.msk.bf16.mxu0 %vm5467_vm2, %v5466_v0 }
 0x23e   :  { %v241_v23 = vpop.f32.mrb[0].mxu0  ;;  %v299_v24 = vpop.f32.mrb[0].mxu1 }
 0x23f   :  { %v300_v25 = vadd.f32 %v4447_v22, %v299_v24  ;;  %v4791_v26 = vpop.f32.mrb[1].mxu0  ;;  %v4799_v27 = vpop.f32.mrb[1].mxu1  ;;  %v242_v38 = vadd.f32 %v4443_v34, %v241_v23  ;;  %v5276_v23 = vld [vmem:[%s6467_s2 + $0x50] sm:$0xff]  }
 0x240   :  { %v244_v28 = vpop.f32.mrb[2].mxu0  ;;  %v302_v29 = vpop.f32.mrb[2].mxu1  ;;  %v5278_v26 = vld [vmem:[%s6467_s2 + $0x58] sm:$0xff]   ;;  %v5279_v27 = vld [vmem:[%s6467_s2 + $0x90] sm:$0xff]  }
 0x241   :  { %v366_v30 = vpack.c.bf16 %v300_v25, %v300_v25  ;;  %v303_v31 = vadd.f32 %v4447_v22, %v302_v29  ;;  %v4792_v32 = vpop.f32.mrb[3].mxu0  ;;  %v4800_v33 = vpop.f32.mrb[3].mxu1  ;;  %v245_v41 = vadd.f32 %v4443_v34, %v244_v28  ;;  %v364_v45 = vpack.c.bf16 %v242_v38, %v242_v38  ;;  %v5277_v25 = vld [vmem:[%s6467_s2 + $0x18] sm:$0xff]  }
 0x242   :  { %v5280_v28 = vld [vmem:[%s6467_s2 + $0x98] sm:$0xff]  }
 0x243   :  { %v375_v35 = vsel %vm370_vm3, %v366_v30, 0  ;;  %v367_v36 = vpack.c.bf16 %v303_v31, %v303_v31  ;;  %v365_v49 = vpack.c.bf16 %v245_v41, %v245_v41 }
 0x244   :  { %4810 = vmatpush3.bf16.xpose.msra.mxu1 %v375_v35 }
 0x245   :  { %v421_v39 = vsel %vm370_vm3, %v367_v36, 0  ;;  %4821 = vmatprep.subr.bf16.mxu1 %v5466_v0 }
 0x246   :  { %v357_v40 = vpop.f32.mrb[4].mxu0  ;;  %4816 = vmatpush3.bf16.xpose.msra.mxu0 %v421_v39  ;;  %v4463_v39 = vld [vmem:[%s6468_s3 + $0x7] ss:$0 sm:$0xff] }
 0x247   :  { %v358_v42 = vadd.f32 %v4451_v37, %v357_v40  ;;  %v4807_v43 = vpop.f32.mrb[5].mxu0  ;;  %4827 = vmatprep.subr.bf16.mxu0 %v5466_v0 }
 0x248   :  { %v360_v44 = vpop.f32.mrb[6].mxu0 }
 0x249   :  { %v368_v46 = vpack.c.bf16 %v358_v42, %v358_v42  ;;  %v361_v47 = vadd.f32 %v4451_v37, %v360_v44  ;;  %v4808_v48 = vpop.f32.mrb[7].mxu0 }
 0x24b   :  { %v494_v50 = vsel %vm492_vm4, %v368_v46, 0  ;;  %v369_v51 = vpack.c.bf16 %v361_v47, %v361_v47  ;;  %4812 = vmatmul.mubr.msk.bf16.vlgmr.msra.gmra.mrb[4].mxu1 %vm370_vm3, %v364_v45 }
 0x24c   :  { %4822 = vmatpush3.bf16.msra.mxu1 %v494_v50  ;;  %4823 = vmatprep.mubr.msk.bf16.mxu1 %vm5467_vm2, %v5466_v0  ;;  %v4459_v50 = vld [vmem:[%s6468_s3 + $0x3] ss:$0 sm:$0xff] }
 0x24d   :  { %v540_v52 = vsel %vm492_vm4, %v369_v51, 0  ;;  %4818 = vmatmul.mubr.msk.bf16.vlgmr.msra.gmra.mrb[8].mxu0 %vm370_vm3, %v365_v49  ;;  %4833 = vmatprep.subr.bf16.mxu1 %v5466_v0  ;;  %v4467_v51 = vld [vmem:[%s6468_s3 + $0xb] ss:$0 sm:$0xff] }
 0x24e   :  { %4828 = vmatpush3.bf16.msra.mxu0 %v540_v52  ;;  %4829 = vmatprep.mubr.msk.bf16.mxu0 %vm5467_vm2, %v5466_v0 }
 0x24f   :  { %4841 = vmatprep.subr.bf16.mxu0 %v5466_v0 }
 0x31e   :  { %v411_v53 = vpop.f32.mrb[4].mxu1 }
 0x31f   :  { %v463_v54 = vmul.f32 0.35355338, %v411_v53  ;;  %v4813_v55 = vpop.f32.mrb[5].mxu1 }
 0x320   :  { %v414_v56 = vpop.f32.mrb[6].mxu1  ;;  %v457_v57 = vpop.f32.mrb[8].mxu0 }
 0x321   :  { %v464_v58 = vmul.f32 0.35355338, %v457_v57  ;;  %v4814_v59 = vpop.f32.mrb[7].mxu1  ;;  %v4819_v60 = vpop.f32.mrb[9].mxu0  ;;  %v465_v61 = vsel %vm370_vm3, %v463_v54, -inf }
 0x322   :  { %466 = vmax.xlane.f32.xlu1 %v465_v61  ;;  %v460_v62 = vpop.f32.mrb[10].mxu0 }
 0x323   :  { %v4820_v63 = vpop.f32.mrb[11].mxu0  ;;  %v468_v1 = vsel %vm370_vm3, %v464_v58, -inf }
 0x324   :  { %469 = vmax.xlane.f32.xlu0 %v468_v1 }
 0x3af   :  { %v467_v2 = vpop.xlane.xlu1 %466 }
 0x3b0   :  { %v471_v3 = vsub.f32 %v463_v54, %v467_v2 }
 0x3b1   :  { %v470_v4 = vpop.xlane.xlu0 %469 }
 0x3b2   :  { %v473_v5 = vmul.f32 1.442695, %v471_v3  ;;  %v472_v6 = vsub.f32 %v464_v58, %v470_v4 }
 0x3b4   :  { %5335 = vpow2.f32 %v473_v5  ;;  %v475_v7 = vmul.f32 1.442695, %v472_v6 }
 0x3b6   :  { %5337 = vpow2.f32 %v475_v7 }
 0x3be   :  { %v5336_v8 = vpop.eup %5335 }
 0x3bf   :  { %v477_v9 = vsel %vm370_vm3, %v5336_v8, 0.0 }
 0x3c0   :  { %v5338_v10 = vpop.eup %5337  ;;  %478 = vadd.xlane.f32.xlu1 %v477_v9 }
 0x3c1   :  { %v480_v11 = vsel %vm370_vm3, %v5338_v10, 0.0 }
 0x3c2   :  { %481 = vadd.xlane.f32.xlu0 %v480_v11 }
 0x44d   :  { %v479_v12 = vpop.xlane.xlu1 %478 }
 0x44e   :  { %5339 = vrcp.f32 %v479_v12 }
 0x44f   :  { %v482_v13 = vpop.xlane.xlu0 %481 }
 0x450   :  { %5341 = vrcp.f32 %v482_v13 }
 0x458   :  { %v5340_v14 = vpop.eup %5339 }
 0x459   :  { %v485_v15 = vmul.f32 %v5340_v14, %v5336_v8 }
 0x45a   :  { %v5342_v16 = vpop.eup %5341 }
 0x45b   :  { %v486_v21 = vmul.f32 %v5342_v16, %v5338_v10  ;;  %v487_v22 = vpack.c.bf16 %v485_v15, %v485_v15 }
 0x45d   :  { %4824 = vmatmul.mubr.msk.bf16.vlgmr.msra.gmra.mrb[8].mxu1 %vm370_vm3, %v487_v22  ;;  %v488_v24 = vpack.c.bf16 %v486_v21, %v486_v21 }
 0x45e   :  { %4834 = vmatpush3.bf16.msra.mxu1 %v5275_v19  ;;  %4837 = vmatprep.mubr.msk.bf16.mxu1 %vm5467_vm2, %v5466_v0 }
 0x45f   :  { %4830 = vmatmul.mubr.msk.bf16.vlgmr.msra.gmra.mrb[12].mxu0 %vm370_vm3, %v488_v24  ;;  %4835 = vmatprep.subr.bf16.mxu1 %v5466_v0 }
 0x460   :  { %4842 = vmatpush3.bf16.msra.mxu0 %v5276_v23  ;;  %4845 = vmatprep.mubr.msk.bf16.mxu0 %vm5467_vm2, %v5466_v0 }
 0x461   :  { %4843 = vmatprep.subr.bf16.mxu0 %v5466_v0 }
 0x462   :  { %4836 = vmatpush3.bf16.msra.mxu1 %v5277_v25 }
 0x463   :  { %4849 = vmatprep.subr.bf16.mxu1 %v5466_v0 }
 0x464   :  { %4844 = vmatpush3.bf16.msra.mxu0 %v5278_v26 }
 0x465   :  { %4838 = vmatmul.mubr.msk.bf16.vlgmr.msra.gmra.mrb[12].mxu1 %vm133_vm1, %v5674_v20  ;;  %4857 = vmatprep.subr.bf16.mxu0 %v5466_v0 }
 0x466   :  { %4850 = vmatpush3.bf16.msra.mxu1 %v5279_v27  ;;  %4853 = vmatprep.mubr.msk.bf16.mxu1 %vm5467_vm2, %v5466_v0 }
 0x467   :  { %4846 = vmatmul.mubr.msk.bf16.vlgmr.msra.gmra.mrb[16].mxu0 %vm133_vm1, %v5674_v20  ;;  %4851 = vmatprep.subr.bf16.mxu1 %v5466_v0 }
 0x468   :  { %4859 = vmatprep.mubr.msk.bf16.mxu0 %vm5467_vm2, %v5466_v0 }
 0x46a   :  { %4852 = vmatpush3.bf16.msra.mxu1 %v5280_v28 }
 0x46b   :  { %4863 = vmatprep.subr.bf16.mxu1 %v5466_v0 }
 0x46d   :  { %4854 = vmatmul.mubr.msk.bf16.vlgmr.msra.gmra.mrb[16].mxu1 %vm133_vm1, %v5674_v20 }
 0x46e   :  { %4865 = vmatprep.mubr.msk.bf16.mxu1 %vm5467_vm2, %v5466_v0 }
 0x530   :  { %v5762_v29 = vpop.f32.mrb[8].mxu1 }
 0x531   :  { %v4825_v30 = vpop.f32.mrb[9].mxu1 }
 0x532   :  { %v533_v31 = vpop.f32.mrb[10].mxu1  ;;  %v5764_v32 = vpop.f32.mrb[12].mxu0 }
 0x533   :  { %v582_v33 = vpack.c.bf16 %v5764_v32, %v5762_v29  ;;  %v4826_v34 = vpop.f32.mrb[11].mxu1  ;;  %v4831_v35 = vpop.f32.mrb[13].mxu0 }
 0x534   :  { %v579_v36 = vpop.f32.mrb[14].mxu0 }
 0x535   :  { %v4832_v37 = vpop.f32.mrb[15].mxu0 }
 0x536   :  { %v595_v37 = vld [vmem:[%s6467_s2 + $0xc8] sm:$0xf] }
 0x538   :  { %v647_v38 = vpop.f32.mrb[12].mxu1 }
 0x539   :  { %v4839_v40 = vpop.f32.mrb[13].mxu1  ;;  %v648_v55 = vadd.f32 %v4459_v50, %v647_v38 }
 0x53a   :  { %v650_v41 = vpop.f32.mrb[14].mxu1  ;;  %v705_v42 = vpop.f32.mrb[16].mxu0 }
 0x53b   :  { %v706_v43 = vadd.f32 %v4463_v39, %v705_v42  ;;  %v4840_v44 = vpop.f32.mrb[15].mxu1  ;;  %v4847_v45 = vpop.f32.mrb[17].mxu0  ;;  %v651_v60 = vadd.f32 %v4459_v50, %v650_v41  ;;  %v770_v1 = vpack.c.bf16 %v648_v55, %v648_v55  ;;  %v991_v42 = vsel %vm492_vm4, %v595_v37, 0 }
 0x53c   :  { %v708_v46 = vpop.f32.mrb[18].mxu0  ;;  %v5282_v45 = vld [vmem:[%s6467_s2 + $0x28] sm:$0xff]  }
 0x53d   :  { %v772_v47 = vpack.c.bf16 %v706_v43, %v706_v43  ;;  %v709_v48 = vadd.f32 %v4463_v39, %v708_v46  ;;  %v4848_v49 = vpop.f32.mrb[19].mxu0  ;;  %v771_v3 = vpack.c.bf16 %v651_v60, %v651_v60  ;;  %v5281_v43 = vld [vmem:[%s6467_s2 + $0x20] sm:$0xff]  }
 0x53e   :  { %v5283_v46 = vld [vmem:[%s6467_s2 + $0xa0] sm:$0xff]  }
 0x53f   :  { %v780_v52 = vsel %vm370_vm3, %v772_v47, 0  ;;  %v773_v53 = vpack.c.bf16 %v709_v48, %v709_v48  ;;  %v5284_v47 = vld [vmem:[%s6467_s2 + $0xa8] sm:$0xff]  }
 0x540   :  { %v763_v54 = vpop.f32.mrb[16].mxu1  ;;  %4858 = vmatpush3.bf16.xpose.msra.mxu0 %v780_v52  ;;  %v5285_v52 = vld [vmem:[%s6467_s2 + $0x60] sm:$0xff]  }
 0x541   :  { %v826_v56 = vsel %vm370_vm3, %v773_v53, 0  ;;  %v764_v57 = vadd.f32 %v4467_v51, %v763_v54  ;;  %v4855_v58 = vpop.f32.mrb[17].mxu1  ;;  %4869 = vmatprep.subr.bf16.mxu0 %v5466_v0 }
 0x542   :  { %v766_v59 = vpop.f32.mrb[18].mxu1  ;;  %4864 = vmatpush3.bf16.xpose.msra.mxu1 %v826_v56  ;;  %v5286_v58 = vld [vmem:[%s6467_s2 + $0x68] sm:$0xff]  }
 0x543   :  { %v774_v61 = vpack.c.bf16 %v764_v57, %v764_v57  ;;  %v767_v62 = vadd.f32 %v4467_v51, %v766_v59  ;;  %v4856_v63 = vpop.f32.mrb[19].mxu1  ;;  %4875 = vmatprep.subr.bf16.mxu1 %v5466_v0 }
 0x545   :  { %v775_v2 = vpack.c.bf16 %v767_v62, %v767_v62  ;;  %v898_v4 = vsel %vm492_vm4, %v774_v61, 0 }
 0x547   :  { %4860 = vmatmul.mubr.msk.bf16.vlgmr.msra.gmra.mrb[20].mxu0 %vm370_vm3, %v770_v1  ;;  %v944_v5 = vsel %vm492_vm4, %v775_v2, 0 }
 0x548   :  { %4870 = vmatpush3.bf16.msra.mxu0 %v898_v4  ;;  %4871 = vmatprep.mubr.msk.bf16.mxu0 %vm5467_vm2, %v5466_v0 }
 0x549   :  { %4866 = vmatmul.mubr.msk.bf16.vlgmr.msra.gmra.mrb[20].mxu1 %vm370_vm3, %v771_v3  ;;  %4881 = vmatprep.subr.bf16.mxu0 %v5466_v0 }
 0x54a   :  { %4876 = vmatpush3.bf16.msra.mxu1 %v944_v5  ;;  %4877 = vmatprep.mubr.msk.bf16.mxu1 %vm5467_vm2, %v5466_v0 }
 0x54b   :  { %4887 = vmatprep.subr.bf16.mxu1 %v5466_v0 }
 0x61a   :  { %v816_v6 = vpop.f32.mrb[20].mxu0 }
 0x61b   :  { %v868_v7 = vmul.f32 0.35355338, %v816_v6  ;;  %v4861_v8 = vpop.f32.mrb[21].mxu0 }
 0x61c   :  { %v819_v9 = vpop.f32.mrb[22].mxu0  ;;  %v862_v10 = vpop.f32.mrb[20].mxu1  ;;  %v4480_v8 = vld [vmem:[%s6468_s3 + $0x8] ss:$0 sm:$0xff] }
 0x61d   :  { %v869_v11 = vmul.f32 0.35355338, %v862_v10  ;;  %v4862_v12 = vpop.f32.mrb[23].mxu0  ;;  %v4867_v13 = vpop.f32.mrb[21].mxu1  ;;  %v870_v14 = vsel %vm370_vm3, %v868_v7, -inf }
 0x61e   :  { %v865_v15 = vpop.f32.mrb[22].mxu1  ;;  %871 = vmax.xlane.f32.xlu0 %v870_v14  ;;  %v4484_v12 = vld [vmem:[%s6468_s3 + $0xc] ss:$0 sm:$0xff] }
 0x61f   :  { %v4868_v16 = vpop.f32.mrb[23].mxu1  ;;  %v873_v19 = vsel %vm370_vm3, %v869_v11, -inf }
 0x620   :  { %874 = vmax.xlane.f32.xlu1 %v873_v19  ;;  %v4476_v19 = vld [vmem:[%s6468_s3 + $0x4] ss:$0 sm:$0xff] }
 0x6ab   :  { %v872_v21 = vpop.xlane.xlu0 %871 }
 0x6ac   :  { %v876_v22 = vsub.f32 %v868_v7, %v872_v21 }
 0x6ad   :  { %v875_v23 = vpop.xlane.xlu1 %874 }
 0x6ae   :  { %v878_v24 = vmul.f32 1.442695, %v876_v22  ;;  %v877_v25 = vsub.f32 %v869_v11, %v875_v23 }
 0x6b0   :  { %5343 = vpow2.f32 %v878_v24  ;;  %v880_v26 = vmul.f32 1.442695, %v877_v25 }
 0x6b2   :  { %5345 = vpow2.f32 %v880_v26 }
 0x6ba   :  { %v5344_v27 = vpop.eup %5343 }
 0x6bb   :  { %v882_v28 = vsel %vm370_vm3, %v5344_v27, 0.0 }
 0x6bc   :  { %v5346_v30 = vpop.eup %5345  ;;  %883 = vadd.xlane.f32.xlu0 %v882_v28 }
 0x6bd   :  { %v885_v31 = vsel %vm370_vm3, %v5346_v30, 0.0 }
 0x6be   :  { %886 = vadd.xlane.f32.xlu1 %v885_v31 }
 0x749   :  { %v884_v34 = vpop.xlane.xlu0 %883 }
 0x74a   :  { %5347 = vrcp.f32 %v884_v34 }
 0x74b   :  { %v887_v35 = vpop.xlane.xlu1 %886 }
 0x74c   :  { %5349 = vrcp.f32 %v887_v35 }
 0x754   :  { %v5348_v36 = vpop.eup %5347 }
 0x755   :  { %v890_v38 = vmul.f32 %v5348_v36, %v5344_v27 }
 0x756   :  { %v5350_v39 = vpop.eup %5349 }
 0x757   :  { %v891_v40 = vmul.f32 %v5350_v39, %v5346_v30  ;;  %v892_v41 = vpack.c.bf16 %v890_v38, %v890_v38 }
 0x759   :  { %4872 = vmatmul.mubr.msk.bf16.vlgmr.msra.gmra.mrb[24].mxu0 %vm370_vm3, %v892_v41  ;;  %v893_v44 = vpack.c.bf16 %v891_v40, %v891_v40 }
 0x75a   :  { %4882 = vmatpush3.bf16.msra.mxu0 %v991_v42  ;;  %4883 = vmatprep.mubr.msk.bf16.mxu0 %vm5467_vm2, %v5466_v0 }
 0x75b   :  { %4878 = vmatmul.mubr.msk.bf16.vlgmr.msra.gmra.mrb[24].mxu1 %vm370_vm3, %v893_v44  ;;  %4895 = vmatprep.subr.bf16.mxu0 %v5466_v0 }
 0x75c   :  { %4888 = vmatpush3.bf16.msra.mxu1 %v5281_v43  ;;  %4891 = vmatprep.mubr.msk.bf16.mxu1 %vm5467_vm2, %v5466_v0 }
 0x75d   :  { %4889 = vmatprep.subr.bf16.mxu1 %v5466_v0 }
 0x760   :  { %4890 = vmatpush3.bf16.msra.mxu1 %v5282_v45 }
 0x761   :  { %4903 = vmatprep.subr.bf16.mxu1 %v5466_v0 }
 0x763   :  { %4892 = vmatmul.mubr.msk.bf16.vlgmr.msra.gmra.mrb[28].mxu1 %vm133_vm1, %v5674_v20 }
 0x764   :  { %4904 = vmatpush3.bf16.msra.mxu1 %v5283_v46  ;;  %4907 = vmatprep.mubr.msk.bf16.mxu1 %vm5467_vm2, %v5466_v0 }
 0x765   :  { %4905 = vmatprep.subr.bf16.mxu1 %v5466_v0 }
 0x768   :  { %4906 = vmatpush3.bf16.msra.mxu1 %v5284_v47 }
 0x769   :  { %4917 = vmatprep.subr.bf16.mxu1 %v5466_v0 }
 0x76b   :  { %4908 = vmatmul.mubr.msk.bf16.vlgmr.msra.gmra.mrb[32].mxu1 %vm133_vm1, %v5674_v20 }
 0x76c   :  { %4919 = vmatprep.mubr.msk.bf16.mxu1 %vm5467_vm2, %v5466_v0 }
 0x82c   :  { %v934_v48 = vpop.f32.mrb[24].mxu0 }
 0x82d   :  { %v4873_v49 = vpop.f32.mrb[25].mxu0 }
 0x82e   :  { %v937_v50 = vpop.f32.mrb[26].mxu0  ;;  %v980_v51 = vpop.f32.mrb[24].mxu1 }
 0x82f   :  { %v986_v53 = vpack.c.bf16 %v980_v51, %v934_v48  ;;  %v4874_v54 = vpop.f32.mrb[27].mxu0  ;;  %v4879_v55 = vpop.f32.mrb[25].mxu1 }
 0x830   :  { %v983_v56 = vpop.f32.mrb[26].mxu1 }
 0x831   :  { %v4880_v57 = vpop.f32.mrb[27].mxu1  ;;  %4884 = vmatmul.mubr.msk.bf16.vlgmr.msra.gmra.mrb[28].mxu0 %vm370_vm3, %v986_v53 }
 0x832   :  { %4896 = vmatpush3.bf16.msra.mxu0 %v5285_v52  ;;  %4899 = vmatprep.mubr.msk.bf16.mxu0 %vm5467_vm2, %v5466_v0 }
 0x833   :  { %4897 = vmatprep.subr.bf16.mxu0 %v5466_v0 }
 0x836   :  { %v1098_v59 = vpop.f32.mrb[28].mxu1  ;;  %4898 = vmatpush3.bf16.msra.mxu0 %v5286_v58 }
 0x837   :  { %v4893_v60 = vpop.f32.mrb[29].mxu1  ;;  %4911 = vmatprep.subr.bf16.mxu0 %v5466_v0  ;;  %v1099_v24 = vadd.f32 %v4476_v19, %v1098_v59 }
 0x838   :  { %v1101_v61 = vpop.f32.mrb[30].mxu1 }
 0x839   :  { %v4894_v62 = vpop.f32.mrb[31].mxu1  ;;  %4900 = vmatmul.mubr.msk.bf16.vlgmr.msra.gmra.mrb[32].mxu0 %vm133_vm1, %v5674_v20  ;;  %v1102_v27 = vadd.f32 %v4476_v19, %v1101_v61  ;;  %v1221_v30 = vpack.c.bf16 %v1099_v24, %v1099_v24 }
 0x83a   :  { %4913 = vmatprep.mubr.msk.bf16.mxu0 %vm5467_vm2, %v5466_v0  ;;  %v1046_v62 = vld [vmem:[%s6467_s2 + $0xd0] sm:$0xf] }
 0x83b   :  { %v1222_v34 = vpack.c.bf16 %v1102_v27, %v1102_v27 }
 0x83e   :  { %v1214_v63 = vpop.f32.mrb[32].mxu1 }
 0x83f   :  { %v4909_v1 = vpop.f32.mrb[33].mxu1  ;;  %v1215_v21 = vadd.f32 %v4484_v12, %v1214_v63 }
 0x840   :  { %v1217_v2 = vpop.f32.mrb[34].mxu1 }
 0x841   :  { %v4910_v3 = vpop.f32.mrb[35].mxu1  ;;  %v1218_v25 = vadd.f32 %v4484_v12, %v1217_v2  ;;  %v1225_v28 = vpack.c.bf16 %v1215_v21, %v1215_v21 }
 0x843   :  { %v1226_v31 = vpack.c.bf16 %v1218_v25, %v1218_v25  ;;  %v1349_v35 = vsel %vm492_vm4, %v1225_v28, 0  ;;  %v5292_v25 = vld [vmem:[%s6467_s2 + $0x78] sm:$0xff]  }
 0x845   :  { %v1395_v36 = vsel %vm492_vm4, %v1226_v31, 0 }
 0x904   :  { %v5845_v4 = vpop.f32.mrb[28].mxu0 }
 0x905   :  { %v4885_v5 = vpop.f32.mrb[29].mxu0 }
 0x906   :  { %v5847_v6 = vpop.f32.mrb[30].mxu0  ;;  %v1442_v5 = vsel %vm492_vm4, %v1046_v62, 0 }
 0x907   :  { %v4886_v7 = vpop.f32.mrb[31].mxu0 }
 0x908   :  { %v5287_v7 = vld [vmem:[%s6467_s2 + $0x30] sm:$0xff]  }
 0x90c   :  { %v1156_v9 = vpop.f32.mrb[32].mxu0 }
 0x90d   :  { %v1157_v10 = vadd.f32 %v4480_v8, %v1156_v9  ;;  %v4901_v11 = vpop.f32.mrb[33].mxu0  ;;  %v5288_v9 = vld [vmem:[%s6467_s2 + $0x38] sm:$0xff]  }
 0x90e   :  { %v1159_v13 = vpop.f32.mrb[34].mxu0  ;;  %v5290_v11 = vld [vmem:[%s6467_s2 + $0xb8] sm:$0xff]  }
 0x90f   :  { %v1223_v14 = vpack.c.bf16 %v1157_v10, %v1157_v10  ;;  %v1160_v15 = vadd.f32 %v4480_v8, %v1159_v13  ;;  %v4902_v16 = vpop.f32.mrb[35].mxu0  ;;  %v5289_v10 = vld [vmem:[%s6467_s2 + $0xb0] sm:$0xff]  }
 0x910   :  { %v5291_v16 = vld [vmem:[%s6467_s2 + $0x70] sm:$0xff]  }
 0x911   :  { %v1231_v22 = vsel %vm370_vm3, %v1223_v14, 0  ;;  %v1224_v23 = vpack.c.bf16 %v1160_v15, %v1160_v15 }
 0x912   :  { %4912 = vmatpush3.bf16.xpose.msra.mxu0 %v1231_v22 }
 0x913   :  { %v1277_v26 = vsel %vm370_vm3, %v1224_v23, 0  ;;  %4923 = vmatprep.subr.bf16.mxu0 %v5466_v0 }
 0x914   :  { %4918 = vmatpush3.bf16.xpose.msra.mxu1 %v1277_v26 }
 0x915   :  { %4929 = vmatprep.subr.bf16.mxu1 %v5466_v0 }
 0x919   :  { %4914 = vmatmul.mubr.msk.bf16.vlgmr.msra.gmra.mrb[36].mxu0 %vm370_vm3, %v1221_v30 }
 0x91a   :  { %4924 = vmatpush3.bf16.msra.mxu0 %v1349_v35  ;;  %4925 = vmatprep.mubr.msk.bf16.mxu0 %vm5467_vm2, %v5466_v0 }
 0x91b   :  { %4920 = vmatmul.mubr.msk.bf16.vlgmr.msra.gmra.mrb[36].mxu1 %vm370_vm3, %v1222_v34  ;;  %4935 = vmatprep.subr.bf16.mxu0 %v5466_v0 }
 0x91c   :  { %4930 = vmatpush3.bf16.msra.mxu1 %v1395_v36  ;;  %4931 = vmatprep.mubr.msk.bf16.mxu1 %vm5467_vm2, %v5466_v0 }
 0x91d   :  { %4941 = vmatprep.subr.bf16.mxu1 %v5466_v0 }
 0x9ec   :  { %v1267_v37 = vpop.f32.mrb[36].mxu0 }
 0x9ed   :  { %v1319_v38 = vmul.f32 0.35355338, %v1267_v37  ;;  %v4915_v39 = vpop.f32.mrb[37].mxu0 }
 0x9ee   :  { %v1270_v40 = vpop.f32.mrb[38].mxu0  ;;  %v1313_v41 = vpop.f32.mrb[36].mxu1 }
 0x9ef   :  { %v1320_v42 = vmul.f32 0.35355338, %v1313_v41  ;;  %v4916_v43 = vpop.f32.mrb[39].mxu0  ;;  %v4921_v44 = vpop.f32.mrb[37].mxu1  ;;  %v1321_v45 = vsel %vm370_vm3, %v1319_v38, -inf }
 0x9f0   :  { %v1316_v46 = vpop.f32.mrb[38].mxu1  ;;  %1322 = vmax.xlane.f32.xlu0 %v1321_v45  ;;  %v4497_v41 = vld [vmem:[%s6468_s3 + $0x9] ss:$0 sm:$0xff]  ;;  %v4501_v44 = vld [vmem:[%s6468_s3 + $0xd] ss:$0 sm:$0xff] }
 0x9f1   :  { %v4922_v47 = vpop.f32.mrb[39].mxu1  ;;  %v1324_v48 = vsel %vm370_vm3, %v1320_v42, -inf }
 0x9f2   :  { %1325 = vmax.xlane.f32.xlu1 %v1324_v48 }
 0xa7d   :  { %v1323_v49 = vpop.xlane.xlu0 %1322 }
 0xa7e   :  { %v1327_v50 = vsub.f32 %v1319_v38, %v1323_v49  ;;  %v4493_v49 = vld [vmem:[%s6468_s3 + $0x5] ss:$0 sm:$0xff] }
 0xa7f   :  { %v1326_v51 = vpop.xlane.xlu1 %1325 }
 0xa80   :  { %v1329_v52 = vmul.f32 1.442695, %v1327_v50  ;;  %v1328_v53 = vsub.f32 %v1320_v42, %v1326_v51 }
 0xa82   :  { %5351 = vpow2.f32 %v1329_v52  ;;  %v1331_v54 = vmul.f32 1.442695, %v1328_v53 }
 0xa84   :  { %5353 = vpow2.f32 %v1331_v54 }
 0xa8c   :  { %v5352_v55 = vpop.eup %5351 }
 0xa8d   :  { %v1333_v56 = vsel %vm370_vm3, %v5352_v55, 0.0 }
 0xa8e   :  { %v5354_v57 = vpop.eup %5353  ;;  %1334 = vadd.xlane.f32.xlu0 %v1333_v56 }
 0xa8f   :  { %v1336_v58 = vsel %vm370_vm3, %v5354_v57, 0.0 }
 0xa90   :  { %1337 = vadd.xlane.f32.xlu1 %v1336_v58 }
 0xb1b   :  { %v1335_v59 = vpop.xlane.xlu0 %1334 }
 0xb1c   :  { %5355 = vrcp.f32 %v1335_v59 }
 0xb1d   :  { %v1338_v60 = vpop.xlane.xlu1 %1337 }
 0xb1e   :  { %5357 = vrcp.f32 %v1338_v60 }
 0xb26   :  { %v5356_v61 = vpop.eup %5355 }
 0xb27   :  { %v1341_v63 = vmul.f32 %v5356_v61, %v5352_v55 }
 0xb28   :  { %v5358_v1 = vpop.eup %5357 }
 0xb29   :  { %v1342_v2 = vmul.f32 %v5358_v1, %v5354_v57  ;;  %v1343_v3 = vpack.c.bf16 %v1341_v63, %v1341_v63 }
 0xb2b   :  { %4926 = vmatmul.mubr.msk.bf16.vlgmr.msra.gmra.mrb[40].mxu0 %vm370_vm3, %v1343_v3  ;;  %v1344_v8 = vpack.c.bf16 %v1342_v2, %v1342_v2 }
 0xb2c   :  { %4936 = vmatpush3.bf16.msra.mxu0 %v1442_v5  ;;  %4937 = vmatprep.mubr.msk.bf16.mxu0 %vm5467_vm2, %v5466_v0 }
 0xb2d   :  { %4932 = vmatmul.mubr.msk.bf16.vlgmr.msra.gmra.mrb[40].mxu1 %vm370_vm3, %v1344_v8  ;;  %4949 = vmatprep.subr.bf16.mxu0 %v5466_v0 }
 0xb2e   :  { %4942 = vmatpush3.bf16.msra.mxu1 %v5287_v7  ;;  %4945 = vmatprep.mubr.msk.bf16.mxu1 %vm5467_vm2, %v5466_v0 }
 0xb2f   :  { %4943 = vmatprep.subr.bf16.mxu1 %v5466_v0 }
 0xb32   :  { %4944 = vmatpush3.bf16.msra.mxu1 %v5288_v9 }
 0xb33   :  { %4957 = vmatprep.subr.bf16.mxu1 %v5466_v0 }
 0xb35   :  { %4946 = vmatmul.mubr.msk.bf16.vlgmr.msra.gmra.mrb[44].mxu1 %vm133_vm1, %v5674_v20 }
 0xb36   :  { %4958 = vmatpush3.bf16.msra.mxu1 %v5289_v10  ;;  %4961 = vmatprep.mubr.msk.bf16.mxu1 %vm5467_vm2, %v5466_v0 }
 0xb37   :  { %4959 = vmatprep.subr.bf16.mxu1 %v5466_v0 }
 0xb3a   :  { %4960 = vmatpush3.bf16.msra.mxu1 %v5290_v11 }
 0xb3b   :  { %4971 = vmatprep.subr.bf16.mxu1 %v5466_v0 }
 0xb3d   :  { %4962 = vmatmul.mubr.msk.bf16.vlgmr.msra.gmra.mrb[48].mxu1 %vm133_vm1, %v5674_v20 }
 0xb3e   :  { %4973 = vmatprep.mubr.msk.bf16.mxu1 %vm5467_vm2, %v5466_v0 }
 0xbfe   :  { %v1385_v12 = vpop.f32.mrb[40].mxu0 }
 0xbff   :  { %v4927_v13 = vpop.f32.mrb[41].mxu0 }
 0xc00   :  { %v1388_v14 = vpop.f32.mrb[42].mxu0  ;;  %v1431_v15 = vpop.f32.mrb[40].mxu1 }
 0xc01   :  { %v1437_v19 = vpack.c.bf16 %v1431_v15, %v1385_v12  ;;  %v4928_v21 = vpop.f32.mrb[43].mxu0  ;;  %v4933_v22 = vpop.f32.mrb[41].mxu1 }
 0xc02   :  { %v1434_v23 = vpop.f32.mrb[42].mxu1 }
 0xc03   :  { %v4934_v24 = vpop.f32.mrb[43].mxu1  ;;  %4938 = vmatmul.mubr.msk.bf16.vlgmr.msra.gmra.mrb[44].mxu0 %vm370_vm3, %v1437_v19 }
 0xc04   :  { %4950 = vmatpush3.bf16.msra.mxu0 %v5291_v16  ;;  %4953 = vmatprep.mubr.msk.bf16.mxu0 %vm5467_vm2, %v5466_v0 }
 0xc05   :  { %4951 = vmatprep.subr.bf16.mxu0 %v5466_v0 }
 0xc08   :  { %v1549_v26 = vpop.f32.mrb[44].mxu1  ;;  %4952 = vmatpush3.bf16.msra.mxu0 %v5292_v25 }
 0xc09   :  { %v4947_v27 = vpop.f32.mrb[45].mxu1  ;;  %4965 = vmatprep.subr.bf16.mxu0 %v5466_v0  ;;  %v1550_v53 = vadd.f32 %v4493_v49, %v1549_v26 }
 0xc0a   :  { %v1552_v28 = vpop.f32.mrb[46].mxu1 }
 0xc0b   :  { %v4948_v30 = vpop.f32.mrb[47].mxu1  ;;  %4954 = vmatmul.mubr.msk.bf16.vlgmr.msra.gmra.mrb[48].mxu0 %vm133_vm1, %v5674_v20  ;;  %v1553_v56 = vadd.f32 %v4493_v49, %v1552_v28  ;;  %v1672_v58 = vpack.c.bf16 %v1550_v53, %v1550_v53 }
 0xc0c   :  { %4967 = vmatprep.mubr.msk.bf16.mxu0 %vm5467_vm2, %v5466_v0 }
 0xc0d   :  { %v1673_v60 = vpack.c.bf16 %v1553_v56, %v1553_v56 }
 0xc10   :  { %v1665_v31 = vpop.f32.mrb[48].mxu1 }
 0xc11   :  { %v4963_v34 = vpop.f32.mrb[49].mxu1  ;;  %v1666_v50 = vadd.f32 %v4501_v44, %v1665_v31  ;;  %v1497_v31 = vld [vmem:[%s6467_s2 + $0xd8] sm:$0xf] }
 0xc12   :  { %v1668_v35 = vpop.f32.mrb[50].mxu1 }
 0xc13   :  { %v4964_v36 = vpop.f32.mrb[51].mxu1  ;;  %v1669_v54 = vadd.f32 %v4501_v44, %v1668_v35  ;;  %v1676_v57 = vpack.c.bf16 %v1666_v50, %v1666_v50 }
 0xc14   :  { %v186_v36 = vld [vmem:[%s6467_s2 + $0xc0] sm:$0xf] }
 0xc15   :  { %v1677_v59 = vpack.c.bf16 %v1669_v54, %v1669_v54  ;;  %v1800_v61 = vsel %vm492_vm4, %v1676_v57, 0 }
 0xc17   :  { %v1846_v62 = vsel %vm492_vm4, %v1677_v59, 0 }
 0xcd6   :  { %v5926_v37 = vpop.f32.mrb[44].mxu0 }
 0xcd7   :  { %v4939_v38 = vpop.f32.mrb[45].mxu0 }
 0xcd8   :  { %v5928_v39 = vpop.f32.mrb[46].mxu0 }
 0xcd9   :  { %v4940_v40 = vpop.f32.mrb[47].mxu0 }
 0xcde   :  { %v1607_v42 = vpop.f32.mrb[48].mxu0 }
 0xcdf   :  { %v1608_v43 = vadd.f32 %v4497_v41, %v1607_v42  ;;  %v4955_v20 = vpop.f32.mrb[49].mxu0 }
 0xce0   :  { %v1610_v45 = vpop.f32.mrb[50].mxu0 }
 0xce1   :  { %v1674_v46 = vpack.c.bf16 %v1608_v43, %v1608_v43  ;;  %v1611_v47 = vadd.f32 %v4497_v41, %v1610_v45  ;;  %v4956_v48 = vpop.f32.mrb[51].mxu0  ;;  %v1893_v41 = vsel %vm492_vm4, %v1497_v31, 0  ;;  %v1940_v43 = vsel %vm492_vm4, %v186_v36, 0  ;;  %v4513_v31 = vld [vmem:[%s6468_s3 + $0x10] ss:$0 sm:$0xff] }
 0xce3   :  { %v1682_v51 = vsel %vm370_vm3, %v1674_v46, 0  ;;  %v1675_v52 = vpack.c.bf16 %v1611_v47, %v1611_v47 }
 0xce4   :  { %4966 = vmatpush3.bf16.xpose.msra.mxu0 %v1682_v51 }
 0xce5   :  { %v1728_v55 = vsel %vm370_vm3, %v1675_v52, 0  ;;  %4977 = vmatprep.subr.bf16.mxu0 %v5466_v0 }
 0xce6   :  { %4972 = vmatpush3.bf16.xpose.msra.mxu1 %v1728_v55 }
 0xce7   :  { %4983 = vmatprep.subr.bf16.mxu1 %v5466_v0 }
 0xceb   :  { %4968 = vmatmul.mubr.msk.bf16.vlgmr.msra.gmra.mrb[52].mxu0 %vm370_vm3, %v1672_v58  ;;  %v4511_v58 = vld [vmem:[%s6468_s3 + $0xe] ss:$0 sm:$0xff] }
 0xcec   :  { %4978 = vmatpush3.bf16.msra.mxu0 %v1800_v61  ;;  %4979 = vmatprep.mubr.msk.bf16.mxu0 %vm5467_vm2, %v5466_v0 }
 0xced   :  { %4974 = vmatmul.mubr.msk.bf16.vlgmr.msra.gmra.mrb[52].mxu1 %vm370_vm3, %v1673_v60  ;;  %4989 = vmatprep.subr.bf16.mxu0 %v5466_v0 }
 0xcee   :  { %4984 = vmatpush3.bf16.msra.mxu1 %v1846_v62  ;;  %4985 = vmatprep.mubr.msk.bf16.mxu1 %vm5467_vm2, %v5466_v0 }
 0xcef   :  { %4995 = vmatprep.subr.bf16.mxu1 %v5466_v0 }
 0xdbe   :  { %v1718_v63 = vpop.f32.mrb[52].mxu0 }
 0xdbf   :  { %v1770_v1 = vmul.f32 0.35355338, %v1718_v63  ;;  %v4969_v2 = vpop.f32.mrb[53].mxu0 }
 0xdc0   :  { %v1721_v3 = vpop.f32.mrb[54].mxu0  ;;  %v1764_v5 = vpop.f32.mrb[52].mxu1 }
 0xdc1   :  { %v1771_v7 = vmul.f32 0.35355338, %v1764_v5  ;;  %v4970_v8 = vpop.f32.mrb[55].mxu0  ;;  %v4975_v9 = vpop.f32.mrb[53].mxu1  ;;  %v1772_v10 = vsel %vm370_vm3, %v1770_v1, -inf }
 0xdc2   :  { %v1767_v11 = vpop.f32.mrb[54].mxu1  ;;  %1773 = vmax.xlane.f32.xlu0 %v1772_v10 }
 0xdc3   :  { %v4976_v12 = vpop.f32.mrb[55].mxu1  ;;  %v1775_v13 = vsel %vm370_vm3, %v1771_v7, -inf }
 0xdc4   :  { %1776 = vmax.xlane.f32.xlu1 %v1775_v13 }
 0xe4f   :  { %v1774_v14 = vpop.xlane.xlu0 %1773 }
 0xe50   :  { %v1778_v15 = vsub.f32 %v1770_v1, %v1774_v14  ;;  %v5294_v14 = vld [vmem:[%s6467_s2 + $0xe8] sm:$0xff]  }
 0xe51   :  { %v1777_v16 = vpop.xlane.xlu1 %1776 }
 0xe52   :  { %v1780_v19 = vmul.f32 1.442695, %v1778_v15  ;;  %v1779_v21 = vsub.f32 %v1771_v7, %v1777_v16 }
 0xe54   :  { %5359 = vpow2.f32 %v1780_v19  ;;  %v1782_v22 = vmul.f32 1.442695, %v1779_v21 }
 0xe56   :  { %5361 = vpow2.f32 %v1782_v22 }
 0xe5e   :  { %v5360_v23 = vpop.eup %5359 }
 0xe5f   :  { %v1784_v24 = vsel %vm370_vm3, %v5360_v23, 0.0 }
 0xe60   :  { %v5362_v25 = vpop.eup %5361  ;;  %1785 = vadd.xlane.f32.xlu0 %v1784_v24 }
 0xe61   :  { %v1787_v26 = vsel %vm370_vm3, %v5362_v25, 0.0 }
 0xe62   :  { %1788 = vadd.xlane.f32.xlu1 %v1787_v26 }
 0xeed   :  { %v1786_v27 = vpop.xlane.xlu0 %1785 }
 0xeee   :  { %5363 = vrcp.f32 %v1786_v27 }
 0xeef   :  { %v1789_v28 = vpop.xlane.xlu1 %1788 }
 0xef0   :  { %5365 = vrcp.f32 %v1789_v28 }
 0xef8   :  { %v5364_v30 = vpop.eup %5363 }
 0xef9   :  { %v1792_v34 = vmul.f32 %v5364_v30, %v5360_v23 }
 0xefa   :  { %v5366_v35 = vpop.eup %5365 }
 0xefb   :  { %v1793_v38 = vmul.f32 %v5366_v35, %v5362_v25  ;;  %v1794_v40 = vpack.c.bf16 %v1792_v34, %v1792_v34  ;;  %v4512_v25 = vld [vmem:[%s6468_s3 + $0xf] ss:$0 sm:$0xff] }
 0xefd   :  { %4980 = vmatmul.mubr.msk.bf16.vlgmr.msra.gmra.mrb[56].mxu0 %vm370_vm3, %v1794_v40  ;;  %v1795_v42 = vpack.c.bf16 %v1793_v38, %v1793_v38  ;;  %v5295_v40 = vld [vmem:[%s6467_s2 + $0xf0] sm:$0xff]  }
 0xefe   :  { %4990 = vmatpush3.bf16.msra.mxu0 %v1893_v41  ;;  %4991 = vmatprep.mubr.msk.bf16.mxu0 %vm5467_vm2, %v5466_v0  ;;  %v5296_v41 = vld [vmem:[%s6467_s2 + $0xf8] sm:$0xff]  }
 0xeff   :  { %4986 = vmatmul.mubr.msk.bf16.vlgmr.msra.gmra.mrb[56].mxu1 %vm370_vm3, %v1795_v42  ;;  %5001 = vmatprep.subr.bf16.mxu0 %v5466_v0  ;;  %v5297_v42 = vld [vmem:[%s6467_s2 + $0x100] sm:$0xff]  }
 0xf00   :  { %4996 = vmatpush3.bf16.msra.mxu1 %v1940_v43  ;;  %4997 = vmatprep.mubr.msk.bf16.mxu1 %vm5467_vm2, %v5466_v0  ;;  %v5298_v43 = vld [vmem:[%s6467_s2 + $0x108] sm:$0xff]  }
 0xf01   :  { %5009 = vmatprep.subr.bf16.mxu1 %v5466_v0 }
 0xf07   :  { %4998 = vmatmul.mubr.msk.bf16.vlgmr.msra.gmra.mrb[60].mxu1 %vm370_vm3, %v582_v33 }
 0xf08   :  { %5017 = vmatprep.mubr.msk.bf16.mxu1 %vm5467_vm2, %v5466_v0  ;;  %5010 = vmatpush3.bf16.msra.mxu1 %v5295_v40 }
 0xf09   :  { %5011 = vmatprep.subr.bf16.mxu1 %v5466_v0 }
 0xf0c   :  { %5012 = vmatpush3.bf16.msra.mxu1 %v5296_v41 }
 0xf0d   :  { %5013 = vmatprep.subr.bf16.mxu1 %v5466_v0 }
 0xf10   :  { %5014 = vmatpush3.bf16.msra.mxu1 %v5297_v42 }
 0xf11   :  { %5015 = vmatprep.subr.bf16.mxu1 %v5466_v0 }
 0xf14   :  { %5016 = vmatpush3.bf16.msra.mxu1 %v5298_v43 }
 0xf15   :  { %5037 = vmatprep.subr.bf16.mxu1 %v5466_v0 }
 0xfd0   :  { %v1836_v20 = vpop.f32.mrb[56].mxu0 }
 0xfd1   :  { %v4981_v44 = vpop.f32.mrb[57].mxu0 }
 0xfd2   :  { %v1839_v45 = vpop.f32.mrb[58].mxu0  ;;  %v1882_v46 = vpop.f32.mrb[56].mxu1 }
 0xfd3   :  { %v1888_v47 = vpack.c.bf16 %v1882_v46, %v1836_v20  ;;  %v4982_v48 = vpop.f32.mrb[59].mxu0  ;;  %v4987_v49 = vpop.f32.mrb[57].mxu1  ;;  %v4514_v20 = vld [vmem:[%s6468_s3 + $0x11] ss:$0 sm:$0xff] }
 0xfd4   :  { %v1885_v50 = vpop.f32.mrb[58].mxu1 }
 0xfd5   :  { %v4988_v51 = vpop.f32.mrb[59].mxu1  ;;  %4992 = vmatmul.mubr.msk.bf16.vlgmr.msra.gmra.mrb[60].mxu0 %vm370_vm3, %v1888_v47 }
 0xfd6   :  { %5005 = vmatprep.mubr.msk.bf16.mxu0 %vm5467_vm2, %v5466_v0 }
 0xfda   :  { %v1976_v29 = vpop.f32.mrb[60].mxu1 }
 0xfdb   :  { %v1977_v32 = vadd.f32 %v1976_v29, %v5845_v4  ;;  %v4999_v33 = vpop.f32.mrb[61].mxu1 }
 0xfdc   :  { %v1979_v52 = vpop.f32.mrb[62].mxu1 }
 0xfdd   :  { %v1980_v53 = vadd.f32 %v1979_v52, %v5847_v6  ;;  %v5000_v54 = vpop.f32.mrb[63].mxu1  ;;  %v1983_v55 = vadd.f32 %v1977_v32, %v5926_v37 }
 0xfdf   :  { %v1984_v56 = vadd.f32 %v1980_v53, %v5928_v39 }
0x10a8   :  { %v1929_v57 = vpop.f32.mrb[60].mxu0 }
0x10a9   :  { %v1985_v59 = vadd.f32 %v1983_v55, %v1929_v57  ;;  %v4993_v60 = vpop.f32.mrb[61].mxu0 }
0x10aa   :  { %v1932_v61 = vpop.f32.mrb[62].mxu0 }
0x10ab   :  { %v1992_v62 = vadd.f32 %v4511_v58, %v1985_v59  ;;  %v1986_v63 = vadd.f32 %v1984_v56, %v1932_v61  ;;  %v4994_v4 = vpop.f32.mrb[63].mxu0 }
0x10ad   :  { %v1993_v1 = vadd.f32 %v4511_v58, %v1986_v63  ;;  %v1994_v2 = vadd.f32 %v1992_v62, %v5665_v17 }
0x10af   :  { %v1998_v6 = vsel %vm133_vm1, %v1994_v2, 0.0  ;;  %v1995_v37 = vadd.f32 %v1993_v1, %v5667_v18  ;;  %v5293_v18 = vld [vmem:[%s6467_s2 + $0xe0] sm:$0xff]  }
0x10b0   :  { %1999 = vadd.xlane.f32.xlu0 %v1998_v6  ;;  %5002 = vmatpush3.bf16.msra.mxu0 %v5293_v18 }
0x10b1   :  { %v2001_v39 = vsel %vm133_vm1, %v1995_v37, 0.0  ;;  %5003 = vmatprep.subr.bf16.mxu0 %v5466_v0 }
0x10b2   :  { %2002 = vadd.xlane.f32.xlu1 %v2001_v39 }
0x10b4   :  { %5004 = vmatpush3.bf16.msra.mxu0 %v5294_v14 }
0x10b5   :  { %5021 = vmatprep.subr.bf16.mxu0 %v5466_v0 }
0x113d   :  { %v2000_v3 = vpop.xlane.xlu0 %1999 }
0x113e   :  { %v2004_v5 = vmul.f32 0.03125, %v2000_v3 }
0x113f   :  { %v2003_v7 = vpop.xlane.xlu1 %2002 }
0x1140   :  { %v2006_v8 = vsub.f32 %v1994_v2, %v2004_v5  ;;  %v2005_v9 = vmul.f32 0.03125, %v2003_v7  ;;  %v4518_v2 = vld [vmem:[%s6468_s3 + $0x12] ss:$0 sm:$0xff] }
0x1142   :  { %v2007_v10 = vsub.f32 %v1995_v37, %v2005_v9  ;;  %v2008_v11 = vmul.f32 %v2006_v8, %v2006_v8 }
0x1144   :  { %v2010_v12 = vsel %vm133_vm1, %v2008_v11, 0.0  ;;  %v2009_v13 = vmul.f32 %v2007_v10, %v2007_v10 }
0x1145   :  { %2011 = vadd.xlane.f32.xlu0 %v2010_v12 }
0x1146   :  { %v2013_v17 = vsel %vm133_vm1, %v2009_v13, 0.0 }
0x1147   :  { %2014 = vadd.xlane.f32.xlu1 %v2013_v17 }
0x11d2   :  { %v2012_v15 = vpop.xlane.xlu0 %2011 }
0x11d3   :  { %v2016_v16 = vmul.f32 0.03125, %v2012_v15 }
0x11d4   :  { %v2015_v19 = vpop.xlane.xlu1 %2014 }
0x11d5   :  { %v2018_v21 = vadd.f32 1e-05, %v2016_v16  ;;  %v2017_v22 = vmul.f32 0.03125, %v2015_v19 }
0x11d7   :  { %5367 = vrsqrt.f32 %v2018_v21  ;;  %v2019_v23 = vadd.f32 1e-05, %v2017_v22 }
0x11d9   :  { %5369 = vrsqrt.f32 %v2019_v23  ;;  %v5299_v23 = vld [vmem:[%s6467_s2 + $0x110] sm:$0xff]  }
0x11e1   :  { %v5368_v24 = vpop.eup %5367 }
0x11e2   :  { %v2022_v26 = vmul.f32 %v5368_v24, %v2006_v8  ;;  %v5300_v24 = vld [vmem:[%s6467_s2 + $0x190] sm:$0xff]  }
0x11e3   :  { %v5370_v27 = vpop.eup %5369 }
0x11e4   :  { %v2028_v28 = vmul.f32 %v4512_v25, %v2022_v26  ;;  %v2023_v30 = vmul.f32 %v5370_v27, %v2007_v10  ;;  %v5302_v26 = vld [vmem:[%s6467_s2 + $0x198] sm:$0xff]  }
0x11e6   :  { %v2029_v34 = vmul.f32 %v4512_v25, %v2023_v30  ;;  %v2034_v35 = vadd.f32 %v4513_v31, %v2028_v28  ;;  %v5301_v25 = vld [vmem:[%s6467_s2 + $0x118] sm:$0xff]  }
0x11e8   :  { %v2035_v36 = vadd.f32 %v4513_v31, %v2029_v34 }
0x11ea   :  { %v2036_v38 = vpack.c.bf16 %v2035_v36, %v2034_v35 }
0x11ec   :  { %5006 = vmatmul.mubr.msk.bf16.vlgmr.msra.gmra.mrb[64].mxu0 %vm133_vm1, %v2036_v38  ;;  %v4524_v38 = vld [vmem:[%s6468_s3 + $0x13] ss:$0 sm:$0xff] }
0x11ed   :  { %5025 = vmatprep.mubr.msk.bf16.mxu0 %vm5467_vm2, %v5466_v0  ;;  %5022 = vmatpush3.bf16.msra.mxu0 %v5299_v23 }
0x11ee   :  { %5023 = vmatprep.subr.bf16.mxu0 %v5466_v0 }
0x11f1   :  { %5024 = vmatpush3.bf16.msra.mxu0 %v5301_v25 }
0x11f2   :  { %5029 = vmatprep.subr.bf16.mxu0 %v5466_v0 }
0x12bf   :  { %v2103_v44 = vpop.f32.mrb[64].mxu0 }
0x12c0   :  { %v2104_v45 = vadd.f32 %v4514_v20, %v2103_v44  ;;  %v5007_v46 = vpop.f32.mrb[65].mxu0 }
0x12c1   :  { %v2106_v47 = vpop.f32.mrb[66].mxu0 }
0x12c2   :  { %v2110_v48 = vmul.f32 %v2104_v45, %v2104_v45  ;;  %v2107_v49 = vadd.f32 %v4514_v20, %v2106_v47  ;;  %v5008_v50 = vpop.f32.mrb[67].mxu0  ;;  %v4525_v20 = vld [vmem:[%s6468_s3 + $0x14] ss:$0 sm:$0xff] }
0x12c3   :  { %v5303_v47 = vld [vmem:[%s6467_s2 + $0x150] sm:$0xff]  }
0x12c4   :  { %v2112_v51 = vmul.f32 %v2110_v48, %v2104_v45  ;;  %v2111_v29 = vmul.f32 %v2107_v49, %v2107_v49 }
0x12c6   :  { %v2114_v32 = vmul.f32 0.044715, %v2112_v51  ;;  %v2113_v33 = vmul.f32 %v2111_v29, %v2107_v49 }
0x12c8   :  { %v2116_v52 = vadd.f32 %v2114_v32, %v2104_v45  ;;  %v2115_v53 = vmul.f32 0.044715, %v2113_v33 }
0x12ca   :  { %v2118_v54 = vmul.f32 0.7978846, %v2116_v52  ;;  %v2117_v55 = vadd.f32 %v2115_v53, %v2107_v49 }
0x12cc   :  { %5371 = vtanh.f32 %v2118_v54  ;;  %v2119_v56 = vmul.f32 0.7978846, %v2117_v55  ;;  %v4530_v55 = vld [vmem:[%s6468_s3 + $0x19] ss:$0 sm:$0xff] }
0x12ce   :  { %5373 = vtanh.f32 %v2119_v56 }
0x12d6   :  { %v5372_v57 = vpop.eup %5371 }
0x12d7   :  { %v2122_v58 = vadd.f32 1.0, %v5372_v57 }
0x12d8   :  { %v5374_v59 = vpop.eup %5373 }
0x12d9   :  { %v2124_v60 = vmul.f32 0.5, %v2122_v58  ;;  %v2123_v61 = vadd.f32 1.0, %v5374_v59  ;;  %v4534_v59 = vld [vmem:[%s6468_s3 + $0x1d] ss:$0 sm:$0xff] }
0x12db   :  { %v2125_v62 = vmul.f32 0.5, %v2123_v61  ;;  %v2126_v63 = vmul.f32 %v2124_v60, %v2104_v45 }
0x12dd   :  { %v2127_v4 = vmul.f32 %v2125_v62, %v2107_v49  ;;  %v5304_v49 = vld [vmem:[%s6467_s2 + $0x158] sm:$0xff]  }
0x12df   :  { %v2128_v1 = vpack.c.bf16 %v2127_v4, %v2126_v63  ;;  %v4526_v4 = vld [vmem:[%s6468_s3 + $0x15] ss:$0 sm:$0xff] }
0x12e1   :  { %5018 = vmatmul.mubr.msk.bf16.vlgmr.msra.gmra.mrb[64].mxu1 %vm2158_vm5, %v2128_v1 }
0x12e2   :  { %5041 = vmatprep.mubr.msk.bf16.mxu1 %vm5467_vm2, %v5466_v0  ;;  %5038 = vmatpush3.bf16.msra.mxu1 %v5300_v24 }
0x12e3   :  { %5039 = vmatprep.subr.bf16.mxu1 %v5466_v0 }
0x12e6   :  { %5040 = vmatpush3.bf16.msra.mxu1 %v5302_v26 }
0x12e7   :  { %5051 = vmatprep.subr.bf16.mxu1 %v5466_v0 }
0x13b4   :  { %v2196_v6 = vpop.f32.mrb[64].mxu1 }
0x13b5   :  { %v2197_v37 = vadd.f32 %v4518_v2, %v2196_v6  ;;  %v5019_v39 = vpop.f32.mrb[65].mxu1 }
0x13b6   :  { %v2199_v3 = vpop.f32.mrb[66].mxu1 }
0x13b7   :  { %v2200_v5 = vadd.f32 %v4518_v2, %v2199_v3  ;;  %v5020_v7 = vpop.f32.mrb[67].mxu1  ;;  %v2203_v8 = vadd.f32 %v2197_v37, %v2034_v35 }
0x13b9   :  { %v2207_v9 = vsel %vm133_vm1, %v2203_v8, 0.0  ;;  %v2204_v10 = vadd.f32 %v2200_v5, %v2035_v36 }
0x13ba   :  { %2208 = vadd.xlane.f32.xlu0 %v2207_v9 }
0x13bb   :  { %v2210_v11 = vsel %vm133_vm1, %v2204_v10, 0.0 }
0x13bc   :  { %2211 = vadd.xlane.f32.xlu1 %v2210_v11 }
0x1447   :  { %v2209_v12 = vpop.xlane.xlu0 %2208 }
0x1448   :  { %v2213_v13 = vmul.f32 0.03125, %v2209_v12 }
0x1449   :  { %v2212_v17 = vpop.xlane.xlu1 %2211 }
0x144a   :  { %v2215_v18 = vsub.f32 %v2203_v8, %v2213_v13  ;;  %v2214_v14 = vmul.f32 0.03125, %v2212_v17 }
0x144c   :  { %v2216_v15 = vsub.f32 %v2204_v10, %v2214_v14  ;;  %v2217_v16 = vmul.f32 %v2215_v18, %v2215_v18 }
0x144e   :  { %v2219_v19 = vsel %vm133_vm1, %v2217_v16, 0.0  ;;  %v2218_v21 = vmul.f32 %v2216_v15, %v2216_v15 }
0x144f   :  { %2220 = vadd.xlane.f32.xlu0 %v2219_v19 }
0x1450   :  { %v2222_v22 = vsel %vm133_vm1, %v2218_v21, 0.0 }
0x1451   :  { %2223 = vadd.xlane.f32.xlu1 %v2222_v22 }
0x14dc   :  { %v2221_v27 = vpop.xlane.xlu0 %2220 }
0x14dd   :  { %v2225_v28 = vmul.f32 0.03125, %v2221_v27 }
0x14de   :  { %v2224_v30 = vpop.xlane.xlu1 %2223 }
0x14df   :  { %v2227_v31 = vadd.f32 1e-05, %v2225_v28  ;;  %v2226_v34 = vmul.f32 0.03125, %v2224_v30 }
0x14e1   :  { %5375 = vrsqrt.f32 %v2227_v31  ;;  %v2228_v35 = vadd.f32 1e-05, %v2226_v34 }
0x14e3   :  { %5377 = vrsqrt.f32 %v2228_v35 }
0x14eb   :  { %v5376_v36 = vpop.eup %5375 }
0x14ec   :  { %v2231_v40 = vmul.f32 %v5376_v36, %v2215_v18 }
0x14ed   :  { %v5378_v41 = vpop.eup %5377 }
0x14ee   :  { %v2237_v42 = vmul.f32 %v4524_v38, %v2231_v40  ;;  %v2232_v43 = vmul.f32 %v5378_v41, %v2216_v15 }
0x14f0   :  { %v2238_v44 = vmul.f32 %v4524_v38, %v2232_v43  ;;  %v6063_v45 = vadd.f32 %v4525_v20, %v2237_v42 }
0x14f2   :  { %v6065_v46 = vadd.f32 %v4525_v20, %v2238_v44 }
0x14f4   :  { %v6072_v48 = vpack.c.bf16 %v6065_v46, %v6063_v45 }
0x14f6   :  { %5026 = vmatmul.mubr.msk.bf16.vlgmr.msra.gmra.mrb[68].mxu0 %vm133_vm1, %v6072_v48  ;;  %5042 = vmatmul.mubr.msk.bf16.vlgmr.msra.gmra.mrb[68].mxu1 %vm133_vm1, %v6072_v48 }
0x14f7   :  { %5030 = vmatpush3.bf16.msra.mxu0 %v5303_v47  ;;  %5033 = vmatprep.mubr.msk.bf16.mxu0 %vm5467_vm2, %v5466_v0  ;;  %v5305_v47 = vld [vmem:[%s6467_s2 + $0x120] sm:$0xff]  }
0x14f8   :  { %5031 = vmatprep.subr.bf16.mxu0 %v5466_v0  ;;  %5053 = vmatprep.mubr.msk.bf16.mxu1 %vm5467_vm2, %v5466_v0 }
0x14fb   :  { %5032 = vmatpush3.bf16.msra.mxu0 %v5304_v49 }
0x14fc   :  { %5045 = vmatprep.subr.bf16.mxu0 %v5466_v0 }
0x14fe   :  { %5034 = vmatmul.mubr.msk.bf16.vlgmr.msra.gmra.mrb[72].mxu0 %vm133_vm1, %v6072_v48 }
0x14ff   :  { %5047 = vmatprep.mubr.msk.bf16.mxu0 %vm5467_vm2, %v5466_v0 }
0x15c9   :  { %v2313_v50 = vpop.f32.mrb[68].mxu0  ;;  %v2429_v51 = vpop.f32.mrb[68].mxu1 }
0x15ca   :  { %v5027_v29 = vpop.f32.mrb[69].mxu0  ;;  %v5043_v32 = vpop.f32.mrb[69].mxu1  ;;  %v2430_v1 = vadd.f32 %v4534_v59, %v2429_v51  ;;  %v2314_v37 = vadd.f32 %v4526_v4, %v2313_v50  ;;  %v5306_v51 = vld [vmem:[%s6467_s2 + $0x160] sm:$0xff]  }
0x15cb   :  { %v2316_v33 = vpop.f32.mrb[70].mxu0  ;;  %v2432_v52 = vpop.f32.mrb[70].mxu1  ;;  %v5307_v32 = vld [vmem:[%s6467_s2 + $0x128] sm:$0xff]  }
0x15cc   :  { %v5028_v53 = vpop.f32.mrb[71].mxu0  ;;  %v5044_v54 = vpop.f32.mrb[71].mxu1  ;;  %v2433_v39 = vadd.f32 %v4534_v59, %v2432_v52  ;;  %v2440_v5 = vpack.c.bf16 %v2430_v1, %v2430_v1  ;;  %v2317_v7 = vadd.f32 %v4526_v4, %v2316_v33  ;;  %v2436_v8 = vpack.c.bf16 %v2314_v37, %v2314_v37  ;;  %v5308_v33 = vld [vmem:[%s6467_s2 + $0x168] sm:$0xff]   ;;  %v5309_v52 = vld [vmem:[%s6467_s2 + $0x1a0] sm:$0xff]   ;;  %v4546_v4 = vld [vmem:[%s6468_s3 + $0x1a] ss:$0 sm:$0xff] }
0x15cd   :  { %v5310_v53 = vld [vmem:[%s6467_s2 + $0x1a8] sm:$0xff]  }
0x15ce   :  { %v2441_v9 = vpack.c.bf16 %v2433_v39, %v2433_v39  ;;  %v2564_v10 = vsel %vm492_vm4, %v2440_v5, 0  ;;  %v2437_v11 = vpack.c.bf16 %v2317_v7, %v2317_v7 }
0x15d0   :  { %v2610_v12 = vsel %vm492_vm4, %v2441_v9, 0 }
0x15d1   :  { %v2371_v56 = vpop.f32.mrb[72].mxu0 }
0x15d2   :  { %v2372_v57 = vadd.f32 %v4530_v55, %v2371_v56  ;;  %v5035_v58 = vpop.f32.mrb[73].mxu0 }
0x15d3   :  { %v2374_v60 = vpop.f32.mrb[74].mxu0 }
0x15d4   :  { %v2438_v61 = vpack.c.bf16 %v2372_v57, %v2372_v57  ;;  %v2375_v62 = vadd.f32 %v4530_v55, %v2374_v60  ;;  %v5036_v63 = vpop.f32.mrb[75].mxu0 }
0x15d6   :  { %v2446_v2 = vsel %vm370_vm3, %v2438_v61, 0  ;;  %v2439_v6 = vpack.c.bf16 %v2375_v62, %v2375_v62 }
0x15d7   :  { %5046 = vmatpush3.bf16.xpose.msra.mxu0 %v2446_v2 }
0x15d8   :  { %v2492_v3 = vsel %vm370_vm3, %v2439_v6, 0  ;;  %5057 = vmatprep.subr.bf16.mxu0 %v5466_v0 }
0x15d9   :  { %5052 = vmatpush3.bf16.xpose.msra.mxu1 %v2492_v3 }
0x15da   :  { %5063 = vmatprep.subr.bf16.mxu1 %v5466_v0 }
0x15de   :  { %5048 = vmatmul.mubr.msk.bf16.vlgmr.msra.gmra.mrb[76].mxu0 %vm370_vm3, %v2436_v8 }
0x15df   :  { %5058 = vmatpush3.bf16.msra.mxu0 %v2564_v10  ;;  %5059 = vmatprep.mubr.msk.bf16.mxu0 %vm5467_vm2, %v5466_v0  ;;  %v4542_v10 = vld [vmem:[%s6468_s3 + $0x16] ss:$0 sm:$0xff] }
0x15e0   :  { %5054 = vmatmul.mubr.msk.bf16.vlgmr.msra.gmra.mrb[72].mxu1 %vm370_vm3, %v2437_v11  ;;  %5069 = vmatprep.subr.bf16.mxu0 %v5466_v0  ;;  %v4550_v11 = vld [vmem:[%s6468_s3 + $0x1e] ss:$0 sm:$0xff] }
0x15e1   :  { %5064 = vmatpush3.bf16.msra.mxu1 %v2610_v12  ;;  %5065 = vmatprep.mubr.msk.bf16.mxu1 %vm5467_vm2, %v5466_v0 }
0x15e2   :  { %5077 = vmatprep.subr.bf16.mxu1 %v5466_v0 }
0x16b1   :  { %v2482_v13 = vpop.f32.mrb[76].mxu0 }
0x16b2   :  { %v2534_v17 = vmul.f32 0.35355338, %v2482_v13  ;;  %v5049_v18 = vpop.f32.mrb[77].mxu0 }
0x16b3   :  { %v2485_v14 = vpop.f32.mrb[78].mxu0  ;;  %v2528_v15 = vpop.f32.mrb[72].mxu1 }
0x16b4   :  { %v2535_v16 = vmul.f32 0.35355338, %v2528_v15  ;;  %v5050_v19 = vpop.f32.mrb[79].mxu0  ;;  %v5055_v21 = vpop.f32.mrb[73].mxu1  ;;  %v2536_v22 = vsel %vm370_vm3, %v2534_v17, -inf }
0x16b5   :  { %v2531_v23 = vpop.f32.mrb[74].mxu1  ;;  %2537 = vmax.xlane.f32.xlu1 %v2536_v22 }
0x16b6   :  { %v5056_v24 = vpop.f32.mrb[75].mxu1  ;;  %v2539_v25 = vsel %vm370_vm3, %v2535_v16, -inf }
0x16b7   :  { %2540 = vmax.xlane.f32.xlu0 %v2539_v25 }
0x1742   :  { %v2538_v26 = vpop.xlane.xlu1 %2537 }
0x1743   :  { %v2542_v27 = vsub.f32 %v2534_v17, %v2538_v26 }
0x1744   :  { %v2541_v28 = vpop.xlane.xlu0 %2540 }
0x1745   :  { %v2544_v30 = vmul.f32 1.442695, %v2542_v27  ;;  %v2543_v31 = vsub.f32 %v2535_v16, %v2541_v28 }
0x1747   :  { %5379 = vpow2.f32 %v2544_v30  ;;  %v2546_v34 = vmul.f32 1.442695, %v2543_v31 }
0x1749   :  { %5381 = vpow2.f32 %v2546_v34 }
0x1751   :  { %v5380_v35 = vpop.eup %5379 }
0x1752   :  { %v2548_v36 = vsel %vm370_vm3, %v5380_v35, 0.0 }
0x1753   :  { %v5382_v38 = vpop.eup %5381  ;;  %2549 = vadd.xlane.f32.xlu1 %v2548_v36 }
0x1754   :  { %v2551_v40 = vsel %vm370_vm3, %v5382_v38, 0.0 }
0x1755   :  { %2552 = vadd.xlane.f32.xlu0 %v2551_v40 }
0x17e0   :  { %v2550_v41 = vpop.xlane.xlu1 %2549 }
0x17e1   :  { %5383 = vrcp.f32 %v2550_v41 }
0x17e2   :  { %v2553_v42 = vpop.xlane.xlu0 %2552 }
0x17e3   :  { %5385 = vrcp.f32 %v2553_v42 }
0x17eb   :  { %v5384_v43 = vpop.eup %5383 }
0x17ec   :  { %v2556_v20 = vmul.f32 %v5384_v43, %v5380_v35 }
0x17ed   :  { %v5386_v44 = vpop.eup %5385 }
0x17ee   :  { %v2557_v49 = vmul.f32 %v5386_v44, %v5382_v38  ;;  %v2558_v50 = vpack.c.bf16 %v2556_v20, %v2556_v20 }
0x17f0   :  { %5060 = vmatmul.mubr.msk.bf16.vlgmr.msra.gmra.mrb[80].mxu0 %vm370_vm3, %v2558_v50  ;;  %v2559_v29 = vpack.c.bf16 %v2557_v49, %v2557_v49 }
0x17f1   :  { %5070 = vmatpush3.bf16.msra.mxu0 %v5305_v47  ;;  %5073 = vmatprep.mubr.msk.bf16.mxu0 %vm5467_vm2, %v5466_v0 }
0x17f2   :  { %5066 = vmatmul.mubr.msk.bf16.vlgmr.msra.gmra.mrb[76].mxu1 %vm370_vm3, %v2559_v29  ;;  %5071 = vmatprep.subr.bf16.mxu0 %v5466_v0 }
0x17f3   :  { %5078 = vmatpush3.bf16.msra.mxu1 %v5306_v51  ;;  %5081 = vmatprep.mubr.msk.bf16.mxu1 %vm5467_vm2, %v5466_v0 }
0x17f4   :  { %5079 = vmatprep.subr.bf16.mxu1 %v5466_v0 }
0x17f5   :  { %5072 = vmatpush3.bf16.msra.mxu0 %v5307_v32 }
0x17f6   :  { %5085 = vmatprep.subr.bf16.mxu0 %v5466_v0 }
0x17f7   :  { %5080 = vmatpush3.bf16.msra.mxu1 %v5308_v33 }
0x17f8   :  { %5074 = vmatmul.mubr.msk.bf16.vlgmr.msra.gmra.mrb[84].mxu0 %vm133_vm1, %v6072_v48  ;;  %5093 = vmatprep.subr.bf16.mxu1 %v5466_v0 }
0x17f9   :  { %5086 = vmatpush3.bf16.msra.mxu0 %v5309_v52  ;;  %5089 = vmatprep.mubr.msk.bf16.mxu0 %vm5467_vm2, %v5466_v0 }
0x17fa   :  { %5082 = vmatmul.mubr.msk.bf16.vlgmr.msra.gmra.mrb[80].mxu1 %vm133_vm1, %v6072_v48  ;;  %5087 = vmatprep.subr.bf16.mxu0 %v5466_v0 }
0x17fb   :  { %5095 = vmatprep.mubr.msk.bf16.mxu1 %vm5467_vm2, %v5466_v0 }
0x17fd   :  { %5088 = vmatpush3.bf16.msra.mxu0 %v5310_v53 }
0x17fe   :  { %5099 = vmatprep.subr.bf16.mxu0 %v5466_v0 }
0x1800   :  { %5090 = vmatmul.mubr.msk.bf16.vlgmr.msra.gmra.mrb[88].mxu0 %vm133_vm1, %v6072_v48 }
0x1801   :  { %5101 = vmatprep.mubr.msk.bf16.mxu0 %vm5467_vm2, %v5466_v0 }
0x18c3   :  { %v6160_v54 = vpop.f32.mrb[80].mxu0 }
0x18c4   :  { %v5061_v55 = vpop.f32.mrb[81].mxu0 }
0x18c5   :  { %v2603_v56 = vpop.f32.mrb[82].mxu0  ;;  %v6162_v57 = vpop.f32.mrb[76].mxu1 }
0x18c6   :  { %v2652_v58 = vpack.c.bf16 %v6162_v57, %v6160_v54  ;;  %v5062_v59 = vpop.f32.mrb[83].mxu0  ;;  %v5067_v60 = vpop.f32.mrb[77].mxu1 }
0x18c7   :  { %v2649_v61 = vpop.f32.mrb[78].mxu1 }
0x18c8   :  { %v5068_v62 = vpop.f32.mrb[79].mxu1 }
0x18c9   :  { %v2665_v62 = vld [vmem:[%s6467_s2 + $0x1d8] sm:$0xf] }
0x18cb   :  { %v2717_v63 = vpop.f32.mrb[84].mxu0 }
0x18cc   :  { %v5075_v1 = vpop.f32.mrb[85].mxu0  ;;  %v2718_v18 = vadd.f32 %v4542_v10, %v2717_v63 }
0x18cd   :  { %v2720_v2 = vpop.f32.mrb[86].mxu0  ;;  %v2775_v6 = vpop.f32.mrb[80].mxu1 }
0x18ce   :  { %v2776_v37 = vadd.f32 %v4546_v4, %v2775_v6  ;;  %v5076_v39 = vpop.f32.mrb[87].mxu0  ;;  %v5083_v3 = vpop.f32.mrb[81].mxu1  ;;  %v2721_v21 = vadd.f32 %v4542_v10, %v2720_v2  ;;  %v2840_v25 = vpack.c.bf16 %v2718_v18, %v2718_v18  ;;  %v3061_v6 = vsel %vm492_vm4, %v2665_v62, 0 }
0x18cf   :  { %v2778_v5 = vpop.f32.mrb[82].mxu1  ;;  %v5312_v3 = vld [vmem:[%s6467_s2 + $0x138] sm:$0xff]  }
0x18d0   :  { %v2842_v7 = vpack.c.bf16 %v2776_v37, %v2776_v37  ;;  %v2779_v8 = vadd.f32 %v4546_v4, %v2778_v5  ;;  %v5084_v9 = vpop.f32.mrb[83].mxu1  ;;  %v2841_v27 = vpack.c.bf16 %v2721_v21, %v2721_v21  ;;  %v5311_v37 = vld [vmem:[%s6467_s2 + $0x130] sm:$0xff]  }
0x18d1   :  { %v5313_v5 = vld [vmem:[%s6467_s2 + $0x1b0] sm:$0xff]  }
0x18d2   :  { %v2850_v12 = vsel %vm370_vm3, %v2842_v7, 0  ;;  %v2843_v13 = vpack.c.bf16 %v2779_v8, %v2779_v8  ;;  %v5314_v7 = vld [vmem:[%s6467_s2 + $0x1b8] sm:$0xff]  }
0x18d3   :  { %v2833_v17 = vpop.f32.mrb[88].mxu0  ;;  %5094 = vmatpush3.bf16.xpose.msra.mxu1 %v2850_v12  ;;  %v5315_v12 = vld [vmem:[%s6467_s2 + $0x170] sm:$0xff]  }
0x18d4   :  { %v2896_v14 = vsel %vm370_vm3, %v2843_v13, 0  ;;  %v2834_v15 = vadd.f32 %v4550_v11, %v2833_v17  ;;  %v5091_v16 = vpop.f32.mrb[89].mxu0  ;;  %5105 = vmatprep.subr.bf16.mxu1 %v5466_v0 }
0x18d5   :  { %v2836_v19 = vpop.f32.mrb[90].mxu0  ;;  %5100 = vmatpush3.bf16.xpose.msra.mxu0 %v2896_v14  ;;  %v5316_v16 = vld [vmem:[%s6467_s2 + $0x178] sm:$0xff]  }
0x18d6   :  { %v2844_v22 = vpack.c.bf16 %v2834_v15, %v2834_v15  ;;  %v2837_v23 = vadd.f32 %v4550_v11, %v2836_v19  ;;  %v5092_v24 = vpop.f32.mrb[91].mxu0  ;;  %5111 = vmatprep.subr.bf16.mxu0 %v5466_v0 }
0x18d8   :  { %v2845_v26 = vpack.c.bf16 %v2837_v23, %v2837_v23  ;;  %v2968_v28 = vsel %vm492_vm4, %v2844_v22, 0 }
0x18da   :  { %5096 = vmatmul.mubr.msk.bf16.vlgmr.msra.gmra.mrb[84].mxu1 %vm370_vm3, %v2840_v25  ;;  %v3014_v30 = vsel %vm492_vm4, %v2845_v26, 0 }
0x18db   :  { %5106 = vmatpush3.bf16.msra.mxu1 %v2968_v28  ;;  %5107 = vmatprep.mubr.msk.bf16.mxu1 %vm5467_vm2, %v5466_v0 }
0x18dc   :  { %5102 = vmatmul.mubr.msk.bf16.vlgmr.msra.gmra.mrb[92].mxu0 %vm370_vm3, %v2841_v27  ;;  %5117 = vmatprep.subr.bf16.mxu1 %v5466_v0 }
0x18dd   :  { %5112 = vmatpush3.bf16.msra.mxu0 %v3014_v30  ;;  %5113 = vmatprep.mubr.msk.bf16.mxu0 %vm5467_vm2, %v5466_v0 }
0x18de   :  { %5123 = vmatprep.subr.bf16.mxu0 %v5466_v0 }
0x19ad   :  { %v2886_v31 = vpop.f32.mrb[84].mxu1 }
0x19ae   :  { %v2938_v34 = vmul.f32 0.35355338, %v2886_v31  ;;  %v5097_v35 = vpop.f32.mrb[85].mxu1 }
0x19af   :  { %v2889_v36 = vpop.f32.mrb[86].mxu1  ;;  %v2932_v38 = vpop.f32.mrb[92].mxu0  ;;  %v4563_v35 = vld [vmem:[%s6468_s3 + $0x1b] ss:$0 sm:$0xff] }
0x19b0   :  { %v2939_v40 = vmul.f32 0.35355338, %v2932_v38  ;;  %v5098_v41 = vpop.f32.mrb[87].mxu1  ;;  %v5103_v42 = vpop.f32.mrb[93].mxu0  ;;  %v2940_v43 = vsel %vm370_vm3, %v2938_v34, -inf }
0x19b1   :  { %2941 = vmax.xlane.f32.xlu0 %v2940_v43  ;;  %v2935_v20 = vpop.f32.mrb[94].mxu0  ;;  %v4567_v41 = vld [vmem:[%s6468_s3 + $0x1f] ss:$0 sm:$0xff] }
0x19b2   :  { %v5104_v44 = vpop.f32.mrb[95].mxu0  ;;  %v2943_v47 = vsel %vm370_vm3, %v2939_v40, -inf }
0x19b3   :  { %2944 = vmax.xlane.f32.xlu1 %v2943_v47  ;;  %v4559_v47 = vld [vmem:[%s6468_s3 + $0x17] ss:$0 sm:$0xff] }
0x1a3e   :  { %v2942_v49 = vpop.xlane.xlu0 %2941 }
0x1a3f   :  { %v2946_v50 = vsub.f32 %v2938_v34, %v2942_v49 }
0x1a40   :  { %v2945_v51 = vpop.xlane.xlu1 %2944 }
0x1a41   :  { %v2948_v29 = vmul.f32 1.442695, %v2946_v50  ;;  %v2947_v32 = vsub.f32 %v2939_v40, %v2945_v51 }
0x1a43   :  { %5387 = vpow2.f32 %v2948_v29  ;;  %v2950_v33 = vmul.f32 1.442695, %v2947_v32 }
0x1a45   :  { %5389 = vpow2.f32 %v2950_v33 }
0x1a4d   :  { %v5388_v52 = vpop.eup %5387 }
0x1a4e   :  { %v2952_v53 = vsel %vm370_vm3, %v5388_v52, 0.0 }
0x1a4f   :  { %v5390_v55 = vpop.eup %5389  ;;  %2953 = vadd.xlane.f32.xlu0 %v2952_v53 }
0x1a50   :  { %v2955_v56 = vsel %vm370_vm3, %v5390_v55, 0.0 }
0x1a51   :  { %2956 = vadd.xlane.f32.xlu1 %v2955_v56 }
0x1adc   :  { %v2954_v59 = vpop.xlane.xlu0 %2953 }
0x1add   :  { %5391 = vrcp.f32 %v2954_v59 }
0x1ade   :  { %v2957_v60 = vpop.xlane.xlu1 %2956 }
0x1adf   :  { %5393 = vrcp.f32 %v2957_v60 }
0x1ae7   :  { %v5392_v61 = vpop.eup %5391 }
0x1ae8   :  { %v2960_v63 = vmul.f32 %v5392_v61, %v5388_v52 }
0x1ae9   :  { %v5394_v4 = vpop.eup %5393 }
0x1aea   :  { %v2961_v1 = vmul.f32 %v5394_v4, %v5390_v55  ;;  %v2962_v2 = vpack.c.bf16 %v2960_v63, %v2960_v63 }
0x1aec   :  { %5108 = vmatmul.mubr.msk.bf16.vlgmr.msra.gmra.mrb[88].mxu1 %vm370_vm3, %v2962_v2  ;;  %v2963_v39 = vpack.c.bf16 %v2961_v1, %v2961_v1 }
0x1aed   :  { %5118 = vmatpush3.bf16.msra.mxu1 %v3061_v6  ;;  %5119 = vmatprep.mubr.msk.bf16.mxu1 %vm5467_vm2, %v5466_v0 }
0x1aee   :  { %5114 = vmatmul.mubr.msk.bf16.vlgmr.msra.gmra.mrb[96].mxu0 %vm370_vm3, %v2963_v39  ;;  %5131 = vmatprep.subr.bf16.mxu1 %v5466_v0 }
0x1aef   :  { %5124 = vmatpush3.bf16.msra.mxu0 %v5311_v37  ;;  %5127 = vmatprep.mubr.msk.bf16.mxu0 %vm5467_vm2, %v5466_v0 }
0x1af0   :  { %5125 = vmatprep.subr.bf16.mxu0 %v5466_v0 }
0x1af3   :  { %5126 = vmatpush3.bf16.msra.mxu0 %v5312_v3 }
0x1af4   :  { %5139 = vmatprep.subr.bf16.mxu0 %v5466_v0 }
0x1af6   :  { %5128 = vmatmul.mubr.msk.bf16.vlgmr.msra.gmra.mrb[100].mxu0 %vm133_vm1, %v6072_v48 }
0x1af7   :  { %5140 = vmatpush3.bf16.msra.mxu0 %v5313_v5  ;;  %5143 = vmatprep.mubr.msk.bf16.mxu0 %vm5467_vm2, %v5466_v0 }
0x1af8   :  { %5141 = vmatprep.subr.bf16.mxu0 %v5466_v0 }
0x1afb   :  { %5142 = vmatpush3.bf16.msra.mxu0 %v5314_v7 }
0x1afc   :  { %5153 = vmatprep.subr.bf16.mxu0 %v5466_v0 }
0x1afe   :  { %5144 = vmatmul.mubr.msk.bf16.vlgmr.msra.gmra.mrb[104].mxu0 %vm133_vm1, %v6072_v48 }
0x1aff   :  { %5155 = vmatprep.mubr.msk.bf16.mxu0 %vm5467_vm2, %v5466_v0 }
0x1bbf   :  { %v3004_v8 = vpop.f32.mrb[88].mxu1 }
0x1bc0   :  { %v5109_v9 = vpop.f32.mrb[89].mxu1 }
0x1bc1   :  { %v3007_v10 = vpop.f32.mrb[90].mxu1  ;;  %v3050_v11 = vpop.f32.mrb[96].mxu0 }
0x1bc2   :  { %v3056_v13 = vpack.c.bf16 %v3050_v11, %v3004_v8  ;;  %v5110_v17 = vpop.f32.mrb[91].mxu1  ;;  %v5115_v18 = vpop.f32.mrb[97].mxu0 }
0x1bc3   :  { %v3053_v14 = vpop.f32.mrb[98].mxu0 }
0x1bc4   :  { %v5116_v15 = vpop.f32.mrb[99].mxu0  ;;  %5120 = vmatmul.mubr.msk.bf16.vlgmr.msra.gmra.mrb[92].mxu1 %vm370_vm3, %v3056_v13 }
0x1bc5   :  { %5132 = vmatpush3.bf16.msra.mxu1 %v5315_v12  ;;  %5135 = vmatprep.mubr.msk.bf16.mxu1 %vm5467_vm2, %v5466_v0 }
0x1bc6   :  { %5133 = vmatprep.subr.bf16.mxu1 %v5466_v0 }
0x1bc9   :  { %v3168_v19 = vpop.f32.mrb[100].mxu0  ;;  %5134 = vmatpush3.bf16.msra.mxu1 %v5316_v16 }
0x1bca   :  { %v5129_v21 = vpop.f32.mrb[101].mxu0  ;;  %5147 = vmatprep.subr.bf16.mxu1 %v5466_v0  ;;  %v3169_v29 = vadd.f32 %v4559_v47, %v3168_v19 }
0x1bcb   :  { %v3171_v22 = vpop.f32.mrb[102].mxu0 }
0x1bcc   :  { %v5130_v23 = vpop.f32.mrb[103].mxu0  ;;  %5136 = vmatmul.mubr.msk.bf16.vlgmr.msra.gmra.mrb[96].mxu1 %vm133_vm1, %v6072_v48  ;;  %v3172_v52 = vadd.f32 %v4559_v47, %v3171_v22  ;;  %v3291_v55 = vpack.c.bf16 %v3169_v29, %v3169_v29 }
0x1bcd   :  { %5149 = vmatprep.mubr.msk.bf16.mxu1 %vm5467_vm2, %v5466_v0  ;;  %v3116_v23 = vld [vmem:[%s6467_s2 + $0x1e0] sm:$0xf] }
0x1bce   :  { %v3292_v59 = vpack.c.bf16 %v3172_v52, %v3172_v52 }
0x1bd1   :  { %v3284_v24 = vpop.f32.mrb[104].mxu0 }
0x1bd2   :  { %v5145_v25 = vpop.f32.mrb[105].mxu0  ;;  %v3285_v49 = vadd.f32 %v4567_v41, %v3284_v24 }
0x1bd3   :  { %v3287_v26 = vpop.f32.mrb[106].mxu0 }
0x1bd4   :  { %v5146_v27 = vpop.f32.mrb[107].mxu0  ;;  %v3288_v32 = vadd.f32 %v4567_v41, %v3287_v26  ;;  %v3295_v53 = vpack.c.bf16 %v3285_v49, %v3285_v49 }
0x1bd6   :  { %v3296_v56 = vpack.c.bf16 %v3288_v32, %v3288_v32  ;;  %v3419_v60 = vsel %vm492_vm4, %v3295_v53, 0  ;;  %v5322_v32 = vld [vmem:[%s6467_s2 + $0x188] sm:$0xff]  }
0x1bd8   :  { %v3465_v61 = vsel %vm492_vm4, %v3296_v56, 0 }
0x1c97   :  { %v6243_v28 = vpop.f32.mrb[92].mxu1 }
0x1c98   :  { %v5121_v30 = vpop.f32.mrb[93].mxu1 }
0x1c99   :  { %v6245_v31 = vpop.f32.mrb[94].mxu1  ;;  %v3512_v30 = vsel %vm492_vm4, %v3116_v23, 0 }
0x1c9a   :  { %v5122_v34 = vpop.f32.mrb[95].mxu1 }
0x1c9b   :  { %v5317_v34 = vld [vmem:[%s6467_s2 + $0x140] sm:$0xff]  }
0x1c9f   :  { %v3226_v36 = vpop.f32.mrb[96].mxu1 }
0x1ca0   :  { %v3227_v38 = vadd.f32 %v4563_v35, %v3226_v36  ;;  %v5137_v40 = vpop.f32.mrb[97].mxu1  ;;  %v5318_v36 = vld [vmem:[%s6467_s2 + $0x148] sm:$0xff]  }
0x1ca1   :  { %v3229_v42 = vpop.f32.mrb[98].mxu1  ;;  %v5320_v40 = vld [vmem:[%s6467_s2 + $0x1c8] sm:$0xff]  }
0x1ca2   :  { %v3293_v43 = vpack.c.bf16 %v3227_v38, %v3227_v38  ;;  %v3230_v20 = vadd.f32 %v4563_v35, %v3229_v42  ;;  %v5138_v44 = vpop.f32.mrb[99].mxu1  ;;  %v5319_v38 = vld [vmem:[%s6467_s2 + $0x1c0] sm:$0xff]  }
0x1ca3   :  { %v5321_v44 = vld [vmem:[%s6467_s2 + $0x180] sm:$0xff]  }
0x1ca4   :  { %v3301_v50 = vsel %vm370_vm3, %v3293_v43, 0  ;;  %v3294_v51 = vpack.c.bf16 %v3230_v20, %v3230_v20 }
0x1ca5   :  { %5148 = vmatpush3.bf16.xpose.msra.mxu1 %v3301_v50 }
0x1ca6   :  { %v3347_v33 = vsel %vm370_vm3, %v3294_v51, 0  ;;  %5159 = vmatprep.subr.bf16.mxu1 %v5466_v0 }
0x1ca7   :  { %5154 = vmatpush3.bf16.xpose.msra.mxu0 %v3347_v33 }
0x1ca8   :  { %5165 = vmatprep.subr.bf16.mxu0 %v5466_v0 }
0x1cac   :  { %5150 = vmatmul.mubr.msk.bf16.vlgmr.msra.gmra.mrb[100].mxu1 %vm370_vm3, %v3291_v55 }
0x1cad   :  { %5160 = vmatpush3.bf16.msra.mxu1 %v3419_v60  ;;  %5161 = vmatprep.mubr.msk.bf16.mxu1 %vm5467_vm2, %v5466_v0 }
0x1cae   :  { %5156 = vmatmul.mubr.msk.bf16.vlgmr.msra.gmra.mrb[108].mxu0 %vm370_vm3, %v3292_v59  ;;  %5171 = vmatprep.subr.bf16.mxu1 %v5466_v0 }
0x1caf   :  { %5166 = vmatpush3.bf16.msra.mxu0 %v3465_v61  ;;  %5167 = vmatprep.mubr.msk.bf16.mxu0 %vm5467_vm2, %v5466_v0 }
0x1cb0   :  { %5177 = vmatprep.subr.bf16.mxu0 %v5466_v0 }
0x1d7f   :  { %v3337_v62 = vpop.f32.mrb[100].mxu1 }
0x1d80   :  { %v3389_v63 = vmul.f32 0.35355338, %v3337_v62  ;;  %v5151_v4 = vpop.f32.mrb[101].mxu1 }
0x1d81   :  { %v3340_v1 = vpop.f32.mrb[102].mxu1  ;;  %v3383_v2 = vpop.f32.mrb[108].mxu0 }
0x1d82   :  { %v3390_v6 = vmul.f32 0.35355338, %v3383_v2  ;;  %v5152_v37 = vpop.f32.mrb[103].mxu1  ;;  %v5157_v39 = vpop.f32.mrb[109].mxu0  ;;  %v3391_v3 = vsel %vm370_vm3, %v3389_v63, -inf }
0x1d83   :  { %3392 = vmax.xlane.f32.xlu0 %v3391_v3  ;;  %v3386_v5 = vpop.f32.mrb[110].mxu0  ;;  %v4580_v2 = vld [vmem:[%s6468_s3 + $0x1c] ss:$0 sm:$0xff]  ;;  %v4584_v39 = vld [vmem:[%s6468_s3 + $0x20] ss:$0 sm:$0xff] }
0x1d84   :  { %v5158_v7 = vpop.f32.mrb[111].mxu0  ;;  %v3394_v8 = vsel %vm370_vm3, %v3390_v6, -inf }
0x1d85   :  { %3395 = vmax.xlane.f32.xlu1 %v3394_v8 }
0x1e10   :  { %v3393_v9 = vpop.xlane.xlu0 %3392 }
0x1e11   :  { %v3397_v10 = vsub.f32 %v3389_v63, %v3393_v9  ;;  %v4576_v9 = vld [vmem:[%s6468_s3 + $0x18] ss:$0 sm:$0xff] }
0x1e12   :  { %v3396_v11 = vpop.xlane.xlu1 %3395 }
0x1e13   :  { %v3399_v12 = vmul.f32 1.442695, %v3397_v10  ;;  %v3398_v13 = vsub.f32 %v3390_v6, %v3396_v11 }
0x1e15   :  { %5395 = vpow2.f32 %v3399_v12  ;;  %v3401_v17 = vmul.f32 1.442695, %v3398_v13 }
0x1e17   :  { %5397 = vpow2.f32 %v3401_v17 }
0x1e1f   :  { %v5396_v18 = vpop.eup %5395 }
0x1e20   :  { %v3403_v14 = vsel %vm370_vm3, %v5396_v18, 0.0 }
0x1e21   :  { %v5398_v15 = vpop.eup %5397  ;;  %3404 = vadd.xlane.f32.xlu0 %v3403_v14 }
0x1e22   :  { %v3406_v16 = vsel %vm370_vm3, %v5398_v15, 0.0 }
0x1e23   :  { %3407 = vadd.xlane.f32.xlu1 %v3406_v16 }
0x1eae   :  { %v3405_v19 = vpop.xlane.xlu0 %3404 }
0x1eaf   :  { %5399 = vrcp.f32 %v3405_v19 }
0x1eb0   :  { %v3408_v21 = vpop.xlane.xlu1 %3407 }
0x1eb1   :  { %5401 = vrcp.f32 %v3408_v21 }
0x1eb9   :  { %v5400_v22 = vpop.eup %5399 }
0x1eba   :  { %v3411_v24 = vmul.f32 %v5400_v22, %v5396_v18 }
0x1ebb   :  { %v5402_v25 = vpop.eup %5401 }
0x1ebc   :  { %v3412_v26 = vmul.f32 %v5402_v25, %v5398_v15  ;;  %v3413_v27 = vpack.c.bf16 %v3411_v24, %v3411_v24 }
0x1ebe   :  { %5162 = vmatmul.mubr.msk.bf16.vlgmr.msra.gmra.mrb[104].mxu1 %vm370_vm3, %v3413_v27  ;;  %v3414_v35 = vpack.c.bf16 %v3412_v26, %v3412_v26 }
0x1ebf   :  { %5172 = vmatpush3.bf16.msra.mxu1 %v3512_v30  ;;  %5173 = vmatprep.mubr.msk.bf16.mxu1 %vm5467_vm2, %v5466_v0 }
0x1ec0   :  { %5168 = vmatmul.mubr.msk.bf16.vlgmr.msra.gmra.mrb[112].mxu0 %vm370_vm3, %v3414_v35  ;;  %5185 = vmatprep.subr.bf16.mxu1 %v5466_v0 }
0x1ec1   :  { %5178 = vmatpush3.bf16.msra.mxu0 %v5317_v34  ;;  %5181 = vmatprep.mubr.msk.bf16.mxu0 %vm5467_vm2, %v5466_v0 }
0x1ec2   :  { %5179 = vmatprep.subr.bf16.mxu0 %v5466_v0 }
0x1ec5   :  { %5180 = vmatpush3.bf16.msra.mxu0 %v5318_v36 }
0x1ec6   :  { %5193 = vmatprep.subr.bf16.mxu0 %v5466_v0 }
0x1ec8   :  { %5182 = vmatmul.mubr.msk.bf16.vlgmr.msra.gmra.mrb[116].mxu0 %vm133_vm1, %v6072_v48 }
0x1ec9   :  { %5194 = vmatpush3.bf16.msra.mxu0 %v5319_v38  ;;  %5197 = vmatprep.mubr.msk.bf16.mxu0 %vm5467_vm2, %v5466_v0 }
0x1eca   :  { %5195 = vmatprep.subr.bf16.mxu0 %v5466_v0 }
0x1ecd   :  { %5196 = vmatpush3.bf16.msra.mxu0 %v5320_v40 }
0x1ece   :  { %5207 = vmatprep.subr.bf16.mxu0 %v5466_v0 }
0x1ed0   :  { %5198 = vmatmul.mubr.msk.bf16.vlgmr.msra.gmra.mrb[120].mxu0 %vm133_vm1, %v6072_v48 }
0x1ed1   :  { %5209 = vmatprep.mubr.msk.bf16.mxu0 %vm5467_vm2, %v5466_v0 }
0x1f91   :  { %v3455_v41 = vpop.f32.mrb[104].mxu1 }
0x1f92   :  { %v5163_v42 = vpop.f32.mrb[105].mxu1 }
0x1f93   :  { %v3458_v43 = vpop.f32.mrb[106].mxu1  ;;  %v3501_v20 = vpop.f32.mrb[112].mxu0 }
0x1f94   :  { %v3507_v47 = vpack.c.bf16 %v3501_v20, %v3455_v41  ;;  %v5164_v49 = vpop.f32.mrb[107].mxu1  ;;  %v5169_v50 = vpop.f32.mrb[113].mxu0 }
0x1f95   :  { %v3504_v51 = vpop.f32.mrb[114].mxu0 }
0x1f96   :  { %v5170_v29 = vpop.f32.mrb[115].mxu0  ;;  %5174 = vmatmul.mubr.msk.bf16.vlgmr.msra.gmra.mrb[108].mxu1 %vm370_vm3, %v3507_v47 }
0x1f97   :  { %5186 = vmatpush3.bf16.msra.mxu1 %v5321_v44  ;;  %5189 = vmatprep.mubr.msk.bf16.mxu1 %vm5467_vm2, %v5466_v0 }
0x1f98   :  { %5187 = vmatprep.subr.bf16.mxu1 %v5466_v0 }
0x1f9b   :  { %v3619_v33 = vpop.f32.mrb[116].mxu0  ;;  %5188 = vmatpush3.bf16.msra.mxu1 %v5322_v32 }
0x1f9c   :  { %v5183_v52 = vpop.f32.mrb[117].mxu0  ;;  %5201 = vmatprep.subr.bf16.mxu1 %v5466_v0  ;;  %v3620_v13 = vadd.f32 %v4576_v9, %v3619_v33 }
0x1f9d   :  { %v3622_v53 = vpop.f32.mrb[118].mxu0 }
0x1f9e   :  { %v5184_v55 = vpop.f32.mrb[119].mxu0  ;;  %5190 = vmatmul.mubr.msk.bf16.vlgmr.msra.gmra.mrb[112].mxu1 %vm133_vm1, %v6072_v48  ;;  %v3623_v14 = vadd.f32 %v4576_v9, %v3622_v53  ;;  %v3742_v16 = vpack.c.bf16 %v3620_v13, %v3620_v13 }
0x1f9f   :  { %5203 = vmatprep.mubr.msk.bf16.mxu1 %vm5467_vm2, %v5466_v0 }
0x1fa0   :  { %v3743_v21 = vpack.c.bf16 %v3623_v14, %v3623_v14 }
0x1fa3   :  { %v3735_v56 = vpop.f32.mrb[120].mxu0 }
0x1fa4   :  { %v5199_v59 = vpop.f32.mrb[121].mxu0  ;;  %v3736_v10 = vadd.f32 %v4584_v39, %v3735_v56  ;;  %v3567_v56 = vld [vmem:[%s6467_s2 + $0x1e8] sm:$0xf] }
0x1fa5   :  { %v3738_v60 = vpop.f32.mrb[122].mxu0 }
0x1fa6   :  { %v5200_v61 = vpop.f32.mrb[123].mxu0  ;;  %v3739_v17 = vadd.f32 %v4584_v39, %v3738_v60  ;;  %v3746_v15 = vpack.c.bf16 %v3736_v10, %v3736_v10 }
0x1fa7   :  { %v2258_v61 = vld [vmem:[%s6467_s2 + $0x1d0] sm:$0xf] }
0x1fa8   :  { %v3747_v19 = vpack.c.bf16 %v3739_v17, %v3739_v17  ;;  %v3870_v22 = vsel %vm492_vm4, %v3746_v15, 0 }
0x1faa   :  { %v3916_v23 = vsel %vm492_vm4, %v3747_v19, 0 }
0x2069   :  { %v6324_v62 = vpop.f32.mrb[108].mxu1 }
0x206a   :  { %v5175_v63 = vpop.f32.mrb[109].mxu1 }
0x206b   :  { %v6326_v4 = vpop.f32.mrb[110].mxu1 }
0x206c   :  { %v5176_v1 = vpop.f32.mrb[111].mxu1 }
0x2071   :  { %v3677_v6 = vpop.f32.mrb[112].mxu1 }
0x2072   :  { %v3678_v37 = vadd.f32 %v4580_v2, %v3677_v6  ;;  %v5191_v48 = vpop.f32.mrb[113].mxu1 }
0x2073   :  { %v3680_v3 = vpop.f32.mrb[114].mxu1 }
0x2074   :  { %v3744_v5 = vpack.c.bf16 %v3678_v37, %v3678_v37  ;;  %v3681_v7 = vadd.f32 %v4580_v2, %v3680_v3  ;;  %v5192_v8 = vpop.f32.mrb[115].mxu1  ;;  %v3963_v2 = vsel %vm492_vm4, %v3567_v56, 0  ;;  %v4010_v37 = vsel %vm492_vm4, %v2258_v61, 0  ;;  %v4596_v56 = vld [vmem:[%s6468_s3 + $0x23] ss:$0 sm:$0xff] }
0x2076   :  { %v3752_v11 = vsel %vm370_vm3, %v3744_v5, 0  ;;  %v3745_v12 = vpack.c.bf16 %v3681_v7, %v3681_v7 }
0x2077   :  { %5202 = vmatpush3.bf16.xpose.msra.mxu1 %v3752_v11 }
0x2078   :  { %v3798_v18 = vsel %vm370_vm3, %v3745_v12, 0  ;;  %5213 = vmatprep.subr.bf16.mxu1 %v5466_v0 }
0x2079   :  { %5208 = vmatpush3.bf16.xpose.msra.mxu0 %v3798_v18 }
0x207a   :  { %5219 = vmatprep.subr.bf16.mxu0 %v5466_v0 }
0x207e   :  { %5204 = vmatmul.mubr.msk.bf16.vlgmr.msra.gmra.mrb[116].mxu1 %vm370_vm3, %v3742_v16  ;;  %v4594_v16 = vld [vmem:[%s6468_s3 + $0x21] ss:$0 sm:$0xff] }
0x207f   :  { %5214 = vmatpush3.bf16.msra.mxu1 %v3870_v22  ;;  %5215 = vmatprep.mubr.msk.bf16.mxu1 %vm5467_vm2, %v5466_v0 }
0x2080   :  { %5210 = vmatmul.mubr.msk.bf16.vlgmr.msra.gmra.mrb[124].mxu0 %vm370_vm3, %v3743_v21  ;;  %5225 = vmatprep.subr.bf16.mxu1 %v5466_v0 }
0x2081   :  { %5220 = vmatpush3.bf16.msra.mxu0 %v3916_v23  ;;  %5221 = vmatprep.mubr.msk.bf16.mxu0 %vm5467_vm2, %v5466_v0 }
0x2082   :  { %5231 = vmatprep.subr.bf16.mxu0 %v5466_v0 }
0x2151   :  { %v3788_v24 = vpop.f32.mrb[116].mxu1 }
0x2152   :  { %v3840_v25 = vmul.f32 0.35355338, %v3788_v24  ;;  %v5205_v26 = vpop.f32.mrb[117].mxu1 }
0x2153   :  { %v3791_v27 = vpop.f32.mrb[118].mxu1  ;;  %v3834_v30 = vpop.f32.mrb[124].mxu0 }
0x2154   :  { %v3841_v34 = vmul.f32 0.35355338, %v3834_v30  ;;  %v5206_v35 = vpop.f32.mrb[119].mxu1  ;;  %v5211_v36 = vpop.f32.mrb[125].mxu0  ;;  %v3842_v38 = vsel %vm370_vm3, %v3840_v25, -inf }
0x2155   :  { %3843 = vmax.xlane.f32.xlu0 %v3842_v38  ;;  %v3837_v40 = vpop.f32.mrb[126].mxu0 }
0x2156   :  { %v5212_v41 = vpop.f32.mrb[127].mxu0  ;;  %v3845_v42 = vsel %vm370_vm3, %v3841_v34, -inf }
0x2157   :  { %3846 = vmax.xlane.f32.xlu1 %v3845_v42 }
0x21e2   :  { %v3844_v43 = vpop.xlane.xlu0 %3843 }
0x21e3   :  { %v3848_v20 = vsub.f32 %v3840_v25, %v3844_v43  ;;  %v5324_v43 = vld [vmem:[%s6467_s2 + $0x1f8] sm:$0xff]  }
0x21e4   :  { %v3847_v44 = vpop.xlane.xlu1 %3846 }
0x21e5   :  { %v3850_v47 = vmul.f32 1.442695, %v3848_v20  ;;  %v3849_v49 = vsub.f32 %v3841_v34, %v3847_v44 }
0x21e7   :  { %5403 = vpow2.f32 %v3850_v47  ;;  %v3852_v50 = vmul.f32 1.442695, %v3849_v49 }
0x21e9   :  { %5405 = vpow2.f32 %v3852_v50 }
0x21f1   :  { %v5404_v51 = vpop.eup %5403 }
0x21f2   :  { %v3854_v29 = vsel %vm370_vm3, %v5404_v51, 0.0 }
0x21f3   :  { %v5406_v32 = vpop.eup %5405  ;;  %3855 = vadd.xlane.f32.xlu0 %v3854_v29 }
0x21f4   :  { %v3857_v33 = vsel %vm370_vm3, %v5406_v32, 0.0 }
0x21f5   :  { %3858 = vadd.xlane.f32.xlu1 %v3857_v33 }
0x2280   :  { %v3856_v52 = vpop.xlane.xlu0 %3855 }
0x2281   :  { %5407 = vrcp.f32 %v3856_v52 }
0x2282   :  { %v3859_v53 = vpop.xlane.xlu1 %3858 }
0x2283   :  { %5409 = vrcp.f32 %v3859_v53 }
0x228b   :  { %v5408_v55 = vpop.eup %5407 }
0x228c   :  { %v3862_v59 = vmul.f32 %v5408_v55, %v5404_v51 }
0x228d   :  { %v5410_v60 = vpop.eup %5409 }
0x228e   :  { %v3863_v63 = vmul.f32 %v5410_v60, %v5406_v32  ;;  %v3864_v1 = vpack.c.bf16 %v3862_v59, %v3862_v59  ;;  %v4595_v32 = vld [vmem:[%s6468_s3 + $0x22] ss:$0 sm:$0xff] }
0x2290   :  { %5216 = vmatmul.mubr.msk.bf16.vlgmr.msra.gmra.mrb[120].mxu1 %vm370_vm3, %v3864_v1  ;;  %v3865_v6 = vpack.c.bf16 %v3863_v63, %v3863_v63  ;;  %v5325_v1 = vld [vmem:[%s6467_s2 + $0x200] sm:$0xff]  }
0x2291   :  { %5226 = vmatpush3.bf16.msra.mxu1 %v3963_v2  ;;  %5227 = vmatprep.mubr.msk.bf16.mxu1 %vm5467_vm2, %v5466_v0  ;;  %v5326_v2 = vld [vmem:[%s6467_s2 + $0x208] sm:$0xff]  }
0x2292   :  { %5222 = vmatmul.mubr.msk.bf16.vlgmr.msra.gmra.mrb[128].mxu0 %vm370_vm3, %v3865_v6  ;;  %5237 = vmatprep.subr.bf16.mxu1 %v5466_v0  ;;  %v5327_v6 = vld [vmem:[%s6467_s2 + $0x210] sm:$0xff]  }
0x2293   :  { %5232 = vmatpush3.bf16.msra.mxu0 %v4010_v37  ;;  %5233 = vmatprep.mubr.msk.bf16.mxu0 %vm5467_vm2, %v5466_v0  ;;  %v5328_v37 = vld [vmem:[%s6467_s2 + $0x218] sm:$0xff]  }
0x2294   :  { %5245 = vmatprep.subr.bf16.mxu0 %v5466_v0 }
0x229a   :  { %5234 = vmatmul.mubr.msk.bf16.vlgmr.msra.gmra.mrb[132].mxu0 %vm370_vm3, %v2652_v58 }
0x229b   :  { %5253 = vmatprep.mubr.msk.bf16.mxu0 %vm5467_vm2, %v5466_v0  ;;  %5246 = vmatpush3.bf16.msra.mxu0 %v5325_v1 }
0x229c   :  { %5247 = vmatprep.subr.bf16.mxu0 %v5466_v0 }
0x229f   :  { %5248 = vmatpush3.bf16.msra.mxu0 %v5326_v2 }
0x22a0   :  { %5249 = vmatprep.subr.bf16.mxu0 %v5466_v0 }
0x22a3   :  { %5250 = vmatpush3.bf16.msra.mxu0 %v5327_v6 }
0x22a4   :  { %5251 = vmatprep.subr.bf16.mxu0 %v5466_v0 }
0x22a7   :  { %5252 = vmatpush3.bf16.msra.mxu0 %v5328_v37 }
0x2363   :  { %v3906_v48 = vpop.f32.mrb[120].mxu1 }
0x2364   :  { %v5217_v39 = vpop.f32.mrb[121].mxu1 }
0x2365   :  { %v3909_v3 = vpop.f32.mrb[122].mxu1  ;;  %v3952_v5 = vpop.f32.mrb[128].mxu0 }
0x2366   :  { %v3958_v7 = vpack.c.bf16 %v3952_v5, %v3906_v48  ;;  %v5218_v8 = vpop.f32.mrb[123].mxu1  ;;  %v5223_v9 = vpop.f32.mrb[129].mxu0  ;;  %v4597_v48 = vld [vmem:[%s6468_s3 + $0x24] ss:$0 sm:$0xff] }
0x2367   :  { %v3955_v10 = vpop.f32.mrb[130].mxu0 }
0x2368   :  { %v5224_v11 = vpop.f32.mrb[131].mxu0  ;;  %5228 = vmatmul.mubr.msk.bf16.vlgmr.msra.gmra.mrb[124].mxu1 %vm370_vm3, %v3958_v7 }
0x2369   :  { %5241 = vmatprep.mubr.msk.bf16.mxu1 %vm5467_vm2, %v5466_v0 }
0x236d   :  { %v4046_v54 = vpop.f32.mrb[132].mxu0 }
0x236e   :  { %v4047_v57 = vadd.f32 %v4046_v54, %v6243_v28  ;;  %v5235_v58 = vpop.f32.mrb[133].mxu0 }
0x236f   :  { %v4049_v12 = vpop.f32.mrb[134].mxu0 }
0x2370   :  { %v4050_v13 = vadd.f32 %v4049_v12, %v6245_v31  ;;  %v5236_v17 = vpop.f32.mrb[135].mxu0  ;;  %v4053_v18 = vadd.f32 %v4047_v57, %v6324_v62 }
0x2372   :  { %v4054_v14 = vadd.f32 %v4050_v13, %v6326_v4 }
0x243b   :  { %v3999_v15 = vpop.f32.mrb[124].mxu1 }
0x243c   :  { %v4055_v19 = vadd.f32 %v4053_v18, %v3999_v15  ;;  %v5229_v21 = vpop.f32.mrb[125].mxu1 }
0x243d   :  { %v4002_v22 = vpop.f32.mrb[126].mxu1 }
0x243e   :  { %v4062_v23 = vadd.f32 %v4594_v16, %v4055_v19  ;;  %v4056_v24 = vadd.f32 %v4054_v14, %v4002_v22  ;;  %v5230_v28 = vpop.f32.mrb[127].mxu1 }
0x2440   :  { %v4063_v25 = vadd.f32 %v4594_v16, %v4056_v24  ;;  %v4064_v26 = vadd.f32 %v4062_v23, %v6063_v45 }
0x2442   :  { %v4068_v31 = vsel %vm133_vm1, %v4064_v26, 0.0  ;;  %v4065_v62 = vadd.f32 %v4063_v25, %v6065_v46  ;;  %v5323_v46 = vld [vmem:[%s6467_s2 + $0x1f0] sm:$0xff]  }
0x2443   :  { %4069 = vadd.xlane.f32.xlu0 %v4068_v31  ;;  %5238 = vmatpush3.bf16.msra.mxu1 %v5323_v46 }
0x2444   :  { %v4071_v4 = vsel %vm133_vm1, %v4065_v62, 0.0  ;;  %5239 = vmatprep.subr.bf16.mxu1 %v5466_v0 }
0x2445   :  { %4072 = vadd.xlane.f32.xlu1 %v4071_v4 }
0x2447   :  { %5240 = vmatpush3.bf16.msra.mxu1 %v5324_v43 }
0x2448   :  { %5257 = vmatprep.subr.bf16.mxu1 %v5466_v0 }
0x24d0   :  { %v4070_v27 = vpop.xlane.xlu0 %4069 }
0x24d1   :  { %v4074_v30 = vmul.f32 0.03125, %v4070_v27 }
0x24d2   :  { %v4073_v34 = vpop.xlane.xlu1 %4072 }
0x24d3   :  { %v4076_v35 = vsub.f32 %v4064_v26, %v4074_v30  ;;  %v4075_v36 = vmul.f32 0.03125, %v4073_v34  ;;  %v4601_v26 = vld [vmem:[%s6468_s3 + $0x25] ss:$0 sm:$0xff] }
0x24d5   :  { %v4077_v38 = vsub.f32 %v4065_v62, %v4075_v36  ;;  %v4078_v40 = vmul.f32 %v4076_v35, %v4076_v35 }
0x24d7   :  { %v4080_v41 = vsel %vm133_vm1, %v4078_v40, 0.0  ;;  %v4079_v42 = vmul.f32 %v4077_v38, %v4077_v38 }
0x24d8   :  { %4081 = vadd.xlane.f32.xlu0 %v4080_v41 }
0x24d9   :  { %v4083_v45 = vsel %vm133_vm1, %v4079_v42, 0.0 }
0x24da   :  { %4084 = vadd.xlane.f32.xlu1 %v4083_v45 }
0x2565   :  { %v4082_v20 = vpop.xlane.xlu0 %4081 }
0x2566   :  { %v4086_v44 = vmul.f32 0.03125, %v4082_v20 }
0x2567   :  { %v4085_v47 = vpop.xlane.xlu1 %4084 }
0x2568   :  { %v4088_v49 = vadd.f32 1e-05, %v4086_v44  ;;  %v4087_v50 = vmul.f32 0.03125, %v4085_v47 }
0x256a   :  { %5411 = vrsqrt.f32 %v4088_v49  ;;  %v4089_v51 = vadd.f32 1e-05, %v4087_v50 }
0x256c   :  { %5413 = vrsqrt.f32 %v4089_v51  ;;  %v5329_v51 = vld [vmem:[%s6467_s2 + $0x220] sm:$0xff]  }
0x2574   :  { %v5412_v29 = vpop.eup %5411 }
0x2575   :  { %v4092_v33 = vmul.f32 %v5412_v29, %v4076_v35  ;;  %v5330_v29 = vld [vmem:[%s6467_s2 + $0x228] sm:$0xff]  }
0x2576   :  { %v5414_v52 = vpop.eup %5413 }
0x2577   :  { %v4098_v53 = vmul.f32 %v4595_v32, %v4092_v33  ;;  %v4093_v55 = vmul.f32 %v5414_v52, %v4077_v38 }
0x2579   :  { %v4099_v59 = vmul.f32 %v4595_v32, %v4093_v55  ;;  %v4104_v60 = vadd.f32 %v4596_v56, %v4098_v53 }
0x257b   :  { %v4105_v61 = vadd.f32 %v4596_v56, %v4099_v59 }
0x257d   :  { %v4106_v63 = vpack.c.bf16 %v4105_v61, %v4104_v60 }
0x257f   :  { %5242 = vmatmul.mubr.msk.bf16.vlgmr.msra.gmra.mrb[128].mxu1 %vm133_vm1, %v4106_v63  ;;  %v4608_v63 = vld [vmem:[%s6468_s3 + $0x27] ss:$0 sm:$0xff] }
0x2580   :  { %5261 = vmatprep.mubr.msk.bf16.mxu1 %vm5467_vm2, %v5466_v0  ;;  %5258 = vmatpush3.bf16.msra.mxu1 %v5329_v51 }
0x2581   :  { %5259 = vmatprep.subr.bf16.mxu1 %v5466_v0 }
0x2584   :  { %5260 = vmatpush3.bf16.msra.mxu1 %v5330_v29 }
0x2652   :  { %v4173_v39 = vpop.f32.mrb[128].mxu1 }
0x2653   :  { %v4174_v3 = vadd.f32 %v4597_v48, %v4173_v39  ;;  %v5243_v5 = vpop.f32.mrb[129].mxu1 }
0x2654   :  { %v4176_v7 = vpop.f32.mrb[130].mxu1 }
0x2655   :  { %v4180_v8 = vmul.f32 %v4174_v3, %v4174_v3  ;;  %v4177_v9 = vadd.f32 %v4597_v48, %v4176_v7  ;;  %v5244_v10 = vpop.f32.mrb[131].mxu1 }
0x2657   :  { %v4182_v11 = vmul.f32 %v4180_v8, %v4174_v3  ;;  %v4181_v54 = vmul.f32 %v4177_v9, %v4177_v9  ;;  %v4609_v8 = vld [vmem:[%s6468_s3 + $0x28] ss:$0 sm:$0xff] }
0x2659   :  { %v4184_v57 = vmul.f32 0.044715, %v4182_v11  ;;  %v4183_v58 = vmul.f32 %v4181_v54, %v4177_v9 }
0x265b   :  { %v4186_v12 = vadd.f32 %v4184_v57, %v4174_v3  ;;  %v4185_v13 = vmul.f32 0.044715, %v4183_v58 }
0x265d   :  { %v4188_v17 = vmul.f32 0.7978846, %v4186_v12  ;;  %v4187_v18 = vadd.f32 %v4185_v13, %v4177_v9 }
0x265f   :  { %5415 = vtanh.f32 %v4188_v17  ;;  %v4189_v14 = vmul.f32 0.7978846, %v4187_v18 }
0x2661   :  { %5417 = vtanh.f32 %v4189_v14 }
0x2669   :  { %v5416_v15 = vpop.eup %5415 }
0x266a   :  { %v4192_v16 = vadd.f32 1.0, %v5416_v15 }
0x266b   :  { %v5418_v19 = vpop.eup %5417 }
0x266c   :  { %v4194_v21 = vmul.f32 0.5, %v4192_v16  ;;  %v4193_v22 = vadd.f32 1.0, %v5418_v19 }
0x266e   :  { %v4195_v23 = vmul.f32 0.5, %v4193_v22  ;;  %v4196_v24 = vmul.f32 %v4194_v21, %v4174_v3 }
0x2670   :  { %v4197_v28 = vmul.f32 %v4195_v23, %v4177_v9 }
0x2672   :  { %v4198_v25 = vpack.c.bf16 %v4197_v28, %v4196_v24 }
0x2674   :  { %5254 = vmatmul.mubr.msk.bf16.vlgmr.msra.gmra.mrb[136].mxu0 %vm2158_vm5, %v4198_v25 }
0x2747   :  { %v4265_v31 = vpop.f32.mrb[136].mxu0 }
0x2748   :  { %v4266_v62 = vadd.f32 %v4601_v26, %v4265_v31  ;;  %v5255_v4 = vpop.f32.mrb[137].mxu0 }
0x2749   :  { %v4268_v27 = vpop.f32.mrb[138].mxu0 }
0x274a   :  { %v4269_v30 = vadd.f32 %v4601_v26, %v4268_v27  ;;  %v5256_v34 = vpop.f32.mrb[139].mxu0  ;;  %v4272_v35 = vadd.f32 %v4266_v62, %v4104_v60  ;;  %v4607_v60 = vld [vmem:[%s6468_s3 + $0x26] ss:$0 sm:$0xff] }
0x274c   :  { %v4276_v36 = vsel %vm133_vm1, %v4272_v35, 0.0  ;;  %v4273_v38 = vadd.f32 %v4269_v30, %v4105_v61 }
0x274d   :  { %4277 = vadd.xlane.f32.xlu0 %v4276_v36 }
0x274e   :  { %v4279_v40 = vsel %vm133_vm1, %v4273_v38, 0.0 }
0x274f   :  { %4280 = vadd.xlane.f32.xlu1 %v4279_v40 }
0x27da   :  { %v4278_v41 = vpop.xlane.xlu0 %4277 }
0x27db   :  { %v4282_v42 = vmul.f32 0.03125, %v4278_v41 }
0x27dc   :  { %v4281_v45 = vpop.xlane.xlu1 %4280 }
0x27dd   :  { %v4284_v46 = vsub.f32 %v4272_v35, %v4282_v42  ;;  %v4283_v43 = vmul.f32 0.03125, %v4281_v45 }
0x27df   :  { %v4285_v20 = vsub.f32 %v4273_v38, %v4283_v43  ;;  %v4286_v44 = vmul.f32 %v4284_v46, %v4284_v46 }
0x27e1   :  { %v4288_v47 = vsel %vm133_vm1, %v4286_v44, 0.0  ;;  %v4287_v49 = vmul.f32 %v4285_v20, %v4285_v20 }
0x27e2   :  { %4289 = vadd.xlane.f32.xlu0 %v4288_v47 }
0x27e3   :  { %v4291_v50 = vsel %vm133_vm1, %v4287_v49, 0.0 }
0x27e4   :  { %4292 = vadd.xlane.f32.xlu1 %v4291_v50 }
0x286f   :  { %v4290_v32 = vpop.xlane.xlu0 %4289 }
0x2870   :  { %v4294_v33 = vmul.f32 0.03125, %v4290_v32 }
0x2871   :  { %v4293_v52 = vpop.xlane.xlu1 %4292 }
0x2872   :  { %v4296_v53 = vadd.f32 1e-05, %v4294_v33  ;;  %v4295_v55 = vmul.f32 0.03125, %v4293_v52 }
0x2874   :  { %5419 = vrsqrt.f32 %v4296_v53  ;;  %v4297_v56 = vadd.f32 1e-05, %v4295_v55 }
0x2876   :  { %5421 = vrsqrt.f32 %v4297_v56 }
0x287e   :  { %v5420_v59 = vpop.eup %5419 }
0x287f   :  { %v4300_v61 = vmul.f32 %v5420_v59, %v4284_v46 }
0x2880   :  { %v5422_v0 = vpop.eup %5421 }
0x2881   :  { %v4306_v1 = vmul.f32 %v4607_v60, %v4300_v61  ;;  %v4301_v2 = vmul.f32 %v5422_v0, %v4285_v20 }
0x2883   :  { %v4312_v6 = vadd.f32 %v4608_v63, %v4306_v1  ;;  %v4307_v37 = vmul.f32 %v4607_v60, %v4301_v2 }
0x2885   :  { %v4313_v48 = vadd.f32 %v4608_v63, %v4307_v37  ;;  %v4315_v39 = vrot.slane %v4312_v6, 7 }
0x2887   :  { %v4318_v3 = vrot.slane %v4313_v48, 6 }
0x2889   :  { %v4321_v5 = vsel %vm4320_vm6, %v4315_v39, %v4318_v3 }
0x288a   :  { %v4326_v7 = vpack.c.bf16 %v4321_v5, %v4321_v5 }
0x288c   :  { %5262 = vmatmul.mubr.msk.bf16.vlgmr.msra.gmra.mrb[132].mxu1 %vm133_vm1, %v4326_v7 }
0x295f   :  { %v4381_v9 = vpop.f32.mrb[132].mxu1 }
0x2960   :  { %v4382_v10 = vadd.f32 %v4609_v8, %v4381_v9  ;;  %v5263_v11 = vpop.f32.mrb[133].mxu1 }
0x2961   :  { %v4384_v54 = vpop.f32.mrb[134].mxu1 }
0x2962   :  { %v4613_v57 = vmul.f32 -1.442695, %v4382_v10  ;;  %v5264_v58 = vpop.f32.mrb[135].mxu1 }
0x2964   :  { %5423 = vpow2.f32 %v4613_v57 }
0x296e   :  { %v5424_v12 = vpop.eup %5423 }
0x296f   :  { %v4390_v13 = vadd.f32 1.0, %v5424_v12 }
0x2971   :  { %5425 = vrcp.f32 %v4390_v13 }
0x297b   :  { %v5426_v17 = vpop.eup %5425 }
0x297c   :  { %4394 = vst.msk [vmem:[#allocation6] sm:$0x3] %vm4393_vm7, %v5426_v17 }
0x297d   :  { %5450 = shalt.err (!%p5447_p9)
}
0x297e   :  { %s5451_s7 = scalar_lea.hbm %s6469_s4, 32 }
0x297f   :  { %p5452_p10 = scmp.ne.s32.totalorder %s6469_s4, %s5451_s7  ;;  %p5455_p11 = scmp.lt.u32.totalorder %s5451_s7, %s6469_s4 }
0x2981   :  { %p5457_p12 = pnand %p5455_p11, %p5452_p10 }
0x2983   :  { %5460 = shalt.err (!%p5457_p12)
}
0x2984   :  { %4404 = dma.vmem_to_hbm [thread:$0]  %s4402_s15, 32, %s6469_s4, [#allocation4]  }
0x2985   :  { %5463 = dma.done.wait [#allocation4], 32  }
0x2986   :  { %5464 = vsyncadd [#allocation4], 4294967264 }
0x2987   :  { %4408 = vsyncpa [#allocation4], 1 }
0x2988   :  { %4409 = vsyncpa [#allocation5], 1 }

</bundles_post_ra>
